<compile_context>
chip_gen: v7x
topology: tpu7x:2x2x1
jax: 0.10.0
libtpu: 0.0.40
codegen_flags: <defaults>
</compile_context>

<pallas_src>
import functools

import jax
import jax.numpy as jnp
import numpy as np
from jax.experimental import pallas as pl
from jax.experimental.pallas import tpu as pltpu

_TARGET_TILE_BYTES = 8 << 20   # ~8 MiB streamed per grid step amortizes the ~0.35us step cost


def _vmem_limit_bytes():
    """Scoped-VMEM limit ~= 75% of physical: ~48 MiB on v7x (64 MiB/TC), ~96 MiB on v5e/v6e."""
    phys = 64 << 20                      # conservative default = v7x per-TensorCore VMEM
    try:
        phys = int(getattr(pltpu.get_tpu_info(), "vmem_capacity_bytes", phys))
    except Exception:
        pass
    return min(int(phys * 3 // 4), 100 << 20)


def _build_spatial_conv_matrix(sa_w, H, W):
    """(2*H*W, H*W) banded matrix K such that
       logit_flat = mean_flat @ K[:H*W] + max_flat @ K[H*W:]
    reproduces a 7x7 zero-padded 'same' conv with weights sa_w of shape (2, 7, 7)."""
    dy = jnp.arange(H)[:, None] - jnp.arange(H)[None, :]      # yi - yo  (H, H)
    dx = jnp.arange(W)[:, None] - jnp.arange(W)[None, :]      # xi - xo  (W, W)
    vy = jnp.abs(dy) <= 3
    vx = jnp.abs(dx) <= 3
    kyi = jnp.clip(dy + 3, 0, 6)
    kxi = jnp.clip(dx + 3, 0, 6)
    # (2, H, W, H, W): [c, yi, xi, yo, xo] = sa_w[c, yi-yo+3, xi-xo+3] if inside the 7x7 window
    k = sa_w[:, kyi[:, None, :, None], kxi[None, :, None, :]]
    mask = (vy[:, None, :, None] & vx[None, :, None, :]).astype(sa_w.dtype)
    k = k * mask[None]
    return k.reshape(2 * H * W, H * W).astype(jnp.float32)


def _choose_block_batch(B, C, HW, weight_bytes, stream_itemsize, vmem_budget):
    """Batch tile that reaches the streaming target while fitting: double-buffered streamed
    input + ~3 full-tile f32 temporaries + single-buffered resident weights."""
    per_b_f32 = C * HW * 4
    per_b_stream = C * HW * stream_itemsize
    cost_per_b = 2 * per_b_stream + 3 * per_b_f32
    avail = vmem_budget - weight_bytes - (2 << 20)            # slack for output/misc
    bt_cap = max(1, avail // cost_per_b)
    bt_target = max(1, -(-_TARGET_TILE_BYTES // per_b_stream))
    bt = int(min(bt_cap, bt_target))
    if B >= 16:
        bt = min(bt, -(-B // 2))          # >= 2 grid blocks so both v7x TensorCores get work
    if bt >= 8:
        bt = (bt // 8) * 8                # sublane-aligned batch tiles
    return int(max(1, min(bt, B)))


def _head_kernel(inv_hw, channels_last,
                 x_ref, caw1_ref, cab1_ref, caw2_ref, cab2_ref,
                 kmean_ref, kmax_ref, w1_ref, b1_ref, w2_ref, b2_ref,
                 w3_ref, b3_ref, w4_ref, b4_ref, o_ref):
    """Fused CBAM + global-average-pool + ClassificationModule for one batch tile.

    x_ref: (Bt, C, HW) or (Bt, HW, C) when channels_last, possibly bf16 (upcast on load).
    caw1: (C, hid_p), cab1: (1, hid_p), caw2: (hid_p, C), cab2: (1, C)   [hid_p lane-padded]
    kmean/kmax: (HW, HW) banded 7x7-conv matrices
    w1..b4: classifier weights (in, out) / biases (1, out); final layer lane-padded
    o_ref: (1, Bt, num_classes_padded)
    """
    sp_ax, ch_ax = (1, 2) if channels_last else (2, 1)
    x = x_ref[...].astype(jnp.float32)

    # ---- channel attention: shared MLP on spatial-avg / spatial-max (no VMEM scratch) ----
    def ca_mlp(v):                                            # v: (Bt, C)
        h = jnp.maximum(
            jnp.dot(v, caw1_ref[...], preferred_element_type=jnp.float32) + cab1_ref[...], 0.0)
        return jnp.dot(h, caw2_ref[...], preferred_element_type=jnp.float32) + cab2_ref[...]

    avg_c = jnp.mean(x, axis=sp_ax)                           # (Bt, C)
    max_c = jnp.max(x, axis=sp_ax)                            # (Bt, C)
    ca = jax.nn.sigmoid(ca_mlp(avg_c) + ca_mlp(max_c))        # (Bt, C)

    ca_b = ca[:, None, :] if channels_last else ca[:, :, None]
    x_ca = x * ca_b                                           # full tile, dies after mean/max

    # ---- spatial attention: 7x7 zero-padded 'same' conv as two MXU matmuls ----
    mean_s = jnp.mean(x_ca, axis=ch_ax)                       # (Bt, HW)
    max_s = jnp.max(x_ca, axis=ch_ax)                         # (Bt, HW)
    logit = (jnp.dot(mean_s, kmean_ref[...], preferred_element_type=jnp.float32)
             + jnp.dot(max_s, kmax_ref[...], preferred_element_type=jnp.float32))
    sa = jax.nn.sigmoid(logit)                                # (Bt, HW)

    # ---- attention-weighted AdaptiveAvgPool2d(1); ca factored out of the spatial sum ----
    sa_b = sa[:, :, None] if channels_last else sa[:, None, :]
    pooled = ca * (jnp.sum(x * sa_b, axis=sp_ax) * inv_hw)    # (Bt, C)

    # ---- ClassificationModule: Linear+ReLU x3 -> (dropout) -> Linear ----
    h1 = jnp.maximum(
        jnp.dot(pooled, w1_ref[...], preferred_element_type=jnp.float32) + b1_ref[...], 0.0)
    h2 = jnp.maximum(
        jnp.dot(h1, w2_ref[...], preferred_element_type=jnp.float32) + b2_ref[...], 0.0)
    h3 = jnp.maximum(
        jnp.dot(h2, w3_ref[...], preferred_element_type=jnp.float32) + b3_ref[...], 0.0)
    # TODO(synk): nn.Dropout(p=0.5) is identity in eval mode; train-mode RNG dropout not implemented.
    o_ref[0] = jnp.dot(h3, w4_ref[...], preferred_element_type=jnp.float32) + b4_ref[...]


_WEIGHT_KEYS = ("ca_w1t", "ca_b1", "ca_w2t", "ca_b2", "k_mean", "k_max",
                "fc_w1t", "fc_b1", "fc_w2t", "fc_b2", "fc_w3t", "fc_b3",
                "fc_w4t", "fc_b4")


def prepare_params(params, H, W):
    """One-time weight prep: transposes, bias reshapes, banded conv matrices, lane padding."""
    HW = H * W
    if HW > 1024:
        # TODO(synk): for large feature maps fall back to a direct 49-tap roll/accumulate conv;
        # the banded (HW, HW) matrices are O(HW^2) in memory and FLOPs (bad on v7x's 64 MiB VMEM).
        raise NotImplementedError("banded spatial-conv path is only used for H*W <= 1024")
    num_classes = params["fc_w4"].shape[0]
    ncp = ((num_classes + 127) // 128) * 128                  # lane-dense output
    hid = params["ca_w1"].shape[0]
    hidp = ((hid + 127) // 128) * 128                         # lane-dense CA hidden dim
    k_full = _build_spatial_conv_matrix(params["sa_w"], H, W)
    f32 = jnp.float32
    return dict(
        num_classes=num_classes,
        ca_w1t=jnp.pad(params["ca_w1"].T.astype(f32), ((0, 0), (0, hidp - hid))),   # (C, hidp)
        ca_b1=jnp.pad(params["ca_b1"].reshape(1, -1).astype(f32), ((0, 0), (0, hidp - hid))),
        ca_w2t=jnp.pad(params["ca_w2"].T.astype(f32), ((0, hidp - hid), (0, 0))),   # (hidp, C)
        ca_b2=params["ca_b2"].reshape(1, -1).astype(f32),
        k_mean=k_full[:HW],                                   # (HW, HW)
        k_max=k_full[HW:],                                    # (HW, HW)
        fc_w1t=params["fc_w1"].T.astype(f32),                 # (C, 512)
        fc_b1=params["fc_b1"].reshape(1, -1).astype(f32),
        fc_w2t=params["fc_w2"].T.astype(f32),                 # (512, 256)
        fc_b2=params["fc_b2"].reshape(1, -1).astype(f32),
        fc_w3t=params["fc_w3"].T.astype(f32),                 # (256, 128)
        fc_b3=params["fc_b3"].reshape(1, -1).astype(f32),
        fc_w4t=jnp.pad(params["fc_w4"].T.astype(f32),
                       ((0, 0), (0, ncp - num_classes))),     # (128, ncp)
        fc_b4=jnp.pad(params["fc_b4"].reshape(1, -1).astype(f32),
                      ((0, 0), (0, ncp - num_classes))),      # (1, ncp)
    )


def head_forward(x, prep, *, stream_dtype=jnp.float32):
    B, C, H, W = x.shape
    HW = H * W
    weights = [prep[k] for k in _WEIGHT_KEYS]
    weight_bytes = sum(int(np.prod(w.shape)) * 4 for w in weights)

    vmem_limit = _vmem_limit_bytes()
    stream_itemsize = int(np.dtype(stream_dtype).itemsize)
    bt = _choose_block_batch(B, C, HW, weight_bytes, stream_itemsize, vmem_limit - (4 << 20))
    nblocks = int(pl.cdiv(B, bt))
    b_pad = nblocks * bt

    # Lane-dense big-tensor layout: when the spatial axis is narrow but C fills 128 lanes,
    # stream x as (B, HW, C) so every elementwise pass uses full vregs and pooled is lane-dense.
    channels_last = (HW < 128) and (C >= 128)
    xf = x.reshape(B, C, HW)
    if channels_last:
        xf = xf.transpose(0, 2, 1)                            # (B, HW, C)
    xf = xf.astype(stream_dtype)
    if b_pad != B:
        xf = jnp.pad(xf, ((0, b_pad - B), (0, 0), (0, 0)))    # zero rows, sliced off below

    ncp = prep["fc_w4t"].shape[1]
    x_block = (bt,) + xf.shape[1:]

    def build(single_buffer_weights):
        def const_spec(w):
            nd = w.ndim
            kw = {"pipeline_mode": pl.Buffered(1)} if single_buffer_weights else {}
            return pl.BlockSpec(w.shape, lambda b, nd=nd: (0,) * nd, **kw)

        return pl.pallas_call(
            functools.partial(_head_kernel, 1.0 / float(HW), channels_last),
            out_shape=jax.ShapeDtypeStruct((nblocks, bt, ncp), jnp.float32),
            grid=(nblocks,),
            in_specs=[pl.BlockSpec(x_block, lambda b: (b, 0, 0))]
                     + [const_spec(w) for w in weights],
            out_specs=pl.BlockSpec((1, bt, ncp), lambda b: (b, 0, 0)),
            compiler_params=pltpu.CompilerParams(
                dimension_semantics=("parallel",),            # batch blocks are independent
                vmem_limit_bytes=vmem_limit),
        )

    try:
        # Constant weights single-buffered: their block index never changes, so double-buffering
        # only wastes VMEM that is better spent on a larger batch tile.
        out = build(True)(xf, *weights)
    except Exception:
        out = build(False)(xf, *weights)                      # fallback if Buffered(1) unsupported

    return out.reshape(b_pad, ncp)[:B, :prep["num_classes"]]


def head_reference(x, params):
    """Pure-JAX reference with identical semantics (eval mode)."""
    B, C, H, W = x.shape
    xf = x.reshape(B, C, H * W)
    avg = xf.mean(-1)
    mx = xf.max(-1)

    def ca_mlp(v):
        h = jnp.maximum(v @ params["ca_w1"].T + params["ca_b1"], 0.0)
        return h @ params["ca_w2"].T + params["ca_b2"]

    ca = jax.nn.sigmoid(ca_mlp(avg) + ca_mlp(mx))             # (B, C)
    x1 = x * ca[:, :, None, None]
    maps = jnp.concatenate(
        [x1.mean(1, keepdims=True), x1.max(1, keepdims=True)], axis=1)
    logit = jax.lax.conv_general_dilated(
        maps, params["sa_w"][None], (1, 1), ((3, 3), (3, 3)),
        dimension_numbers=("NCHW", "OIHW", "NCHW"))
    x2 = x1 * jax.nn.sigmoid(logit)
    pooled = x2.mean((2, 3))
    h = jnp.maximum(pooled @ params["fc_w1"].T + params["fc_b1"], 0.0)
    h = jnp.maximum(h @ params["fc_w2"].T + params["fc_b2"], 0.0)
    h = jnp.maximum(h @ params["fc_w3"].T + params["fc_b3"], 0.0)
    return h @ params["fc_w4"].T + params["fc_b4"]


def init_params(key, num_classes, input_features, reduction=16):
    hid = max(input_features // reduction, 1)
    ks = jax.random.split(key, 11)

    def lin(k, out_d, in_d):
        return jax.random.normal(k, (out_d, in_d), jnp.float32) / np.sqrt(in_d)

    return dict(
        ca_w1=lin(ks[0], hid, input_features),
        ca_b1=jnp.zeros((hid,), jnp.float32),
        ca_w2=lin(ks[1], input_features, hid),
        ca_b2=jnp.zeros((input_features,), jnp.float32),
        sa_w=jax.random.normal(ks[2], (2, 7, 7), jnp.float32) / 7.0,
        fc_w1=lin(ks[3], 512, input_features),
        fc_b1=jax.random.normal(ks[4], (512,), jnp.float32) * 0.01,
        fc_w2=lin(ks[5], 256, 512),
        fc_b2=jax.random.normal(ks[6], (256,), jnp.float32) * 0.01,
        fc_w3=lin(ks[7], 128, 256),
        fc_b3=jax.random.normal(ks[8], (128,), jnp.float32) * 0.01,
        fc_w4=lin(ks[9], num_classes, 128),
        fc_b4=jax.random.normal(ks[10], (num_classes,), jnp.float32) * 0.01,
    )


if __name__ == "__main__":
    num_classes = 10
    key = jax.random.PRNGKey(0)
    configs = [
        # (B, C, H, W, stream_dtype, tol)
        (2, 64, 8, 8, jnp.float32, 2e-3),    # channels-first path (C < 128)
        (4, 128, 8, 8, jnp.float32, 2e-3),   # channels-last lane-dense path (C >= 128, HW < 128)
        (2, 128, 8, 8, jnp.bfloat16, 3e-2),  # bf16 streaming of x (HBM-bandwidth lever)
    ]
    for (B, C, H, W, sdt, tol) in configs:
        kx, kp, key = jax.random.split(key, 3)
        x = jax.random.normal(kx, (B, C, H, W), jnp.float32)
        params = init_params(kp, num_classes, C)
        prep = prepare_params(params, H, W)   # one-time weight prep, hoisted out of the call path

        out = jax.block_until_ready(head_forward(x, prep, stream_dtype=sdt))
        assert out.shape == (B, num_classes)

        ref = head_reference(x, params)
        np.testing.assert_allclose(np.asarray(out), np.asarray(ref), rtol=tol, atol=tol)
    print("KERNEL_OK")
</pallas_src>

<mosaic_0001>
module attributes {stable_mosaic.version = 11 : i64} {
  func.func @_head_kernel(%arg0: i32, %arg1: memref<2x64x64xf32, #tpu.memory_space<vmem>>, %arg2: memref<64x128xf32, #tpu.memory_space<vmem>>, %arg3: memref<1x128xf32, #tpu.memory_space<vmem>>, %arg4: memref<128x64xf32, #tpu.memory_space<vmem>>, %arg5: memref<1x64xf32, #tpu.memory_space<vmem>>, %arg6: memref<64x64xf32, #tpu.memory_space<vmem>>, %arg7: memref<64x64xf32, #tpu.memory_space<vmem>>, %arg8: memref<64x512xf32, #tpu.memory_space<vmem>>, %arg9: memref<1x512xf32, #tpu.memory_space<vmem>>, %arg10: memref<512x256xf32, #tpu.memory_space<vmem>>, %arg11: memref<1x256xf32, #tpu.memory_space<vmem>>, %arg12: memref<256x128xf32, #tpu.memory_space<vmem>>, %arg13: memref<1x128xf32, #tpu.memory_space<vmem>>, %arg14: memref<128x128xf32, #tpu.memory_space<vmem>>, %arg15: memref<1x128xf32, #tpu.memory_space<vmem>>, %arg16: memref<1x2x128xf32, #tpu.memory_space<vmem>>) attributes {dimension_semantics = [#tpu.dimension_semantics<parallel>], iteration_bounds = array<i64: 1>, scalar_prefetch = 0 : i64, scratch_operands = 0 : i64, tpu.core_type = #tpu.core_type<tc>, window_params = [{transform_indices = @transform_0, window_bounds = array<i64: 2, 64, 64>}, {pipeline_mode = #tpu.pipeline_mode<synchronous>, transform_indices = @transform_1, window_bounds = array<i64: 64, 128>}, {pipeline_mode = #tpu.pipeline_mode<synchronous>, transform_indices = @transform_2, window_bounds = array<i64: 1, 128>}, {pipeline_mode = #tpu.pipeline_mode<synchronous>, transform_indices = @transform_3, window_bounds = array<i64: 128, 64>}, {pipeline_mode = #tpu.pipeline_mode<synchronous>, transform_indices = @transform_4, window_bounds = array<i64: 1, 64>}, {pipeline_mode = #tpu.pipeline_mode<synchronous>, transform_indices = @transform_5, window_bounds = array<i64: 64, 64>}, {pipeline_mode = #tpu.pipeline_mode<synchronous>, transform_indices = @transform_6, window_bounds = array<i64: 64, 64>}, {pipeline_mode = #tpu.pipeline_mode<synchronous>, transform_indices = @transform_7, window_bounds = array<i64: 64, 512>}, {pipeline_mode = #tpu.pipeline_mode<synchronous>, transform_indices = @transform_8, window_bounds = array<i64: 1, 512>}, {pipeline_mode = #tpu.pipeline_mode<synchronous>, transform_indices = @transform_9, window_bounds = array<i64: 512, 256>}, {pipeline_mode = #tpu.pipeline_mode<synchronous>, transform_indices = @transform_10, window_bounds = array<i64: 1, 256>}, {pipeline_mode = #tpu.pipeline_mode<synchronous>, transform_indices = @transform_11, window_bounds = array<i64: 256, 128>}, {pipeline_mode = #tpu.pipeline_mode<synchronous>, transform_indices = @transform_12, window_bounds = array<i64: 1, 128>}, {pipeline_mode = #tpu.pipeline_mode<synchronous>, transform_indices = @transform_13, window_bounds = array<i64: 128, 128>}, {pipeline_mode = #tpu.pipeline_mode<synchronous>, transform_indices = @transform_14, window_bounds = array<i64: 1, 128>}, {transform_indices = @transform_15, window_bounds = array<i64: 1, 2, 128>}]} {
    %c0 = arith.constant 0 : index
    %c0_0 = arith.constant 0 : index
    %c0_1 = arith.constant 0 : index
    %0 = vector.load %arg1[%c0, %c0_0, %c0_1] : memref<2x64x64xf32, #tpu.memory_space<vmem>>, vector<2x64x64xf32>
    %cst = arith.constant dense<0.000000e+00> : vector<2x64xf32>
    %1 = vector.multi_reduction <add>, %0, %cst [2] : vector<2x64x64xf32> to vector<2x64xf32>
    %cst_2 = arith.constant 6.400000e+01 : f32
    %2 = vector.broadcast %cst_2 : f32 to vector<2x64xf32>
    %3 = arith.divf %1, %2 : vector<2x64xf32>
    %cst_3 = arith.constant dense<0xFF800000> : vector<2x64xf32>
    %4 = vector.multi_reduction <maximumf>, %0, %cst_3 [2] : vector<2x64x64xf32> to vector<2x64xf32>
    %c0_4 = arith.constant 0 : index
    %c0_5 = arith.constant 0 : index
    %5 = vector.load %arg2[%c0_4, %c0_5] : memref<64x128xf32, #tpu.memory_space<vmem>>, vector<64x128xf32>
    %cst_6 = arith.constant dense<0.000000e+00> : vector<2x128xf32>
    %6 = tpu.matmul %3, %5, %cst_6 {dimension_numbers = #tpu.dot_dimension_numbers<[1], [0], [0], [1], [0, 0, 1, 1], [], []>} : vector<2x64xf32>, vector<64x128xf32>, vector<2x128xf32> -> vector<2x128xf32>
    %c0_7 = arith.constant 0 : index
    %c0_8 = arith.constant 0 : index
    %7 = vector.load %arg3[%c0_7, %c0_8] : memref<1x128xf32, #tpu.memory_space<vmem>>, vector<1x128xf32>
    %8 = vector.broadcast %7 : vector<1x128xf32> to vector<2x128xf32>
    %9 = arith.addf %6, %8 : vector<2x128xf32>
    %cst_9 = arith.constant 0.000000e+00 : f32
    %10 = vector.broadcast %cst_9 : f32 to vector<2x128xf32>
    %11 = arith.maximumf %9, %10 : vector<2x128xf32>
    %c0_10 = arith.constant 0 : index
    %c0_11 = arith.constant 0 : index
    %12 = vector.load %arg4[%c0_10, %c0_11] : memref<128x64xf32, #tpu.memory_space<vmem>>, vector<128x64xf32>
    %cst_12 = arith.constant dense<0.000000e+00> : vector<2x64xf32>
    %13 = tpu.matmul %11, %12, %cst_12 {dimension_numbers = #tpu.dot_dimension_numbers<[1], [0], [0], [1], [0, 0, 1, 1], [], []>} : vector<2x128xf32>, vector<128x64xf32>, vector<2x64xf32> -> vector<2x64xf32>
    %c0_13 = arith.constant 0 : index
    %c0_14 = arith.constant 0 : index
    %14 = vector.load %arg5[%c0_13, %c0_14] : memref<1x64xf32, #tpu.memory_space<vmem>>, vector<1x64xf32>
    %15 = vector.broadcast %14 : vector<1x64xf32> to vector<2x64xf32>
    %16 = arith.addf %13, %15 : vector<2x64xf32>
    %c0_15 = arith.constant 0 : index
    %c0_16 = arith.constant 0 : index
    %17 = vector.load %arg2[%c0_15, %c0_16] : memref<64x128xf32, #tpu.memory_space<vmem>>, vector<64x128xf32>
    %cst_17 = arith.constant dense<0.000000e+00> : vector<2x128xf32>
    %18 = tpu.matmul %4, %17, %cst_17 {dimension_numbers = #tpu.dot_dimension_numbers<[1], [0], [0], [1], [0, 0, 1, 1], [], []>} : vector<2x64xf32>, vector<64x128xf32>, vector<2x128xf32> -> vector<2x128xf32>
    %c0_18 = arith.constant 0 : index
    %c0_19 = arith.constant 0 : index
    %19 = vector.load %arg3[%c0_18, %c0_19] : memref<1x128xf32, #tpu.memory_space<vmem>>, vector<1x128xf32>
    %20 = vector.broadcast %19 : vector<1x128xf32> to vector<2x128xf32>
    %21 = arith.addf %18, %20 : vector<2x128xf32>
    %cst_20 = arith.constant 0.000000e+00 : f32
    %22 = vector.broadcast %cst_20 : f32 to vector<2x128xf32>
    %23 = arith.maximumf %21, %22 : vector<2x128xf32>
    %c0_21 = arith.constant 0 : index
    %c0_22 = arith.constant 0 : index
    %24 = vector.load %arg4[%c0_21, %c0_22] : memref<128x64xf32, #tpu.memory_space<vmem>>, vector<128x64xf32>
    %cst_23 = arith.constant dense<0.000000e+00> : vector<2x64xf32>
    %25 = tpu.matmul %23, %24, %cst_23 {dimension_numbers = #tpu.dot_dimension_numbers<[1], [0], [0], [1], [0, 0, 1, 1], [], []>} : vector<2x128xf32>, vector<128x64xf32>, vector<2x64xf32> -> vector<2x64xf32>
    %c0_24 = arith.constant 0 : index
    %c0_25 = arith.constant 0 : index
    %26 = vector.load %arg5[%c0_24, %c0_25] : memref<1x64xf32, #tpu.memory_space<vmem>>, vector<1x64xf32>
    %27 = vector.broadcast %26 : vector<1x64xf32> to vector<2x64xf32>
    %28 = arith.addf %25, %27 : vector<2x64xf32>
    %29 = arith.addf %16, %28 : vector<2x64xf32>
    %30 = arith.negf %29 : vector<2x64xf32>
    %31 = math.exp %30 : vector<2x64xf32>
    %cst_26 = arith.constant 1.000000e+00 : f32
    %32 = vector.broadcast %cst_26 : f32 to vector<2x64xf32>
    %33 = arith.addf %32, %31 : vector<2x64xf32>
    %34 = arith.divf %32, %33 : vector<2x64xf32>
    %35 = vector.shape_cast %34 : vector<2x64xf32> to vector<2x64x1xf32>
    %36 = vector.broadcast %35 : vector<2x64x1xf32> to vector<2x64x64xf32>
    %37 = arith.mulf %0, %36 : vector<2x64x64xf32>
    %cst_27 = arith.constant dense<0.000000e+00> : vector<2x64xf32>
    %38 = vector.multi_reduction <add>, %37, %cst_27 [1] : vector<2x64x64xf32> to vector<2x64xf32>
    %cst_28 = arith.constant 6.400000e+01 : f32
    %39 = vector.broadcast %cst_28 : f32 to vector<2x64xf32>
    %40 = arith.divf %38, %39 : vector<2x64xf32>
    %cst_29 = arith.constant dense<0xFF800000> : vector<2x64xf32>
    %41 = vector.multi_reduction <maximumf>, %37, %cst_29 [1] : vector<2x64x64xf32> to vector<2x64xf32>
    %c0_30 = arith.constant 0 : index
    %c0_31 = arith.constant 0 : index
    %42 = vector.load %arg6[%c0_30, %c0_31] : memref<64x64xf32, #tpu.memory_space<vmem>>, vector<64x64xf32>
    %cst_32 = arith.constant dense<0.000000e+00> : vector<2x64xf32>
    %43 = tpu.matmul %40, %42, %cst_32 {dimension_numbers = #tpu.dot_dimension_numbers<[1], [0], [0], [1], [0, 0, 1, 1], [], []>} : vector<2x64xf32>, vector<64x64xf32>, vector<2x64xf32> -> vector<2x64xf32>
    %c0_33 = arith.constant 0 : index
    %c0_34 = arith.constant 0 : index
    %44 = vector.load %arg7[%c0_33, %c0_34] : memref<64x64xf32, #tpu.memory_space<vmem>>, vector<64x64xf32>
    %cst_35 = arith.constant dense<0.000000e+00> : vector<2x64xf32>
    %45 = tpu.matmul %41, %44, %cst_35 {dimension_numbers = #tpu.dot_dimension_numbers<[1], [0], [0], [1], [0, 0, 1, 1], [], []>} : vector<2x64xf32>, vector<64x64xf32>, vector<2x64xf32> -> vector<2x64xf32>
    %46 = arith.addf %43, %45 : vector<2x64xf32>
    %47 = arith.negf %46 : vector<2x64xf32>
    %48 = math.exp %47 : vector<2x64xf32>
    %cst_36 = arith.constant 1.000000e+00 : f32
    %49 = vector.broadcast %cst_36 : f32 to vector<2x64xf32>
    %50 = arith.addf %49, %48 : vector<2x64xf32>
    %51 = arith.divf %49, %50 : vector<2x64xf32>
    %52 = vector.shape_cast %51 : vector<2x64xf32> to vector<2x1x64xf32>
    %53 = vector.broadcast %52 : vector<2x1x64xf32> to vector<2x64x64xf32>
    %54 = arith.mulf %0, %53 : vector<2x64x64xf32>
    %cst_37 = arith.constant dense<0.000000e+00> : vector<2x64xf32>
    %55 = vector.multi_reduction <add>, %54, %cst_37 [2] : vector<2x64x64xf32> to vector<2x64xf32>
    %cst_38 = arith.constant 1.562500e-02 : f32
    %56 = vector.broadcast %cst_38 : f32 to vector<2x64xf32>
    %57 = arith.mulf %55, %56 : vector<2x64xf32>
    %58 = arith.mulf %34, %57 : vector<2x64xf32>
    %c0_39 = arith.constant 0 : index
    %c0_40 = arith.constant 0 : index
    %59 = vector.load %arg8[%c0_39, %c0_40] : memref<64x512xf32, #tpu.memory_space<vmem>>, vector<64x512xf32>
    %cst_41 = arith.constant dense<0.000000e+00> : vector<2x512xf32>
    %60 = tpu.matmul %58, %59, %cst_41 {dimension_numbers = #tpu.dot_dimension_numbers<[1], [0], [0], [1], [0, 0, 1, 1], [], []>} : vector<2x64xf32>, vector<64x512xf32>, vector<2x512xf32> -> vector<2x512xf32>
    %c0_42 = arith.constant 0 : index
    %c0_43 = arith.constant 0 : index
    %61 = vector.load %arg9[%c0_42, %c0_43] : memref<1x512xf32, #tpu.memory_space<vmem>>, vector<1x512xf32>
    %62 = vector.broadcast %61 : vector<1x512xf32> to vector<2x512xf32>
    %63 = arith.addf %60, %62 : vector<2x512xf32>
    %cst_44 = arith.constant 0.000000e+00 : f32
    %64 = vector.broadcast %cst_44 : f32 to vector<2x512xf32>
    %65 = arith.maximumf %63, %64 : vector<2x512xf32>
    %c0_45 = arith.constant 0 : index
    %c0_46 = arith.constant 0 : index
    %66 = vector.load %arg10[%c0_45, %c0_46] : memref<512x256xf32, #tpu.memory_space<vmem>>, vector<512x256xf32>
    %cst_47 = arith.constant dense<0.000000e+00> : vector<2x256xf32>
    %67 = tpu.matmul %65, %66, %cst_47 {dimension_numbers = #tpu.dot_dimension_numbers<[1], [0], [0], [1], [0, 0, 1, 1], [], []>} : vector<2x512xf32>, vector<512x256xf32>, vector<2x256xf32> -> vector<2x256xf32>
    %c0_48 = arith.constant 0 : index
    %c0_49 = arith.constant 0 : index
    %68 = vector.load %arg11[%c0_48, %c0_49] : memref<1x256xf32, #tpu.memory_space<vmem>>, vector<1x256xf32>
    %69 = vector.broadcast %68 : vector<1x256xf32> to vector<2x256xf32>
    %70 = arith.addf %67, %69 : vector<2x256xf32>
    %cst_50 = arith.constant 0.000000e+00 : f32
    %71 = vector.broadcast %cst_50 : f32 to vector<2x256xf32>
    %72 = arith.maximumf %70, %71 : vector<2x256xf32>
    %c0_51 = arith.constant 0 : index
    %c0_52 = arith.constant 0 : index
    %73 = vector.load %arg12[%c0_51, %c0_52] : memref<256x128xf32, #tpu.memory_space<vmem>>, vector<256x128xf32>
    %cst_53 = arith.constant dense<0.000000e+00> : vector<2x128xf32>
    %74 = tpu.matmul %72, %73, %cst_53 {dimension_numbers = #tpu.dot_dimension_numbers<[1], [0], [0], [1], [0, 0, 1, 1], [], []>} : vector<2x256xf32>, vector<256x128xf32>, vector<2x128xf32> -> vector<2x128xf32>
    %c0_54 = arith.constant 0 : index
    %c0_55 = arith.constant 0 : index
    %75 = vector.load %arg13[%c0_54, %c0_55] : memref<1x128xf32, #tpu.memory_space<vmem>>, vector<1x128xf32>
    %76 = vector.broadcast %75 : vector<1x128xf32> to vector<2x128xf32>
    %77 = arith.addf %74, %76 : vector<2x128xf32>
    %cst_56 = arith.constant 0.000000e+00 : f32
    %78 = vector.broadcast %cst_56 : f32 to vector<2x128xf32>
    %79 = arith.maximumf %77, %78 : vector<2x128xf32>
    %c0_57 = arith.constant 0 : index
    %c0_58 = arith.constant 0 : index
    %80 = vector.load %arg14[%c0_57, %c0_58] : memref<128x128xf32, #tpu.memory_space<vmem>>, vector<128x128xf32>
    %cst_59 = arith.constant dense<0.000000e+00> : vector<2x128xf32>
    %81 = tpu.matmul %79, %80, %cst_59 {dimension_numbers = #tpu.dot_dimension_numbers<[1], [0], [0], [1], [0, 0, 1, 1], [], []>} : vector<2x128xf32>, vector<128x128xf32>, vector<2x128xf32> -> vector<2x128xf32>
    %c0_60 = arith.constant 0 : index
    %c0_61 = arith.constant 0 : index
    %82 = vector.load %arg15[%c0_60, %c0_61] : memref<1x128xf32, #tpu.memory_space<vmem>>, vector<1x128xf32>
    %83 = vector.broadcast %82 : vector<1x128xf32> to vector<2x128xf32>
    %84 = arith.addf %81, %83 : vector<2x128xf32>
    %c0_62 = arith.constant 0 : index
    %c0_63 = arith.constant 0 : index
    %c0_64 = arith.constant 0 : index
    %85 = vector.load %arg16[%c0_62, %c0_63, %c0_64] : memref<1x2x128xf32, #tpu.memory_space<vmem>>, vector<1x2x128xf32>
    %86 = vector.shape_cast %85 : vector<1x2x128xf32> to vector<2x128xf32>
    %87 = vector.shape_cast %84 : vector<2x128xf32> to vector<1x2x128xf32>
    tpu.vector_store %arg16[%c0_62, %c0_63, %c0_64], %87 {strides = array<i32>} : memref<1x2x128xf32, #tpu.memory_space<vmem>>, vector<1x2x128xf32>,
    return
  }
  func.func @transform_0(%arg0: i32) -> (i32, i32, i32) {
    %c0_i32 = arith.constant 0 : i32
    %c0_i32_0 = arith.constant 0 : i32
    %c0_i32_1 = arith.constant 0 : i32
    return %arg0, %c0_i32, %c0_i32_0 : i32, i32, i32
  }
  func.func @transform_1(%arg0: i32) -> (i32, i32) {
    %c0_i32 = arith.constant 0 : i32
    %c0_i32_0 = arith.constant 0 : i32
    %c0_i32_1 = arith.constant 0 : i32
    return %c0_i32, %c0_i32_0 : i32, i32
  }
  func.func @transform_2(%arg0: i32) -> (i32, i32) {
    %c0_i32 = arith.constant 0 : i32
    %c0_i32_0 = arith.constant 0 : i32
    %c0_i32_1 = arith.constant 0 : i32
    return %c0_i32, %c0_i32_0 : i32, i32
  }
  func.func @transform_3(%arg0: i32) -> (i32, i32) {
    %c0_i32 = arith.constant 0 : i32
    %c0_i32_0 = arith.constant 0 : i32
    %c0_i32_1 = arith.constant 0 : i32
    return %c0_i32, %c0_i32_0 : i32, i32
  }
  func.func @transform_4(%arg0: i32) -> (i32, i32) {
    %c0_i32 = arith.constant 0 : i32
    %c0_i32_0 = arith.constant 0 : i32
    %c0_i32_1 = arith.constant 0 : i32
    return %c0_i32, %c0_i32_0 : i32, i32
  }
  func.func @transform_5(%arg0: i32) -> (i32, i32) {
    %c0_i32 = arith.constant 0 : i32
    %c0_i32_0 = arith.constant 0 : i32
    %c0_i32_1 = arith.constant 0 : i32
    return %c0_i32, %c0_i32_0 : i32, i32
  }
  func.func @transform_6(%arg0: i32) -> (i32, i32) {
    %c0_i32 = arith.constant 0 : i32
    %c0_i32_0 = arith.constant 0 : i32
    %c0_i32_1 = arith.constant 0 : i32
    return %c0_i32, %c0_i32_0 : i32, i32
  }
  func.func @transform_7(%arg0: i32) -> (i32, i32) {
    %c0_i32 = arith.constant 0 : i32
    %c0_i32_0 = arith.constant 0 : i32
    %c0_i32_1 = arith.constant 0 : i32
    return %c0_i32, %c0_i32_0 : i32, i32
  }
  func.func @transform_8(%arg0: i32) -> (i32, i32) {
    %c0_i32 = arith.constant 0 : i32
    %c0_i32_0 = arith.constant 0 : i32
    %c0_i32_1 = arith.constant 0 : i32
    return %c0_i32, %c0_i32_0 : i32, i32
  }
  func.func @transform_9(%arg0: i32) -> (i32, i32) {
    %c0_i32 = arith.constant 0 : i32
    %c0_i32_0 = arith.constant 0 : i32
    %c0_i32_1 = arith.constant 0 : i32
    return %c0_i32, %c0_i32_0 : i32, i32
  }
  func.func @transform_10(%arg0: i32) -> (i32, i32) {
    %c0_i32 = arith.constant 0 : i32
    %c0_i32_0 = arith.constant 0 : i32
    %c0_i32_1 = arith.constant 0 : i32
    return %c0_i32, %c0_i32_0 : i32, i32
  }
  func.func @transform_11(%arg0: i32) -> (i32, i32) {
    %c0_i32 = arith.constant 0 : i32
    %c0_i32_0 = arith.constant 0 : i32
    %c0_i32_1 = arith.constant 0 : i32
    return %c0_i32, %c0_i32_0 : i32, i32
  }
  func.func @transform_12(%arg0: i32) -> (i32, i32) {
    %c0_i32 = arith.constant 0 : i32
    %c0_i32_0 = arith.constant 0 : i32
    %c0_i32_1 = arith.constant 0 : i32
    return %c0_i32, %c0_i32_0 : i32, i32
  }
  func.func @transform_13(%arg0: i32) -> (i32, i32) {
    %c0_i32 = arith.constant 0 : i32
    %c0_i32_0 = arith.constant 0 : i32
    %c0_i32_1 = arith.constant 0 : i32
    return %c0_i32, %c0_i32_0 : i32, i32
  }
  func.func @transform_14(%arg0: i32) -> (i32, i32) {
    %c0_i32 = arith.constant 0 : i32
    %c0_i32_0 = arith.constant 0 : i32
    %c0_i32_1 = arith.constant 0 : i32
    return %c0_i32, %c0_i32_0 : i32, i32
  }
  func.func @transform_15(%arg0: i32) -> (i32, i32, i32) {
    %c0_i32 = arith.constant 0 : i32
    %c0_i32_0 = arith.constant 0 : i32
    %c0_i32_1 = arith.constant 0 : i32
    return %arg0, %c0_i32, %c0_i32_0 : i32, i32, i32
  }
}

module attributes {stable_mosaic.version = 11 : i64} {
  func.func @_head_kernel(%arg0: i32, %arg1: memref<2x64x64xf32, #tpu.memory_space<vmem>>, %arg2: memref<64x128xf32, #tpu.memory_space<vmem>>, %arg3: memref<1x128xf32, #tpu.memory_space<vmem>>, %arg4: memref<128x64xf32, #tpu.memory_space<vmem>>, %arg5: memref<1x64xf32, #tpu.memory_space<vmem>>, %arg6: memref<64x64xf32, #tpu.memory_space<vmem>>, %arg7: memref<64x64xf32, #tpu.memory_space<vmem>>, %arg8: memref<64x512xf32, #tpu.memory_space<vmem>>, %arg9: memref<1x512xf32, #tpu.memory_space<vmem>>, %arg10: memref<512x256xf32, #tpu.memory_space<vmem>>, %arg11: memref<1x256xf32, #tpu.memory_space<vmem>>, %arg12: memref<256x128xf32, #tpu.memory_space<vmem>>, %arg13: memref<1x128xf32, #tpu.memory_space<vmem>>, %arg14: memref<128x128xf32, #tpu.memory_space<vmem>>, %arg15: memref<1x128xf32, #tpu.memory_space<vmem>>, %arg16: memref<1x2x128xf32, #tpu.memory_space<vmem>>) attributes {dimension_semantics = [#tpu.dimension_semantics<parallel>], iteration_bounds = array<i64: 1>, scalar_prefetch = 0 : i64, scratch_operands = 0 : i64, tpu.core_type = #tpu.core_type<tc>, window_params = [{transform_indices = @transform_0, window_bounds = array<i64: 2, 64, 64>}, {pipeline_mode = #tpu.pipeline_mode<synchronous>, transform_indices = @transform_1, window_bounds = array<i64: 64, 128>}, {pipeline_mode = #tpu.pipeline_mode<synchronous>, transform_indices = @transform_2, window_bounds = array<i64: 1, 128>}, {pipeline_mode = #tpu.pipeline_mode<synchronous>, transform_indices = @transform_3, window_bounds = array<i64: 128, 64>}, {pipeline_mode = #tpu.pipeline_mode<synchronous>, transform_indices = @transform_4, window_bounds = array<i64: 1, 64>}, {pipeline_mode = #tpu.pipeline_mode<synchronous>, transform_indices = @transform_5, window_bounds = array<i64: 64, 64>}, {pipeline_mode = #tpu.pipeline_mode<synchronous>, transform_indices = @transform_6, window_bounds = array<i64: 64, 64>}, {pipeline_mode = #tpu.pipeline_mode<synchronous>, transform_indices = @transform_7, window_bounds = array<i64: 64, 512>}, {pipeline_mode = #tpu.pipeline_mode<synchronous>, transform_indices = @transform_8, window_bounds = array<i64: 1, 512>}, {pipeline_mode = #tpu.pipeline_mode<synchronous>, transform_indices = @transform_9, window_bounds = array<i64: 512, 256>}, {pipeline_mode = #tpu.pipeline_mode<synchronous>, transform_indices = @transform_10, window_bounds = array<i64: 1, 256>}, {pipeline_mode = #tpu.pipeline_mode<synchronous>, transform_indices = @transform_11, window_bounds = array<i64: 256, 128>}, {pipeline_mode = #tpu.pipeline_mode<synchronous>, transform_indices = @transform_12, window_bounds = array<i64: 1, 128>}, {pipeline_mode = #tpu.pipeline_mode<synchronous>, transform_indices = @transform_13, window_bounds = array<i64: 128, 128>}, {pipeline_mode = #tpu.pipeline_mode<synchronous>, transform_indices = @transform_14, window_bounds = array<i64: 1, 128>}, {transform_indices = @transform_15, window_bounds = array<i64: 1, 2, 128>}]} {
    %c0 = arith.constant 0 : index
    %c0_0 = arith.constant 0 : index
    %c0_1 = arith.constant 0 : index
    %0 = vector.load %arg1[%c0, %c0_0, %c0_1] : memref<2x64x64xf32, #tpu.memory_space<vmem>>, vector<2x64x64xf32>
    %cst = arith.constant dense<0.000000e+00> : vector<2x64xf32>
    %1 = vector.multi_reduction <add>, %0, %cst [2] : vector<2x64x64xf32> to vector<2x64xf32>
    %cst_2 = arith.constant 6.400000e+01 : f32
    %2 = vector.broadcast %cst_2 : f32 to vector<2x64xf32>
    %3 = arith.divf %1, %2 : vector<2x64xf32>
    %cst_3 = arith.constant dense<0xFF800000> : vector<2x64xf32>
    %4 = vector.multi_reduction <maximumf>, %0, %cst_3 [2] : vector<2x64x64xf32> to vector<2x64xf32>
    %c0_4 = arith.constant 0 : index
    %c0_5 = arith.constant 0 : index
    %5 = vector.load %arg2[%c0_4, %c0_5] : memref<64x128xf32, #tpu.memory_space<vmem>>, vector<64x128xf32>
    %cst_6 = arith.constant dense<0.000000e+00> : vector<2x128xf32>
    %6 = tpu.matmul %3, %5, %cst_6 {dimension_numbers = #tpu.dot_dimension_numbers<[1], [0], [0], [1], [0, 0, 1, 1], [], []>} : vector<2x64xf32>, vector<64x128xf32>, vector<2x128xf32> -> vector<2x128xf32>
    %c0_7 = arith.constant 0 : index
    %c0_8 = arith.constant 0 : index
    %7 = vector.load %arg3[%c0_7, %c0_8] : memref<1x128xf32, #tpu.memory_space<vmem>>, vector<1x128xf32>
    %8 = vector.broadcast %7 : vector<1x128xf32> to vector<2x128xf32>
    %9 = arith.addf %6, %8 : vector<2x128xf32>
    %cst_9 = arith.constant 0.000000e+00 : f32
    %10 = vector.broadcast %cst_9 : f32 to vector<2x128xf32>
    %11 = arith.maximumf %9, %10 : vector<2x128xf32>
    %c0_10 = arith.constant 0 : index
    %c0_11 = arith.constant 0 : index
    %12 = vector.load %arg4[%c0_10, %c0_11] : memref<128x64xf32, #tpu.memory_space<vmem>>, vector<128x64xf32>
    %cst_12 = arith.constant dense<0.000000e+00> : vector<2x64xf32>
    %13 = tpu.matmul %11, %12, %cst_12 {dimension_numbers = #tpu.dot_dimension_numbers<[1], [0], [0], [1], [0, 0, 1, 1], [], []>} : vector<2x128xf32>, vector<128x64xf32>, vector<2x64xf32> -> vector<2x64xf32>
    %c0_13 = arith.constant 0 : index
    %c0_14 = arith.constant 0 : index
    %14 = vector.load %arg5[%c0_13, %c0_14] : memref<1x64xf32, #tpu.memory_space<vmem>>, vector<1x64xf32>
    %15 = vector.broadcast %14 : vector<1x64xf32> to vector<2x64xf32>
    %16 = arith.addf %13, %15 : vector<2x64xf32>
    %c0_15 = arith.constant 0 : index
    %c0_16 = arith.constant 0 : index
    %17 = vector.load %arg2[%c0_15, %c0_16] : memref<64x128xf32, #tpu.memory_space<vmem>>, vector<64x128xf32>
    %cst_17 = arith.constant dense<0.000000e+00> : vector<2x128xf32>
    %18 = tpu.matmul %4, %17, %cst_17 {dimension_numbers = #tpu.dot_dimension_numbers<[1], [0], [0], [1], [0, 0, 1, 1], [], []>} : vector<2x64xf32>, vector<64x128xf32>, vector<2x128xf32> -> vector<2x128xf32>
    %c0_18 = arith.constant 0 : index
    %c0_19 = arith.constant 0 : index
    %19 = vector.load %arg3[%c0_18, %c0_19] : memref<1x128xf32, #tpu.memory_space<vmem>>, vector<1x128xf32>
    %20 = vector.broadcast %19 : vector<1x128xf32> to vector<2x128xf32>
    %21 = arith.addf %18, %20 : vector<2x128xf32>
    %cst_20 = arith.constant 0.000000e+00 : f32
    %22 = vector.broadcast %cst_20 : f32 to vector<2x128xf32>
    %23 = arith.maximumf %21, %22 : vector<2x128xf32>
    %c0_21 = arith.constant 0 : index
    %c0_22 = arith.constant 0 : index
    %24 = vector.load %arg4[%c0_21, %c0_22] : memref<128x64xf32, #tpu.memory_space<vmem>>, vector<128x64xf32>
    %cst_23 = arith.constant dense<0.000000e+00> : vector<2x64xf32>
    %25 = tpu.matmul %23, %24, %cst_23 {dimension_numbers = #tpu.dot_dimension_numbers<[1], [0], [0], [1], [0, 0, 1, 1], [], []>} : vector<2x128xf32>, vector<128x64xf32>, vector<2x64xf32> -> vector<2x64xf32>
    %c0_24 = arith.constant 0 : index
    %c0_25 = arith.constant 0 : index
    %26 = vector.load %arg5[%c0_24, %c0_25] : memref<1x64xf32, #tpu.memory_space<vmem>>, vector<1x64xf32>
    %27 = vector.broadcast %26 : vector<1x64xf32> to vector<2x64xf32>
    %28 = arith.addf %25, %27 : vector<2x64xf32>
    %29 = arith.addf %16, %28 : vector<2x64xf32>
    %30 = arith.negf %29 : vector<2x64xf32>
    %31 = math.exp %30 : vector<2x64xf32>
    %cst_26 = arith.constant 1.000000e+00 : f32
    %32 = vector.broadcast %cst_26 : f32 to vector<2x64xf32>
    %33 = arith.addf %32, %31 : vector<2x64xf32>
    %34 = arith.divf %32, %33 : vector<2x64xf32>
    %35 = vector.shape_cast %34 : vector<2x64xf32> to vector<2x64x1xf32>
    %36 = vector.broadcast %35 : vector<2x64x1xf32> to vector<2x64x64xf32>
    %37 = arith.mulf %0, %36 : vector<2x64x64xf32>
    %cst_27 = arith.constant dense<0.000000e+00> : vector<2x64xf32>
    %38 = vector.multi_reduction <add>, %37, %cst_27 [1] : vector<2x64x64xf32> to vector<2x64xf32>
    %cst_28 = arith.constant 6.400000e+01 : f32
    %39 = vector.broadcast %cst_28 : f32 to vector<2x64xf32>
    %40 = arith.divf %38, %39 : vector<2x64xf32>
    %cst_29 = arith.constant dense<0xFF800000> : vector<2x64xf32>
    %41 = vector.multi_reduction <maximumf>, %37, %cst_29 [1] : vector<2x64x64xf32> to vector<2x64xf32>
    %c0_30 = arith.constant 0 : index
    %c0_31 = arith.constant 0 : index
    %42 = vector.load %arg6[%c0_30, %c0_31] : memref<64x64xf32, #tpu.memory_space<vmem>>, vector<64x64xf32>
    %cst_32 = arith.constant dense<0.000000e+00> : vector<2x64xf32>
    %43 = tpu.matmul %40, %42, %cst_32 {dimension_numbers = #tpu.dot_dimension_numbers<[1], [0], [0], [1], [0, 0, 1, 1], [], []>} : vector<2x64xf32>, vector<64x64xf32>, vector<2x64xf32> -> vector<2x64xf32>
    %c0_33 = arith.constant 0 : index
    %c0_34 = arith.constant 0 : index
    %44 = vector.load %arg7[%c0_33, %c0_34] : memref<64x64xf32, #tpu.memory_space<vmem>>, vector<64x64xf32>
    %cst_35 = arith.constant dense<0.000000e+00> : vector<2x64xf32>
    %45 = tpu.matmul %41, %44, %cst_35 {dimension_numbers = #tpu.dot_dimension_numbers<[1], [0], [0], [1], [0, 0, 1, 1], [], []>} : vector<2x64xf32>, vector<64x64xf32>, vector<2x64xf32> -> vector<2x64xf32>
    %46 = arith.addf %43, %45 : vector<2x64xf32>
    %47 = arith.negf %46 : vector<2x64xf32>
    %48 = math.exp %47 : vector<2x64xf32>
    %cst_36 = arith.constant 1.000000e+00 : f32
    %49 = vector.broadcast %cst_36 : f32 to vector<2x64xf32>
    %50 = arith.addf %49, %48 : vector<2x64xf32>
    %51 = arith.divf %49, %50 : vector<2x64xf32>
    %52 = vector.shape_cast %51 : vector<2x64xf32> to vector<2x1x64xf32>
    %53 = vector.broadcast %52 : vector<2x1x64xf32> to vector<2x64x64xf32>
    %54 = arith.mulf %0, %53 : vector<2x64x64xf32>
    %cst_37 = arith.constant dense<0.000000e+00> : vector<2x64xf32>
    %55 = vector.multi_reduction <add>, %54, %cst_37 [2] : vector<2x64x64xf32> to vector<2x64xf32>
    %cst_38 = arith.constant 1.562500e-02 : f32
    %56 = vector.broadcast %cst_38 : f32 to vector<2x64xf32>
    %57 = arith.mulf %55, %56 : vector<2x64xf32>
    %58 = arith.mulf %34, %57 : vector<2x64xf32>
    %c0_39 = arith.constant 0 : index
    %c0_40 = arith.constant 0 : index
    %59 = vector.load %arg8[%c0_39, %c0_40] : memref<64x512xf32, #tpu.memory_space<vmem>>, vector<64x512xf32>
    %cst_41 = arith.constant dense<0.000000e+00> : vector<2x512xf32>
    %60 = tpu.matmul %58, %59, %cst_41 {dimension_numbers = #tpu.dot_dimension_numbers<[1], [0], [0], [1], [0, 0, 1, 1], [], []>} : vector<2x64xf32>, vector<64x512xf32>, vector<2x512xf32> -> vector<2x512xf32>
    %c0_42 = arith.constant 0 : index
    %c0_43 = arith.constant 0 : index
    %61 = vector.load %arg9[%c0_42, %c0_43] : memref<1x512xf32, #tpu.memory_space<vmem>>, vector<1x512xf32>
    %62 = vector.broadcast %61 : vector<1x512xf32> to vector<2x512xf32>
    %63 = arith.addf %60, %62 : vector<2x512xf32>
    %cst_44 = arith.constant 0.000000e+00 : f32
    %64 = vector.broadcast %cst_44 : f32 to vector<2x512xf32>
    %65 = arith.maximumf %63, %64 : vector<2x512xf32>
    %c0_45 = arith.constant 0 : index
    %c0_46 = arith.constant 0 : index
    %66 = vector.load %arg10[%c0_45, %c0_46] : memref<512x256xf32, #tpu.memory_space<vmem>>, vector<512x256xf32>
    %cst_47 = arith.constant dense<0.000000e+00> : vector<2x256xf32>
    %67 = tpu.matmul %65, %66, %cst_47 {dimension_numbers = #tpu.dot_dimension_numbers<[1], [0], [0], [1], [0, 0, 1, 1], [], []>} : vector<2x512xf32>, vector<512x256xf32>, vector<2x256xf32> -> vector<2x256xf32>
    %c0_48 = arith.constant 0 : index
    %c0_49 = arith.constant 0 : index
    %68 = vector.load %arg11[%c0_48, %c0_49] : memref<1x256xf32, #tpu.memory_space<vmem>>, vector<1x256xf32>
    %69 = vector.broadcast %68 : vector<1x256xf32> to vector<2x256xf32>
    %70 = arith.addf %67, %69 : vector<2x256xf32>
    %cst_50 = arith.constant 0.000000e+00 : f32
    %71 = vector.broadcast %cst_50 : f32 to vector<2x256xf32>
    %72 = arith.maximumf %70, %71 : vector<2x256xf32>
    %c0_51 = arith.constant 0 : index
    %c0_52 = arith.constant 0 : index
    %73 = vector.load %arg12[%c0_51, %c0_52] : memref<256x128xf32, #tpu.memory_space<vmem>>, vector<256x128xf32>
    %cst_53 = arith.constant dense<0.000000e+00> : vector<2x128xf32>
    %74 = tpu.matmul %72, %73, %cst_53 {dimension_numbers = #tpu.dot_dimension_numbers<[1], [0], [0], [1], [0, 0, 1, 1], [], []>} : vector<2x256xf32>, vector<256x128xf32>, vector<2x128xf32> -> vector<2x128xf32>
    %c0_54 = arith.constant 0 : index
    %c0_55 = arith.constant 0 : index
    %75 = vector.load %arg13[%c0_54, %c0_55] : memref<1x128xf32, #tpu.memory_space<vmem>>, vector<1x128xf32>
    %76 = vector.broadcast %75 : vector<1x128xf32> to vector<2x128xf32>
    %77 = arith.addf %74, %76 : vector<2x128xf32>
    %cst_56 = arith.constant 0.000000e+00 : f32
    %78 = vector.broadcast %cst_56 : f32 to vector<2x128xf32>
    %79 = arith.maximumf %77, %78 : vector<2x128xf32>
    %c0_57 = arith.constant 0 : index
    %c0_58 = arith.constant 0 : index
    %80 = vector.load %arg14[%c0_57, %c0_58] : memref<128x128xf32, #tpu.memory_space<vmem>>, vector<128x128xf32>
    %cst_59 = arith.constant dense<0.000000e+00> : vector<2x128xf32>
    %81 = tpu.matmul %79, %80, %cst_59 {dimension_numbers = #tpu.dot_dimension_numbers<[1], [0], [0], [1], [0, 0, 1, 1], [], []>} : vector<2x128xf32>, vector<128x128xf32>, vector<2x128xf32> -> vector<2x128xf32>
    %c0_60 = arith.constant 0 : index
    %c0_61 = arith.constant 0 : index
    %82 = vector.load %arg15[%c0_60, %c0_61] : memref<1x128xf32, #tpu.memory_space<vmem>>, vector<1x128xf32>
    %83 = vector.broadcast %82 : vector<1x128xf32> to vector<2x128xf32>
    %84 = arith.addf %81, %83 : vector<2x128xf32>
    %c0_62 = arith.constant 0 : index
    %c0_63 = arith.constant 0 : index
    %c0_64 = arith.constant 0 : index
    %85 = vector.load %arg16[%c0_62, %c0_63, %c0_64] : memref<1x2x128xf32, #tpu.memory_space<vmem>>, vector<1x2x128xf32>
    %86 = vector.shape_cast %85 : vector<1x2x128xf32> to vector<2x128xf32>
    %87 = vector.shape_cast %84 : vector<2x128xf32> to vector<1x2x128xf32>
    tpu.vector_store %arg16[%c0_62, %c0_63, %c0_64], %87 {strides = array<i32>} : memref<1x2x128xf32, #tpu.memory_space<vmem>>, vector<1x2x128xf32>,
    return
  }
  func.func @transform_0(%arg0: i32) -> (i32, i32, i32) {
    %c0_i32 = arith.constant 0 : i32
    %c0_i32_0 = arith.constant 0 : i32
    %c0_i32_1 = arith.constant 0 : i32
    return %arg0, %c0_i32, %c0_i32_0 : i32, i32, i32
  }
  func.func @transform_1(%arg0: i32) -> (i32, i32) {
    %c0_i32 = arith.constant 0 : i32
    %c0_i32_0 = arith.constant 0 : i32
    %c0_i32_1 = arith.constant 0 : i32
    return %c0_i32, %c0_i32_0 : i32, i32
  }
  func.func @transform_2(%arg0: i32) -> (i32, i32) {
    %c0_i32 = arith.constant 0 : i32
    %c0_i32_0 = arith.constant 0 : i32
    %c0_i32_1 = arith.constant 0 : i32
    return %c0_i32, %c0_i32_0 : i32, i32
  }
  func.func @transform_3(%arg0: i32) -> (i32, i32) {
    %c0_i32 = arith.constant 0 : i32
    %c0_i32_0 = arith.constant 0 : i32
    %c0_i32_1 = arith.constant 0 : i32
    return %c0_i32, %c0_i32_0 : i32, i32
  }
  func.func @transform_4(%arg0: i32) -> (i32, i32) {
    %c0_i32 = arith.constant 0 : i32
    %c0_i32_0 = arith.constant 0 : i32
    %c0_i32_1 = arith.constant 0 : i32
    return %c0_i32, %c0_i32_0 : i32, i32
  }
  func.func @transform_5(%arg0: i32) -> (i32, i32) {
    %c0_i32 = arith.constant 0 : i32
    %c0_i32_0 = arith.constant 0 : i32
    %c0_i32_1 = arith.constant 0 : i32
    return %c0_i32, %c0_i32_0 : i32, i32
  }
  func.func @transform_6(%arg0: i32) -> (i32, i32) {
    %c0_i32 = arith.constant 0 : i32
    %c0_i32_0 = arith.constant 0 : i32
    %c0_i32_1 = arith.constant 0 : i32
    return %c0_i32, %c0_i32_0 : i32, i32
  }
  func.func @transform_7(%arg0: i32) -> (i32, i32) {
    %c0_i32 = arith.constant 0 : i32
    %c0_i32_0 = arith.constant 0 : i32
    %c0_i32_1 = arith.constant 0 : i32
    return %c0_i32, %c0_i32_0 : i32, i32
  }
  func.func @transform_8(%arg0: i32) -> (i32, i32) {
    %c0_i32 = arith.constant 0 : i32
    %c0_i32_0 = arith.constant 0 : i32
    %c0_i32_1 = arith.constant 0 : i32
    return %c0_i32, %c0_i32_0 : i32, i32
  }
  func.func @transform_9(%arg0: i32) -> (i32, i32) {
    %c0_i32 = arith.constant 0 : i32
    %c0_i32_0 = arith.constant 0 : i32
    %c0_i32_1 = arith.constant 0 : i32
    return %c0_i32, %c0_i32_0 : i32, i32
  }
  func.func @transform_10(%arg0: i32) -> (i32, i32) {
    %c0_i32 = arith.constant 0 : i32
    %c0_i32_0 = arith.constant 0 : i32
    %c0_i32_1 = arith.constant 0 : i32
    return %c0_i32, %c0_i32_0 : i32, i32
  }
  func.func @transform_11(%arg0: i32) -> (i32, i32) {
    %c0_i32 = arith.constant 0 : i32
    %c0_i32_0 = arith.constant 0 : i32
    %c0_i32_1 = arith.constant 0 : i32
    return %c0_i32, %c0_i32_0 : i32, i32
  }
  func.func @transform_12(%arg0: i32) -> (i32, i32) {
    %c0_i32 = arith.constant 0 : i32
    %c0_i32_0 = arith.constant 0 : i32
    %c0_i32_1 = arith.constant 0 : i32
    return %c0_i32, %c0_i32_0 : i32, i32
  }
  func.func @transform_13(%arg0: i32) -> (i32, i32) {
    %c0_i32 = arith.constant 0 : i32
    %c0_i32_0 = arith.constant 0 : i32
    %c0_i32_1 = arith.constant 0 : i32
    return %c0_i32, %c0_i32_0 : i32, i32
  }
  func.func @transform_14(%arg0: i32) -> (i32, i32) {
    %c0_i32 = arith.constant 0 : i32
    %c0_i32_0 = arith.constant 0 : i32
    %c0_i32_1 = arith.constant 0 : i32
    return %c0_i32, %c0_i32_0 : i32, i32
  }
  func.func @transform_15(%arg0: i32) -> (i32, i32, i32) {
    %c0_i32 = arith.constant 0 : i32
    %c0_i32_0 = arith.constant 0 : i32
    %c0_i32_1 = arith.constant 0 : i32
    return %arg0, %c0_i32, %c0_i32_0 : i32, i32, i32
  }
}

</mosaic_0001>

<bundles_post_ra>
// kernel: tpu_custom_call.1
= control target key start
LH: loop header
LB: loop body
LE: loop exit
PB: predicated region body
PF: predicated region fallthrough
CT: control target
= control target key end

     0   :  { %20 = vsyncpa [#allocation3], 0  ;;  %s3728_s0 = inlined_call_operand.vmem [shape: f32[2,64,64], index: 0, kind: input, shape index: {}]   ;;  %s3729_s1 = inlined_call_operand.vmem [shape: f32[64,128], index: 1, kind: input, shape index: {}]   ;;  %s3730_s2 = inlined_call_operand.vmem [shape: f32[1,128], index: 2, kind: input, shape index: {}]   ;;  %s3731_s3 = inlined_call_operand.vmem [shape: f32[128,64], index: 3, kind: input, shape index: {}]   ;;  %s3732_s4 = inlined_call_operand.vmem [shape: f32[1,64], index: 4, kind: input, shape index: {}]   ;;  %s3733_s5 = inlined_call_operand.hbm [shape: f32[64,64], index: 5, kind: input, shape index: {}]   ;;  %s3734_s6 = inlined_call_operand.hbm [shape: f32[64,64], index: 6, kind: input, shape index: {}]   ;;  %s3735_s7 = inlined_call_operand.hbm [shape: f32[64,512], index: 7, kind: input, shape index: {}]   ;;  %s3736_s8 = inlined_call_operand.vmem [shape: f32[1,512], index: 8, kind: input, shape index: {}]   ;;  %s3737_s9 = inlined_call_operand.hbm [shape: f32[512,256], index: 9, kind: input, shape index: {}]   ;;  %s3738_s10 = inlined_call_operand.vmem [shape: f32[1,256], index: 10, kind: input, shape index: {}]   ;;  %s3739_s11 = inlined_call_operand.hbm [shape: f32[256,128], index: 11, kind: input, shape index: {}]   ;;  %s3740_s12 = inlined_call_operand.vmem [shape: f32[1,128], index: 12, kind: input, shape index: {}]   ;;  %s3741_s13 = inlined_call_operand.hbm [shape: f32[128,128], index: 13, kind: input, shape index: {}]   ;;  %s3742_s14 = inlined_call_operand.vmem [shape: f32[1,128], index: 14, kind: input, shape index: {}]   ;;  %s3743_s15 = inlined_call_operand.hbm [shape: f32[1,2,128], index: 15, kind: output, shape index: {}]  }
   0x1   :  { %21 = vsyncpa [#allocation6], 0 }
   0x2   :  { %22 = vsyncpa [#allocation9], 0 }
   0x3   :  { %23 = vsyncpa [#allocation12], 0 }
   0x4   :  { %24 = vsyncpa [#allocation4], 0  ;;  %s2906_s18 = smov [#allocation5]   ;;  %s2907_s20 = smov [#allocation8]  }
   0x5   :  { %s52_s19 = sshll.u32 %s2906_s18, 4  ;;  %s78_s21 = sshll.u32 %s2907_s20, 4  ;;  %s53_s19 = int_to_ptr.vmem [resolvable:$true] %s52_s19  ;;  %s3003_s21 = int_to_ptr.vmem [resolvable:$true] %s78_s21 }
   0x6   :  { %s2742_s24 = scalar_lea.hbm %s3734_s6, 1024 }
   0x7   :  { %p2743_p0 = scmp.ne.s32.totalorder %s3734_s6, %s2742_s24  ;;  %p2746_p1 = scmp.lt.u32.totalorder %s2742_s24, %s3734_s6 }
   0x9   :  { %p2748_p2 = pnand %p2746_p1, %p2743_p0 }
   0xb   :  { %2751 = shalt.err (!%p2748_p2)
}
   0xc   :  { %s2752_s29 = scalar_lea.vmem %s53_s19, 1024  ;;  %p2757_p4 = scmp.lt.s32.totalorder %s53_s19, %s53_s19 }
   0xd   :  { %p2753_p3 = scmp.ne.s32.totalorder %s53_s19, %s2752_s29  ;;  %p2758_p5 = scmp.lt.s32.totalorder %s2752_s29, %s2752_s29 }
   0xf   :  { %p2759_p6 = por %p2758_p5, %p2757_p4 }
  0x11   :  { %p2760_p7 = pnand %p2759_p6, %p2753_p3 }
  0x13   :  { %2763 = shalt.err (!%p2760_p7)
}
  0x14   :  { %s3744_s30 = smov 128   ;;  %s3746_s16 = smov 8  }
  0x15   :  { %58 = dma.hbm_to_vmem [thread:$0]  %s3734_s6, 1024, %s53_s19, [#allocation6], %s3744_s30, %s3744_s30, %s3746_s16  }
  0x16   :  { %s2764_s23 = scalar_lea.hbm %s3737_s9, 16384 }
  0x17   :  { %p2765_p8 = scmp.ne.s32.totalorder %s3737_s9, %s2764_s23  ;;  %p2768_p9 = scmp.lt.u32.totalorder %s2764_s23, %s3737_s9 }
  0x19   :  { %p2770_p10 = pnand %p2768_p9, %p2765_p8 }
  0x1b   :  { %2773 = shalt.err (!%p2770_p10)
}
  0x1c   :  { %s2774_s28 = scalar_lea.vmem %s3003_s21, 16384  ;;  %p2779_p12 = scmp.lt.s32.totalorder %s3003_s21, %s3003_s21 }
  0x1d   :  { %p2775_p11 = scmp.ne.s32.totalorder %s3003_s21, %s2774_s28  ;;  %p2780_p13 = scmp.lt.s32.totalorder %s2774_s28, %s2774_s28 }
  0x1f   :  { %p2781_p0 = por %p2780_p13, %p2779_p12 }
  0x21   :  { %p2782_p1 = pnand %p2781_p0, %p2775_p11 }
  0x23   :  { %2785 = shalt.err (!%p2782_p1)
}
  0x24   :  { %s2910_s6 = smov 256   ;;  %s2911_s19 = smov 16  }
  0x25   :  { %84 = dma.hbm_to_vmem [thread:$0]  %s3737_s9, 16384, %s3003_s21, [#allocation9], %s2910_s6, %s2910_s6, %s2911_s19  }
  0x26   :  { %s2912_s18 = smov [#allocation2]   ;;  %s2913_s22 = smov [#allocation7]  }
  0x27   :  { %s40_s20 = sshll.u32 %s2912_s18, 4  ;;  %s64_s23 = sshll.u32 %s2913_s22, 4  ;;  %s41_s20 = int_to_ptr.vmem [resolvable:$true] %s40_s20  ;;  %s3037_s23 = int_to_ptr.vmem [resolvable:$true] %s64_s23 }
  0x28   :  { %s2786_s26 = scalar_lea.hbm %s3733_s5, 1024 }
  0x29   :  { %p2787_p2 = scmp.ne.s32.totalorder %s3733_s5, %s2786_s26  ;;  %p2790_p3 = scmp.lt.u32.totalorder %s2786_s26, %s3733_s5 }
  0x2b   :  { %p2792_p4 = pnand %p2790_p3, %p2787_p2 }
  0x2d   :  { %2795 = shalt.err (!%p2792_p4)
}
  0x2e   :  { %s2796_s9 = scalar_lea.vmem %s41_s20, 1024  ;;  %p2801_p6 = scmp.lt.s32.totalorder %s41_s20, %s41_s20 }
  0x2f   :  { %p2797_p5 = scmp.ne.s32.totalorder %s41_s20, %s2796_s9  ;;  %p2802_p7 = scmp.lt.s32.totalorder %s2796_s9, %s2796_s9 }
  0x31   :  { %p2803_p8 = por %p2802_p7, %p2801_p6 }
  0x33   :  { %p2804_p9 = pnand %p2803_p8, %p2797_p5 }
  0x35   :  { %2807 = shalt.err (!%p2804_p9)
}
  0x36   :  { %s3750_s21 = smov 8   ;;  %s3751_s6 = smov 128  }
  0x37   :  { %46 = dma.hbm_to_vmem [thread:$0]  %s3733_s5, 1024, %s41_s20, [#allocation3], %s3751_s6, %s3751_s6, %s3750_s21  }
  0x38   :  { %s2808_s30 = scalar_lea.hbm %s3735_s7, 4096 }
  0x39   :  { %p2809_p10 = scmp.ne.s32.totalorder %s3735_s7, %s2808_s30  ;;  %p2812_p11 = scmp.lt.u32.totalorder %s2808_s30, %s3735_s7 }
  0x3b   :  { %p2814_p12 = pnand %p2812_p11, %p2809_p10 }
  0x3d   :  { %2817 = shalt.err (!%p2814_p12)
}
  0x3e   :  { %s2818_s26 = scalar_lea.vmem %s3037_s23, 4096  ;;  %p2823_p0 = scmp.lt.s32.totalorder %s3037_s23, %s3037_s23 }
  0x3f   :  { %p2819_p13 = scmp.ne.s32.totalorder %s3037_s23, %s2818_s26  ;;  %p2824_p1 = scmp.lt.s32.totalorder %s2818_s26, %s2818_s26 }
  0x41   :  { %p2825_p2 = por %p2824_p1, %p2823_p0 }
  0x43   :  { %p2826_p3 = pnand %p2825_p2, %p2819_p13 }
  0x45   :  { %2829 = shalt.err (!%p2826_p3)
}
  0x46   :  { %s2914_s5 = smov 512   ;;  %s2915_s20 = smov 32  }
  0x47   :  { %70 = dma.hbm_to_vmem [thread:$0]  %s3735_s7, 4096, %s3037_s23, [#allocation6], %s2914_s5, %s2914_s5, %s2915_s20  }
  0x48   :  { %s2916_s9 = smov [#allocation10]   ;;  %s2917_s29 = smov [#allocation11]  }
  0x49   :  { %s92_s19 = sshll.u32 %s2916_s9, 4  ;;  %s106_s17 = sshll.u32 %s2917_s29, 4  ;;  %s93_s19 = int_to_ptr.vmem [resolvable:$true] %s92_s19  ;;  %s3071_s17 = int_to_ptr.vmem [resolvable:$true] %s106_s17 }
  0x4a   :  { %s2830_s16 = scalar_lea.hbm %s3739_s11, 4096 }
  0x4b   :  { %p2831_p4 = scmp.ne.s32.totalorder %s3739_s11, %s2830_s16  ;;  %p2834_p5 = scmp.lt.u32.totalorder %s2830_s16, %s3739_s11 }
  0x4d   :  { %p2836_p6 = pnand %p2834_p5, %p2831_p4 }
  0x4f   :  { %2839 = shalt.err (!%p2836_p6)
}
  0x50   :  { %s2840_s7 = scalar_lea.vmem %s93_s19, 4096  ;;  %p2845_p8 = scmp.lt.s32.totalorder %s93_s19, %s93_s19 }
  0x51   :  { %p2841_p7 = scmp.ne.s32.totalorder %s93_s19, %s2840_s7  ;;  %p2846_p9 = scmp.lt.s32.totalorder %s2840_s7, %s2840_s7 }
  0x53   :  { %p2847_p10 = por %p2846_p9, %p2845_p8 }
  0x55   :  { %p2848_p11 = pnand %p2847_p10, %p2841_p7 }
  0x57   :  { %2851 = shalt.err (!%p2848_p11)
}
  0x58   :  { %98 = dma.hbm_to_vmem [thread:$0]  %s3739_s11, 4096, %s93_s19, [#allocation9], %s3751_s6, %s3751_s6, %s3750_s21  }
  0x59   :  { %s2852_s28 = scalar_lea.hbm %s3741_s13, 2048 }
  0x5a   :  { %p2853_p12 = scmp.ne.s32.totalorder %s3741_s13, %s2852_s28  ;;  %p2856_p13 = scmp.lt.u32.totalorder %s2852_s28, %s3741_s13 }
  0x5c   :  { %p2858_p0 = pnand %p2856_p13, %p2853_p12 }
  0x5e   :  { %2861 = shalt.err (!%p2858_p0)
}
  0x5f   :  { %s2862_s16 = scalar_lea.vmem %s3071_s17, 2048  ;;  %p2867_p2 = scmp.lt.s32.totalorder %s3071_s17, %s3071_s17 }
  0x60   :  { %p2863_p1 = scmp.ne.s32.totalorder %s3071_s17, %s2862_s16  ;;  %p2868_p3 = scmp.lt.s32.totalorder %s2862_s16, %s2862_s16 }
  0x62   :  { %p2869_p4 = por %p2868_p3, %p2867_p2 }
  0x64   :  { %p2870_p5 = pnand %p2869_p4, %p2863_p1 }
  0x66   :  { %2873 = shalt.err (!%p2870_p5)
}
  0x67   :  { %112 = dma.hbm_to_vmem [thread:$0]  %s3741_s13, 2048, %s3071_s17, [#allocation12], %s3751_s6, %s3751_s6, %s3750_s21  }
  0x68   :  { %2896 = dma.done.wait [#allocation3], 1024  }
  0x69   :  { %2897 = vsyncadd [#allocation3], 4294966272 }
  0x6a   :  { %2898 = dma.done.wait [#allocation6], 5120  }
  0x6b   :  { %2899 = vsyncadd [#allocation6], 4294962176 }
  0x6c   :  { %2900 = dma.done.wait [#allocation9], 20480  }
  0x6d   :  { %2901 = vsyncadd [#allocation9], 4294946816 }
  0x6e   :  { %2902 = dma.done.wait [#allocation12], 2048  }
  0x6f   :  { %2903 = vsyncadd [#allocation12], 4294965248  ;;  %vm149_vm0 = vcmask 523264   ;;  %v3111_v0 = vld [vmem:[%s3728_s0 + $0x40] sm:$0xff]  ;;  %v3121_v2 = vld [vmem:[%s3728_s0 + $0x48] sm:$0xff]  ;;  %v3748_v35 = vmov 0.0|0.0  }
  0x70   :  { %v3116_v1 = vld [vmem:[%s3728_s0] sm:$0xff]  ;;  %v174_v3 = vsel %vm149_vm0, %v3111_v0, 0.0  ;;  %v3130_v5 = vld [vmem:[%s3728_s0 + $0x8] sm:$0xff]  ;;  %v177_v6 = vsel %vm149_vm0, %v3121_v2, 0.0  ;;  %v3139_v8 = vld [vmem:[%s3728_s0 + $0x50] sm:$0xff]  ;;  %2379 = vmatprep.subr.bf16.mxu1 %v3748_v35  ;;  %2451 = vmatprep.subr.bf16.mxu0 %v3748_v35  ;;  %vm2919_vm1 = vmmov 0  }
  0x71   :  { %v150_v4 = vsel %vm149_vm0, %v3116_v1, 0.0  ;;  %175 = vadd.xlane.f32.xlu1 %v174_v3  ;;  %v153_v7 = vsel %vm149_vm0, %v3130_v5, 0.0  ;;  %v3144_v9 = vld [vmem:[%s3728_s0 + $0x10] sm:$0xff]  ;;  %v180_v10 = vsel %vm149_vm0, %v3139_v8, 0.0  ;;  %v3153_v12 = vld [vmem:[%s3728_s0 + $0x58] sm:$0xff]  ;;  %v3167_v16 = vld [vmem:[%s3728_s0 + $0x60] sm:$0xff] }
  0x72   :  { %151 = vadd.xlane.f32.xlu0 %v150_v4  ;;  %v156_v11 = vsel %vm149_vm0, %v3144_v9, 0.0  ;;  %v3158_v13 = vld [vmem:[%s3728_s0 + $0x18] sm:$0xff]  ;;  %v183_v14 = vsel %vm149_vm0, %v3153_v12, 0.0  ;;  %v3172_v17 = vld [vmem:[%s3728_s0 + $0x20] sm:$0xff]  ;;  %v186_v18 = vsel %vm149_vm0, %v3167_v16, 0.0  ;;  %v3181_v20 = vld [vmem:[%s3728_s0 + $0x68] sm:$0xff] }
  0x73   :  { %v159_v15 = vsel %vm149_vm0, %v3158_v13, 0.0  ;;  %v162_v19 = vsel %vm149_vm0, %v3172_v17, 0.0  ;;  %v3186_v21 = vld [vmem:[%s3728_s0 + $0x28] sm:$0xff]  ;;  %v189_v22 = vsel %vm149_vm0, %v3181_v20, 0.0  ;;  %v3195_v24 = vld [vmem:[%s3728_s0 + $0x70] sm:$0xff]  ;;  %v3209_v28 = vld [vmem:[%s3728_s0 + $0x78] sm:$0xff] }
  0x74   :  { %v165_v23 = vsel %vm149_vm0, %v3186_v21, 0.0  ;;  %v3200_v25 = vld [vmem:[%s3728_s0 + $0x30] sm:$0xff]  ;;  %v192_v26 = vsel %vm149_vm0, %v3195_v24, 0.0  ;;  %v3214_v29 = vld [vmem:[%s3728_s0 + $0x38] sm:$0xff]  ;;  %v195_v30 = vsel %vm149_vm0, %v3209_v28, 0.0  ;;  %v263_v32 = vld [vmem:[%s3729_s1] sm:$0xff] }
  0x75   :  { %178 = vadd.xlane.f32.xlu1 %v177_v6  ;;  %v168_v27 = vsel %vm149_vm0, %v3200_v25, 0.0  ;;  %v171_v31 = vsel %vm149_vm0, %v3214_v29, 0.0  ;;  %v264_v33 = vld [vmem:[%s3729_s1 + $0x8] sm:$0xff]  ;;  %v265_v36 = vld [vmem:[%s3729_s1 + $0x10] sm:$0xff]  ;;  %v266_v37 = vld [vmem:[%s3729_s1 + $0x18] sm:$0xff]  ;;  %v2920_v45 = vmov 0.0   ;;  %v294_v6 = vlaneseq }
  0x76   :  { %154 = vadd.xlane.f32.xlu0 %v153_v7  ;;  %v3226_v34 = vpack.c.bf16 %v264_v33, %v263_v32  ;;  %v3238_v38 = vpack.c.bf16 %v266_v37, %v265_v36  ;;  %v267_v39 = vld [vmem:[%s3729_s1 + $0x20] sm:$0xff]  ;;  %v268_v40 = vld [vmem:[%s3729_s1 + $0x28] sm:$0xff]  ;;  %v269_v42 = vld [vmem:[%s3729_s1 + $0x30] sm:$0xff]  ;;  %2214 = vmatprep.mubr.msk.f32.mxu1 %vm2919_vm1, %v2920_v45  ;;  %v218_v46 = vsel %vm149_vm0, %v3130_v5, -inf  ;;  %v215_v47 = vsel %vm149_vm0, %v3116_v1, -inf  ;;  %s2922_s6 = smov [#allocation13]  }
  0x77   :  { %v3248_v41 = vpack.c.bf16 %v268_v40, %v267_v39  ;;  %v270_v43 = vld [vmem:[%s3729_s1 + $0x38] sm:$0xff]  ;;  %2322 = vmatprep.mubr.msk.f32.mxu0 %vm2919_vm1, %v2920_v45  ;;  %v242_v48 = vsel %vm149_vm0, %v3121_v2, -inf  ;;  %v239_v49 = vsel %vm149_vm0, %v3111_v0, -inf  ;;  %v245_v50 = vsel %vm149_vm0, %v3139_v8, -inf  ;;  %s2052_s17 = sshll.u32 %s2922_s6, 4  ;;  %s2053_s17 = int_to_ptr.vmem [resolvable:$true] %s2052_s17 }
  0x78   :  { %2381 = vmatpush3.bf16.msra.mxu1 %v3226_v34  ;;  %v3258_v44 = vpack.c.bf16 %v270_v43, %v269_v42  ;;  %v221_v51 = vsel %vm149_vm0, %v3144_v9, -inf  ;;  %v248_v52 = vsel %vm149_vm0, %v3153_v12, -inf  ;;  %v224_v53 = vsel %vm149_vm0, %v3158_v13, -inf  ;;  %s2874_s7 = scalar_lea.vmem %s2053_s17, 32  ;;  %p2879_p7 = scmp.lt.s32.totalorder %s2053_s17, %s2053_s17 }
  0x79   :  { %181 = vadd.xlane.f32.xlu1 %v180_v10  ;;  %2382 = vmatprep.subr.bf16.mxu1 %v3748_v35  ;;  %v251_v54 = vsel %vm149_vm0, %v3167_v16, -inf  ;;  %v227_v55 = vsel %vm149_vm0, %v3172_v17, -inf  ;;  %v254_v56 = vsel %vm149_vm0, %v3181_v20, -inf  ;;  %v230_v57 = vsel %vm149_vm0, %v3186_v21, -inf  ;;  %p2875_p6 = scmp.ne.s32.totalorder %s2053_s17, %s2874_s7  ;;  %p2880_p8 = scmp.lt.s32.totalorder %s2874_s7, %s2874_s7 }
  0x7a   :  { %157 = vadd.xlane.f32.xlu0 %v156_v11  ;;  %v257_v58 = vsel %vm149_vm0, %v3195_v24, -inf  ;;  %v233_v59 = vsel %vm149_vm0, %v3200_v25, -inf  ;;  %v260_v60 = vsel %vm149_vm0, %v3209_v28, -inf  ;;  %v236_v61 = vsel %vm149_vm0, %v3214_v29, -inf }
  0x7b   :  { %v295_v11 = vand.u32 127, %v294_v6  ;;  %vm305_vm2 = vcmask 130112   ;;  %vm312_vm3 = vcmask 195712   ;;  %vm319_vm4 = vcmask 261312   ;;  %p2881_p9 = por %p2880_p8, %p2879_p7 }
  0x7c   :  { %2384 = vmatpush3.bf16.msra.mxu1 %v3238_v38  ;;  %vm326_vm5 = vcmask 326912   ;;  %vm333_vm6 = vcmask 392512   ;;  %vm340_vm7 = vcmask 458112   ;;  %vm347_vm8 = vcmask 523712  }
  0x7d   :  { %184 = vadd.xlane.f32.xlu1 %v183_v14  ;;  %2385 = vmatprep.subr.bf16.mxu1 %v3748_v35  ;;  %v3298_v14 = vshrl.u32 %v294_v6, 7  ;;  %v328_v36 = vadd.s32 4294967256, %v295_v11  ;;  %v335_v39 = vadd.s32 4294967248, %v295_v11  ;;  %vm388_vm9 = vcmask 1041409   ;;  %p2882_p10 = pnand %p2881_p9, %p2875_p6 }
  0x7e   :  { %160 = vadd.xlane.f32.xlu0 %v159_v15 }
  0x80   :  { %2387 = vmatpush3.bf16.msra.mxu1 %v3248_v41 }
  0x81   :  { %187 = vadd.xlane.f32.xlu1 %v186_v18  ;;  %2388 = vmatprep.subr.bf16.mxu1 %v3748_v35 }
  0x82   :  { %163 = vadd.xlane.f32.xlu0 %v162_v19  ;;  %v300_v19 = vadd.s32 4294967288, %v295_v11 }
  0x84   :  { %2390 = vmatpush3.bf16.msra.mxu1 %v3258_v44  ;;  %v3304_v32 = vsub.s32 %v300_v19, %v3298_v14 }
  0x85   :  { %190 = vadd.xlane.f32.xlu1 %v189_v22  ;;  %2391 = vmatprep.subr.bf16.mxu1 %v3748_v35  ;;  %v307_v22 = vadd.s32 4294967280, %v295_v11 }
  0x86   :  { %166 = vadd.xlane.f32.xlu0 %v165_v23  ;;  %v314_v23 = vadd.s32 4294967272, %v295_v11 }
  0x87   :  { %v3307_v33 = vsub.s32 %v307_v22, %v3298_v14 }
  0x88   :  { %v3310_v37 = vsub.s32 %v314_v23, %v3298_v14 }
  0x89   :  { %193 = vadd.xlane.f32.xlu1 %v192_v26  ;;  %v321_v26 = vadd.s32 4294967264, %v295_v11 }
  0x8a   :  { %169 = vadd.xlane.f32.xlu0 %v168_v27  ;;  %v3301_v27 = vsub.s32 %v295_v11, %v3298_v14 }
  0x8b   :  { %v3313_v43 = vsub.s32 %v321_v26, %v3298_v14 }
  0x8d   :  { %196 = vadd.xlane.f32.xlu1 %v195_v30 }
  0x8e   :  { %172 = vadd.xlane.f32.xlu0 %v171_v31 }
  0x91   :  { %219 = vmax.xlane.f32.xlu1 %v218_v46 }
  0x92   :  { %216 = vmax.xlane.f32.xlu0 %v215_v47 }
  0x95   :  { %243 = vmax.xlane.f32.xlu1 %v242_v48 }
  0x96   :  { %240 = vmax.xlane.f32.xlu0 %v239_v49 }
  0x99   :  { %246 = vmax.xlane.f32.xlu1 %v245_v50 }
  0x9a   :  { %222 = vmax.xlane.f32.xlu0 %v221_v51 }
  0x9d   :  { %249 = vmax.xlane.f32.xlu1 %v248_v52 }
  0x9e   :  { %225 = vmax.xlane.f32.xlu0 %v224_v53 }
  0xa1   :  { %252 = vmax.xlane.f32.xlu1 %v251_v54  ;;  %v3316_v54 = vsub.s32 %v328_v36, %v3298_v14 }
  0xa2   :  { %228 = vmax.xlane.f32.xlu0 %v227_v55 }
  0xa5   :  { %255 = vmax.xlane.f32.xlu1 %v254_v56 }
  0xa6   :  { %231 = vmax.xlane.f32.xlu0 %v230_v57  ;;  %v3319_v57 = vsub.s32 %v335_v39, %v3298_v14 }
  0xa9   :  { %258 = vmax.xlane.f32.xlu1 %v257_v58  ;;  %v342_v58 = vadd.s32 4294967240, %v295_v11 }
  0xaa   :  { %234 = vmax.xlane.f32.xlu0 %v233_v59 }
  0xab   :  { %v3332_v26 = vsub.s32 %v342_v58, %v3298_v14 }
  0xad   :  { %261 = vmax.xlane.f32.xlu1 %v260_v60 }
  0xae   :  { %237 = vmax.xlane.f32.xlu0 %v236_v61 }
  0xfe   :  { %v176_v62 = vpop.xlane.xlu1 %175 }
  0xff   :  { %v152_v63 = vpop.xlane.xlu0 %151  ;;  %v207_v46 = vmul.f32 0.015625, %v176_v62 }
 0x100   :  { %v199_v47 = vmul.f32 0.015625, %v152_v63 }
 0x101   :  { %v352_v63 = vrot.slane %v207_v46, %v3301_v27 }
 0x102   :  { %v179_v3 = vpop.xlane.xlu1 %178 }
 0x103   :  { %v155_v4 = vpop.xlane.xlu0 %154  ;;  %v208_v40 = vmul.f32 0.015625, %v179_v3  ;;  %v299_v3 = vrot.slane %v199_v47, %v3301_v27 }
 0x104   :  { %v200_v42 = vmul.f32 0.015625, %v155_v4 }
 0x105   :  { %v356_v59 = vrot.slane %v208_v40, %v3304_v32 }
 0x106   :  { %v182_v7 = vpop.xlane.xlu1 %181  ;;  %v304_v60 = vrot.slane %v200_v42, %v3304_v32 }
 0x107   :  { %v158_v10 = vpop.xlane.xlu0 %157  ;;  %v209_v48 = vmul.f32 0.015625, %v182_v7 }
 0x108   :  { %v201_v49 = vmul.f32 0.015625, %v158_v10 }
 0x109   :  { %v361_v4 = vrot.slane %v209_v48, %v3307_v33 }
 0x10a   :  { %v185_v15 = vpop.xlane.xlu1 %184  ;;  %v311_v6 = vrot.slane %v201_v49, %v3307_v33 }
 0x10b   :  { %v161_v18 = vpop.xlane.xlu0 %160  ;;  %v210_v52 = vmul.f32 0.015625, %v185_v15 }
 0x10c   :  { %v202_v53 = vmul.f32 0.015625, %v161_v18 }
 0x10d   :  { %v366_v15 = vrot.slane %v210_v52, %v3310_v37 }
 0x10e   :  { %v188_v30 = vpop.xlane.xlu1 %187  ;;  %v318_v11 = vrot.slane %v202_v53, %v3310_v37 }
 0x10f   :  { %v164_v31 = vpop.xlane.xlu0 %163  ;;  %v211_v55 = vmul.f32 0.015625, %v188_v30  ;;  %v357_v30 = vsel %vm305_vm2, %v356_v59, %v352_v63 }
 0x110   :  { %v203_v56 = vmul.f32 0.015625, %v164_v31  ;;  %v306_v31 = vsel %vm305_vm2, %v304_v60, %v299_v3  ;;  %v362_v40 = vsel %vm312_vm3, %v361_v4, %v357_v30 }
 0x111   :  { %v371_v22 = vrot.slane %v211_v55, %v3313_v43  ;;  %v313_v42 = vsel %vm312_vm3, %v311_v6, %v306_v31  ;;  %v463_v55 = vld [vmem:[%s3731_s3] sm:$0xff]  ;;  %v469_v31 = vld [vmem:[%s3731_s3 + $0x30] sm:$0xff] }
 0x112   :  { %v191_v50 = vpop.xlane.xlu1 %190  ;;  %v325_v23 = vrot.slane %v203_v56, %v3313_v43  ;;  %v464_v56 = vld [vmem:[%s3731_s3 + $0x8] sm:$0xff] }
 0x113   :  { %v167_v51 = vpop.xlane.xlu0 %166  ;;  %v212_v61 = vmul.f32 0.015625, %v191_v50  ;;  %v367_v50 = vsel %vm319_vm4, %v366_v15, %v362_v40  ;;  %v3358_v6 = vpack.c.bf16 %v464_v56, %v463_v55  ;;  %v465_v15 = vld [vmem:[%s3731_s3 + $0x10] sm:$0xff]  ;;  %v471_v40 = vld [vmem:[%s3731_s3 + $0x40] sm:$0xff]  ;;  %v478_v55 = vld [vmem:[%s3731_s3 + $0x78] sm:$0xff] }
 0x114   :  { %v204_v62 = vmul.f32 0.015625, %v167_v51  ;;  %v320_v51 = vsel %vm319_vm4, %v318_v11, %v313_v42  ;;  %v372_v58 = vsel %vm326_vm5, %v371_v22, %v367_v50  ;;  %v466_v11 = vld [vmem:[%s3731_s3 + $0x18] sm:$0xff]  ;;  %v467_v22 = vld [vmem:[%s3731_s3 + $0x20] sm:$0xff]  ;;  %v472_v42 = vld [vmem:[%s3731_s3 + $0x48] sm:$0xff] }
 0x115   :  { %v376_v36 = vrot.slane %v212_v61, %v3316_v54  ;;  %v327_v59 = vsel %vm326_vm5, %v325_v23, %v320_v51  ;;  %v468_v23 = vld [vmem:[%s3731_s3 + $0x28] sm:$0xff]  ;;  %v475_v50 = vld [vmem:[%s3731_s3 + $0x60] sm:$0xff] }
 0x116   :  { %v194_v7 = vpop.xlane.xlu1 %193  ;;  %v332_v39 = vrot.slane %v204_v62, %v3316_v54  ;;  %v3383_v30 = vpack.c.bf16 %v468_v23, %v467_v22  ;;  %v476_v51 = vld [vmem:[%s3731_s3 + $0x68] sm:$0xff] }
 0x117   :  { %v170_v10 = vpop.xlane.xlu0 %169  ;;  %v213_v18 = vmul.f32 0.015625, %v194_v7  ;;  %v377_v60 = vsel %vm333_vm6, %v376_v36, %v372_v58  ;;  %v470_v36 = vld [vmem:[%s3731_s3 + $0x38] sm:$0xff] }
 0x118   :  { %v205_v19 = vmul.f32 0.015625, %v170_v10  ;;  %v334_v61 = vsel %vm333_vm6, %v332_v39, %v327_v59  ;;  %v3393_v39 = vpack.c.bf16 %v470_v36, %v469_v31 }
 0x119   :  { %v381_v46 = vrot.slane %v213_v18, %v3319_v57 }
 0x11a   :  { %v339_v47 = vrot.slane %v205_v19, %v3319_v57  ;;  %v197_v48 = vpop.xlane.xlu1 %196  ;;  %v3371_v19 = vpack.c.bf16 %v466_v11, %v465_v15 }
 0x11b   :  { %v173_v49 = vpop.xlane.xlu0 %172  ;;  %v214_v52 = vmul.f32 0.015625, %v197_v48  ;;  %v382_v3 = vsel %vm340_vm7, %v381_v46, %v377_v60  ;;  %v3403_v46 = vpack.c.bf16 %v472_v42, %v471_v40  ;;  %v474_v48 = vld [vmem:[%s3731_s3 + $0x58] sm:$0xff]  ;;  %v2064_v42 = vld [vmem:[%s3730_s2] ss:$0 sm:$0xff] }
 0x11c   :  { %v206_v53 = vmul.f32 0.015625, %v173_v49  ;;  %v341_v4 = vsel %vm340_vm7, %v339_v47, %v334_v61  ;;  %v473_v47 = vld [vmem:[%s3731_s3 + $0x50] sm:$0xff] }
 0x11d   :  { %v386_v62 = vrot.slane %v214_v52, %v3332_v26  ;;  %v3413_v49 = vpack.c.bf16 %v474_v48, %v473_v47  ;;  %v3423_v52 = vpack.c.bf16 %v476_v51, %v475_v50 }
 0x11e   :  { %v346_v63 = vrot.slane %v206_v53, %v3332_v26  ;;  %v477_v53 = vld [vmem:[%s3731_s3 + $0x70] sm:$0xff]  ;;  %v220_v58 = vpop.xlane.xlu1 %219 }
 0x11f   :  { %v387_v10 = vsel %vm347_vm8, %v386_v62, %v382_v3  ;;  %v3434_v56 = vpack.c.bf16 %v478_v55, %v477_v53  ;;  %v217_v59 = vpop.xlane.xlu0 %216  ;;  %v579_v15 = vrot.slane %v220_v58, %v3304_v32 }
 0x120   :  { %v348_v7 = vsel %vm347_vm8, %v346_v63, %v341_v4  ;;  %v575_v11 = vrot.slane %v217_v59, %v3301_v27 }
 0x121   :  { %v389_v18 = vsel %vm388_vm9, %v387_v10, %v348_v7 }
 0x122   :  { %2215 = vmatmul.mubr.msk.f32.vlgmr.msra.gmra.mrb[0].mxu1 %vm149_vm0, %v389_v18  ;;  %v244_v60 = vpop.xlane.xlu1 %243  ;;  %v580_v47 = vsel %vm305_vm2, %v579_v15, %v575_v11 }
 0x123   :  { %2393 = vmatpush3.bf16.msra.mxu1 %v3358_v6  ;;  %2249 = vmatprep.mubr.msk.f32.mxu1 %vm2919_vm1, %v2920_v45  ;;  %v241_v61 = vpop.xlane.xlu0 %240  ;;  %v618_v18 = vrot.slane %v244_v60, %v3304_v32 }
 0x124   :  { %2394 = vmatprep.subr.bf16.mxu1 %v3748_v35  ;;  %v614_v22 = vrot.slane %v241_v61, %v3301_v27 }
 0x126   :  { %v247_v62 = vpop.xlane.xlu1 %246  ;;  %v619_v48 = vsel %vm305_vm2, %v618_v18, %v614_v22  ;;  %v3752_v22 = vmov 0.0|0.0  }
 0x127   :  { %2396 = vmatpush3.bf16.msra.mxu1 %v3371_v19  ;;  %v223_v63 = vpop.xlane.xlu0 %222  ;;  %v623_v23 = vrot.slane %v247_v62, %v3307_v33 }
 0x128   :  { %2397 = vmatprep.subr.bf16.mxu1 %v3748_v35  ;;  %v584_v31 = vrot.slane %v223_v63, %v3307_v33 }
 0x129   :  { %v624_v59 = vsel %vm312_vm3, %v623_v23, %v619_v48 }
 0x12a   :  { %v250_v3 = vpop.xlane.xlu1 %249  ;;  %v585_v60 = vsel %vm312_vm3, %v584_v31, %v580_v47 }
 0x12b   :  { %2399 = vmatpush3.bf16.msra.mxu1 %v3383_v30  ;;  %v226_v4 = vpop.xlane.xlu0 %225  ;;  %v628_v51 = vrot.slane %v250_v3, %v3310_v37 }
 0x12c   :  { %2400 = vmatprep.subr.bf16.mxu1 %v3748_v35  ;;  %v589_v53 = vrot.slane %v226_v4, %v3310_v37 }
 0x12d   :  { %v629_v11 = vsel %vm319_vm4, %v628_v51, %v624_v59 }
 0x12e   :  { %v253_v7 = vpop.xlane.xlu1 %252  ;;  %v590_v18 = vsel %vm319_vm4, %v589_v53, %v585_v60 }
 0x12f   :  { %2402 = vmatpush3.bf16.msra.mxu1 %v3393_v39  ;;  %v229_v10 = vpop.xlane.xlu0 %228  ;;  %v633_v62 = vrot.slane %v253_v7, %v3313_v43 }
 0x130   :  { %2403 = vmatprep.subr.bf16.mxu1 %v3748_v35  ;;  %v594_v63 = vrot.slane %v229_v10, %v3313_v43 }
 0x131   :  { %v634_v7 = vsel %vm326_vm5, %v633_v62, %v629_v11  ;;  %v3512_v62 = vsub.s32 1, %v3298_v14  ;;  %v982_v11 = vld [vmem:[#allocation5 + $0x8] sm:$0xff] }
 0x132   :  { %v256_v36 = vpop.xlane.xlu1 %255  ;;  %v595_v10 = vsel %vm326_vm5, %v594_v63, %v590_v18 }
 0x133   :  { %2405 = vmatpush3.bf16.msra.mxu1 %v3403_v46  ;;  %v232_v40 = vpop.xlane.xlu0 %231  ;;  %v638_v3 = vrot.slane %v256_v36, %v3316_v54 }
 0x134   :  { %2406 = vmatprep.subr.bf16.mxu1 %v3748_v35  ;;  %v599_v4 = vrot.slane %v232_v40, %v3316_v54 }
 0x136   :  { %v600_v36 = vsel %vm333_vm6, %v599_v4, %v595_v10  ;;  %v984_v4 = vld [vmem:[#allocation5 + $0x18] sm:$0xff]  ;;  %v985_v10 = vld [vmem:[#allocation5 + $0x20] sm:$0xff] }
 0x137   :  { %2408 = vmatpush3.bf16.msra.mxu1 %v3413_v49  ;;  %v235_v15 = vpop.xlane.xlu0 %234 }
 0x138   :  { %2409 = vmatprep.subr.bf16.mxu1 %v3748_v35  ;;  %v604_v31 = vrot.slane %v235_v15, %v3319_v57  ;;  %v981_v15 = vld [vmem:[#allocation5] sm:$0xff] }
 0x139   :  { %v2452_v18 = vpack.c.bf16 %v982_v11, %v981_v15 }
 0x13b   :  { %2411 = vmatpush3.bf16.msra.mxu1 %v3423_v52  ;;  %v238_v48 = vpop.xlane.xlu0 %237  ;;  %2453 = vmatpush3.bf16.msra.mxu0 %v2452_v18 }
 0x13c   :  { %2412 = vmatprep.subr.bf16.mxu1 %v3748_v35  ;;  %2454 = vmatprep.subr.bf16.mxu0 %v3752_v22 }
 0x13f   :  { %2414 = vmatpush3.bf16.msra.mxu1 %v3434_v56 }
 0x140   :  { %2415 = vmatprep.subr.bf16.mxu1 %v3748_v35  ;;  %v259_v35 = vpop.xlane.xlu1 %258 }
 0x141   :  { %v643_v23 = vrot.slane %v259_v35, %v3319_v57  ;;  %v605_v35 = vsel %vm340_vm7, %v604_v31, %v600_v36 }
 0x144   :  { %v262_v47 = vpop.xlane.xlu1 %261 }
 0x145   :  { %v648_v40 = vrot.slane %v262_v47, %v3332_v26  ;;  %v987_v47 = vld [vmem:[#allocation5 + $0x30] sm:$0xff] }
 0x1f5   :  { %v458_v50 = vpop.f32.mrb[0].mxu1 }
 0x1f6   :  { %v459_v55 = vadd.f32 %v2064_v42, %v458_v50  ;;  %v2216_v58 = vpop.f32.mrb[1].mxu1  ;;  %v609_v50 = vrot.slane %v238_v48, %v3332_v26  ;;  %v988_v48 = vld [vmem:[#allocation5 + $0x38] sm:$0xff] }
 0x1f8   :  { %v462_v61 = vmax.f32 %v459_v55, 0.0  ;;  %v610_v53 = vsel %vm347_vm8, %v609_v50, %v605_v35 }
 0x1fa   :  { %2250 = vmatmul.mubr.f32.vlgmr.msra.gmra.mrb[2].mxu1 %v462_v61 }
 0x1fb   :  { %2417 = vmatpush3.bf16.msra.mxu1 %v3226_v34  ;;  %2268 = vmatprep.mubr.msk.f32.mxu1 %vm2919_vm1, %v2920_v45  ;;  %v639_v34 = vsel %vm333_vm6, %v638_v3, %v634_v7  ;;  %v983_v3 = vld [vmem:[#allocation5 + $0x10] sm:$0xff] }
 0x1fc   :  { %2418 = vmatprep.subr.bf16.mxu1 %v3752_v22  ;;  %v644_v51 = vsel %vm340_vm7, %v643_v23, %v639_v34  ;;  %v2455_v7 = vpack.c.bf16 %v984_v4, %v983_v3  ;;  %v986_v23 = vld [vmem:[#allocation5 + $0x28] sm:$0xff]  ;;  %v2461_v34 = vpack.c.bf16 %v988_v48, %v987_v47 }
 0x1fd   :  { %v2458_v31 = vpack.c.bf16 %v986_v23, %v985_v10 }
 0x1fe   :  { %2456 = vmatpush3.bf16.msra.mxu0 %v2455_v7 }
 0x1ff   :  { %2420 = vmatpush3.bf16.msra.mxu1 %v3238_v38  ;;  %v649_v38 = vsel %vm347_vm8, %v648_v40, %v644_v51  ;;  %2457 = vmatprep.subr.bf16.mxu0 %v3752_v22 }
 0x200   :  { %2421 = vmatprep.subr.bf16.mxu1 %v3752_v22  ;;  %v650_v55 = vsel %vm388_vm9, %v649_v38, %v610_v53 }
 0x202   :  { %2459 = vmatpush3.bf16.msra.mxu0 %v2458_v31 }
 0x203   :  { %2423 = vmatpush3.bf16.msra.mxu1 %v3248_v41  ;;  %2460 = vmatprep.subr.bf16.mxu0 %v3752_v22 }
 0x204   :  { %2424 = vmatprep.subr.bf16.mxu1 %v3752_v22 }
 0x206   :  { %2462 = vmatpush3.bf16.msra.mxu0 %v2461_v34 }
 0x207   :  { %2426 = vmatpush3.bf16.msra.mxu1 %v3258_v44  ;;  %2463 = vmatprep.subr.bf16.mxu0 %v3752_v22 }
 0x208   :  { %2427 = vmatprep.subr.bf16.mxu1 %v3752_v22 }
 0x20a   :  { %2269 = vmatmul.mubr.msk.f32.vlgmr.msra.gmra.mrb[4].mxu1 %vm149_vm0, %v650_v55 }
 0x20b   :  { %2429 = vmatpush3.bf16.msra.mxu1 %v3358_v6  ;;  %2303 = vmatprep.mubr.msk.f32.mxu1 %vm2919_vm1, %v2920_v45 }
 0x20c   :  { %2430 = vmatprep.subr.bf16.mxu1 %v3752_v22 }
 0x20f   :  { %2432 = vmatpush3.bf16.msra.mxu1 %v3371_v19 }
 0x210   :  { %2433 = vmatprep.subr.bf16.mxu1 %v3752_v22 }
 0x213   :  { %2435 = vmatpush3.bf16.msra.mxu1 %v3383_v30  ;;  %v2066_v30 = vld [vmem:[%s3732_s4] ss:$0 sm:$0xff] }
 0x214   :  { %2436 = vmatprep.subr.bf16.mxu1 %v3752_v22 }
 0x217   :  { %2438 = vmatpush3.bf16.msra.mxu1 %v3393_v39  ;;  %v2691_v39 = vadd.f32 %v2066_v30, %v2066_v30 }
 0x218   :  { %2439 = vmatprep.subr.bf16.mxu1 %v3752_v22 }
 0x21b   :  { %2441 = vmatpush3.bf16.msra.mxu1 %v3403_v46 }
 0x21c   :  { %2442 = vmatprep.subr.bf16.mxu1 %v3752_v22 }
 0x21f   :  { %2444 = vmatpush3.bf16.msra.mxu1 %v3413_v49 }
 0x220   :  { %2445 = vmatprep.subr.bf16.mxu1 %v3752_v22 }
 0x223   :  { %2447 = vmatpush3.bf16.msra.mxu1 %v3423_v52 }
 0x224   :  { %2448 = vmatprep.subr.bf16.mxu1 %v3752_v22 }
 0x227   :  { %2450 = vmatpush3.bf16.msra.mxu1 %v3434_v56  ;;  %v3505_v56 = vsub.s32 0, %v3298_v14 }
 0x2dd   :  { %v719_v41 = vpop.f32.mrb[4].mxu1 }
 0x2de   :  { %v720_v44 = vadd.f32 %v2064_v42, %v719_v41  ;;  %v2270_v6 = vpop.f32.mrb[5].mxu1 }
 0x2e0   :  { %v723_v19 = vmax.f32 %v720_v44, 0.0 }
 0x2e2   :  { %2304 = vmatmul.mubr.f32.vlgmr.msra.gmra.mrb[2].mxu1 %v723_v19 }
 0x2e3   :  { %1547 = vmatprep.mubr.f32.mxu1 %v2920_v45 }
 0x3b5   :  { %v790_v46 = vpop.f32.mrb[2].mxu1 }
 0x3b6   :  { %v2692_v49 = vadd.f32 %v2691_v39, %v790_v46  ;;  %v2305_v58 = vpop.f32.mrb[3].mxu1 }
 0x3b8   :  { %v2068_v52 = vmul.f32 -1.442695, %v2692_v49 }
 0x3ba   :  { %2718 = vpow2.f32 %v2068_v52 }
 0x3c4   :  { %v2719_v59 = vpop.eup %2718 }
 0x3c5   :  { %v798_v60 = vadd.f32 1.0, %v2719_v59 }
 0x3c7   :  { %2720 = vrcp.f32 %v798_v60 }
 0x3d1   :  { %v3507_v42 = vpop.eup %2720 }
 0x3d2   :  { %v804_v61 = vrot.slane %v3507_v42, %v3505_v56  ;;  %v839_v63 = vrot.slane %v3507_v42, %v3512_v62 }
 0x3d4   :  { %810 = vbcast.lane.b32.xlu1 %v804_v61, 264  ;;  %806 = vbcast.lane.b32.xlu0 %v804_v61, 256 }
 0x3d8   :  { %814 = vbcast.lane.b32.xlu1 %v804_v61, 272  ;;  %841 = vbcast.lane.b32.xlu0 %v839_v63, 256 }
 0x3dc   :  { %818 = vbcast.lane.b32.xlu1 %v804_v61, 280  ;;  %849 = vbcast.lane.b32.xlu0 %v839_v63, 272 }
 0x3e0   :  { %845 = vbcast.lane.b32.xlu1 %v839_v63, 264  ;;  %822 = vbcast.lane.b32.xlu0 %v804_v61, 288 }
 0x3e4   :  { %853 = vbcast.lane.b32.xlu1 %v839_v63, 280  ;;  %857 = vbcast.lane.b32.xlu0 %v839_v63, 288 }
 0x3e8   :  { %826 = vbcast.lane.b32.xlu1 %v804_v61, 296  ;;  %830 = vbcast.lane.b32.xlu0 %v804_v61, 304 }
 0x3ec   :  { %861 = vbcast.lane.b32.xlu1 %v839_v63, 296  ;;  %865 = vbcast.lane.b32.xlu0 %v839_v63, 304 }
 0x3f0   :  { %834 = vbcast.lane.b32.xlu1 %v804_v61, 312 }
 0x3f4   :  { %869 = vbcast.lane.b32.xlu1 %v839_v63, 312 }
 0x446   :  { %v811_v36 = vpop.permute.xlu1 %810  ;;  %v807_v40 = vpop.permute.xlu0 %806 }
 0x447   :  { %v872_v6 = vmul.f32 %v811_v36, %v3130_v5  ;;  %v871_v19 = vmul.f32 %v807_v40, %v3116_v1 }
 0x449   :  { %v888_v60 = vsel %vm149_vm0, %v872_v6, 0.0  ;;  %v932_v10 = vsel %vm149_vm0, %v872_v6, -inf  ;;  %v931_v23 = vsel %vm149_vm0, %v871_v19, -inf }
 0x44a   :  { %v815_v50 = vpop.permute.xlu1 %814  ;;  %v842_v51 = vpop.permute.xlu0 %841 }
 0x44b   :  { %v879_v53 = vmul.f32 %v842_v51, %v3111_v0  ;;  %v873_v59 = vmul.f32 %v815_v50, %v3144_v9 }
 0x44d   :  { %v908_v30 = vsel %vm149_vm0, %v879_v53, 0.0  ;;  %v890_v15 = vsel %vm149_vm0, %v873_v59, 0.0 }
 0x44e   :  { %v819_v35 = vpop.permute.xlu1 %818  ;;  %v850_v38 = vpop.permute.xlu0 %849 }
 0x44f   :  { %v881_v39 = vmul.f32 %v850_v38, %v3139_v8  ;;  %v874_v5 = vmul.f32 %v819_v35, %v3158_v13 }
 0x451   :  { %v911_v1 = vsel %vm149_vm0, %v881_v39, 0.0  ;;  %v892_v3 = vsel %vm149_vm0, %v874_v5, 0.0  ;;  %v935_v4 = vsel %vm149_vm0, %v874_v5, -inf  ;;  %v954_v48 = vsel %vm149_vm0, %v881_v39, -inf }
 0x452   :  { %v846_v55 = vpop.permute.xlu1 %845  ;;  %v823_v41 = vpop.permute.xlu0 %822 }
 0x453   :  { %v880_v44 = vmul.f32 %v846_v55, %v3121_v2  ;;  %v887_v2 = vsel %vm149_vm0, %v871_v19, 0.0  ;;  %v875_v11 = vmul.f32 %v823_v41, %v3172_v17 }
 0x454   :  { %v889_v9 = vadd.f32 %v888_v60, %v887_v2 }
 0x455   :  { %v909_v46 = vsel %vm149_vm0, %v880_v44, 0.0  ;;  %v894_v34 = vsel %vm149_vm0, %v875_v11, 0.0  ;;  %v937_v38 = vsel %vm149_vm0, %v875_v11, -inf  ;;  %v953_v5 = vsel %vm149_vm0, %v880_v44, -inf }
 0x456   :  { %v910_v49 = vadd.f32 %v909_v46, %v908_v30  ;;  %v854_v58 = vpop.permute.xlu1 %853  ;;  %v858_v52 = vpop.permute.xlu0 %857  ;;  %v891_v31 = vadd.f32 %v890_v15, %v889_v9 }
 0x457   :  { %v882_v0 = vmul.f32 %v854_v58, %v3153_v12  ;;  %v933_v12 = vsel %vm149_vm0, %v873_v59, -inf  ;;  %v883_v13 = vmul.f32 %v858_v52, %v3167_v16  ;;  %v952_v16 = vsel %vm149_vm0, %v879_v53, -inf }
 0x458   :  { %v912_v61 = vadd.f32 %v911_v1, %v910_v49  ;;  %v934_v50 = vmax.f32 %v931_v23, %v933_v12  ;;  %v893_v51 = vadd.f32 %v892_v3, %v891_v31  ;;  %v955_v19 = vmax.f32 %v952_v16, %v954_v48 }
 0x459   :  { %v913_v18 = vsel %vm149_vm0, %v882_v0, 0.0  ;;  %v915_v55 = vsel %vm149_vm0, %v883_v13, 0.0  ;;  %v956_v46 = vsel %vm149_vm0, %v882_v0, -inf  ;;  %v958_v59 = vsel %vm149_vm0, %v883_v13, -inf }
 0x45a   :  { %v827_v63 = vpop.permute.xlu1 %826  ;;  %v831_v8 = vpop.permute.xlu0 %830  ;;  %v914_v47 = vadd.f32 %v913_v18, %v912_v61  ;;  %v895_v30 = vadd.f32 %v894_v34, %v893_v51  ;;  %v938_v52 = vmax.f32 %v934_v50, %v937_v38  ;;  %v959_v18 = vmax.f32 %v955_v19, %v958_v59  ;;  %v976_v59 = vld [vmem:[#allocation2 + $0x18] sm:$0xff] }
 0x45b   :  { %v876_v7 = vmul.f32 %v827_v63, %v3186_v21  ;;  %v877_v36 = vmul.f32 %v831_v8, %v3200_v25  ;;  %v936_v21 = vmax.f32 %v932_v10, %v935_v4  ;;  %v957_v8 = vmax.f32 %v953_v5, %v956_v46 }
 0x45c   :  { %v916_v39 = vadd.f32 %v915_v55, %v914_v47 }
 0x45d   :  { %v939_v41 = vsel %vm149_vm0, %v876_v7, -inf  ;;  %v896_v25 = vsel %vm149_vm0, %v876_v7, 0.0  ;;  %v941_v53 = vsel %vm149_vm0, %v877_v36, -inf  ;;  %v898_v12 = vsel %vm149_vm0, %v877_v36, 0.0 }
 0x45e   :  { %v862_v17 = vpop.permute.xlu1 %861  ;;  %v866_v35 = vpop.permute.xlu0 %865  ;;  %v940_v60 = vmax.f32 %v936_v21, %v939_v41  ;;  %v897_v1 = vadd.f32 %v896_v25, %v895_v30  ;;  %v942_v0 = vmax.f32 %v938_v52, %v941_v53  ;;  %v973_v30 = vld [vmem:[#allocation2] sm:$0xff]  ;;  %v975_v52 = vld [vmem:[#allocation2 + $0x10] sm:$0xff] }
 0x45f   :  { %v884_v40 = vmul.f32 %v862_v17, %v3181_v20  ;;  %v885_v49 = vmul.f32 %v866_v35, %v3195_v24 }
 0x460   :  { %v899_v13 = vadd.f32 %v898_v12, %v897_v1  ;;  %v2467_v1 = vpack.c.bf16 %v976_v59, %v975_v52 }
 0x461   :  { %v917_v6 = vsel %vm149_vm0, %v884_v40, 0.0  ;;  %v960_v61 = vsel %vm149_vm0, %v884_v40, -inf  ;;  %v919_v24 = vsel %vm149_vm0, %v885_v49, 0.0 }
 0x462   :  { %v835_v20 = vpop.permute.xlu1 %834  ;;  %v918_v2 = vadd.f32 %v917_v6, %v916_v39  ;;  %v961_v3 = vmax.f32 %v957_v8, %v960_v61  ;;  %v974_v39 = vld [vmem:[#allocation2 + $0x8] sm:$0xff]  ;;  %v977_v61 = vld [vmem:[#allocation2 + $0x20] sm:$0xff] }
 0x463   :  { %v878_v58 = vmul.f32 %v835_v20, %v3214_v29  ;;  %v962_v29 = vsel %vm149_vm0, %v885_v49, -inf }
 0x464   :  { %v920_v44 = vadd.f32 %v919_v24, %v918_v2  ;;  %v963_v31 = vmax.f32 %v959_v18, %v962_v29  ;;  %v980_v18 = vld [vmem:[#allocation2 + $0x38] sm:$0xff] }
 0x465   :  { %v943_v63 = vsel %vm149_vm0, %v878_v58, -inf  ;;  %v900_v7 = vsel %vm149_vm0, %v878_v58, 0.0  ;;  %v2464_v58 = vpack.c.bf16 %v974_v39, %v973_v30  ;;  %v2729_v39 = vld [vmem:[%s3728_s0 + $0x50] sm:$0xff] }
 0x466   :  { %v944_v15 = vmax.f32 %v940_v60, %v943_v63  ;;  %v870_v11 = vpop.permute.xlu1 %869  ;;  %v901_v34 = vadd.f32 %v900_v7, %v899_v13  ;;  %v978_v63 = vld [vmem:[#allocation2 + $0x28] sm:$0xff] }
 0x467   :  { %v886_v9 = vmul.f32 %v870_v11, %v3209_v28  ;;  %v979_v11 = vld [vmem:[#allocation2 + $0x30] sm:$0xff] }
 0x468   :  { %v945_v4 = vmax.f32 %v942_v0, %v944_v15  ;;  %v902_v51 = vrot.slane %v901_v34, 4  ;;  %v2470_v15 = vpack.c.bf16 %v978_v63, %v977_v61 }
 0x469   :  { %v921_v10 = vsel %vm149_vm0, %v886_v9, 0.0  ;;  %v964_v23 = vsel %vm149_vm0, %v886_v9, -inf  ;;  %v2473_v9 = vpack.c.bf16 %v980_v18, %v979_v11  ;;  %v2735_v11 = vld [vmem:[%s3728_s0 + $0x68] sm:$0xff] }
 0x46a   :  { %v946_v47 = vrot.slane %v945_v4, 4  ;;  %v922_v17 = vadd.f32 %v921_v10, %v920_v44  ;;  %v965_v48 = vmax.f32 %v961_v3, %v964_v23  ;;  %v903_v41 = vadd.f32 %v902_v51, %v901_v34 }
 0x46c   :  { %v947_v40 = vmax.f32 %v945_v4, %v946_v47  ;;  %v966_v50 = vmax.f32 %v963_v31, %v965_v48  ;;  %v923_v16 = vrot.slane %v922_v17, 4  ;;  %v904_v46 = vrot.slane %v903_v41, 2 }
 0x46d   :  { %v2921_v31 = vmov 1966171168  }
 0x46e   :  { %v948_v28 = vrot.slane %v947_v40, 2  ;;  %v967_v36 = vrot.slane %v966_v50, 4  ;;  %v924_v38 = vadd.f32 %v923_v16, %v922_v17  ;;  %v905_v5 = vadd.f32 %v904_v46, %v903_v41 }
 0x46f   :  { %v1147_v47 = vunpack.c.l.s4 %v2921_v31 }
 0x470   :  { %v949_v21 = vmax.f32 %v947_v40, %v948_v28  ;;  %v968_v35 = vmax.f32 %v966_v50, %v967_v36  ;;  %v925_v25 = vrot.slane %v924_v38, 2  ;;  %v906_v0 = vrot.slane %v905_v5, 1 }
 0x471   :  { %v1148_v17 = vunpack.c.0.s8 %v1147_v47 }
 0x472   :  { %v969_v55 = vrot.slane %v968_v35, 2  ;;  %v950_v19 = vrot.slane %v949_v21, 1  ;;  %v926_v60 = vadd.f32 %v925_v25, %v924_v38  ;;  %v907_v29 = vadd.f32 %v906_v0, %v905_v5  ;;  %v2727_v38 = vld [vmem:[%s3728_s0] sm:$0xff]  ;;  %v2734_v0 = vld [vmem:[%s3728_s0 + $0x28] sm:$0xff] }
 0x473   :  { %v1151_v48 = vsub.s32 %v1148_v17, %v3298_v14 }
 0x474   :  { %v970_v6 = vmax.f32 %v968_v35, %v969_v55  ;;  %v951_v53 = vmax.f32 %v949_v21, %v950_v19  ;;  %v927_v8 = vrot.slane %v926_v60, 1  ;;  %v929_v3 = vmul.f32 0.015625, %v907_v29  ;;  %v2726_v21 = vld [vmem:[%s3728_s0 + $0x8] sm:$0xff]  ;;  %v2728_v19 = vld [vmem:[%s3728_s0 + $0x10] sm:$0xff] }
 0x476   :  { %v971_v20 = vrot.slane %v970_v6, 1  ;;  %v928_v24 = vadd.f32 %v927_v8, %v926_v60 }
 0x478   :  { %v972_v49 = vmax.f32 %v970_v6, %v971_v20  ;;  %v930_v12 = vmul.f32 0.015625, %v928_v24 }
 0x47a   :  { %v991_v2 = vsel %vm388_vm9, %v972_v49, %v951_v53  ;;  %v1066_v44 = vsel %vm388_vm9, %v930_v12, %v929_v3  ;;  %v2730_v53 = vld [vmem:[%s3728_s0 + $0x18] sm:$0xff]  ;;  %v2737_v3 = vld [vmem:[%s3728_s0 + $0x40] sm:$0xff] }
 0x47b   :  { %2323 = vmatmul.mubr.msk.f32.vlgmr.msra.gmra.mrb[0].mxu0 %vm149_vm0, %v991_v2  ;;  %v2732_v2 = vld [vmem:[%s3728_s0 + $0x20] sm:$0xff] }
 0x47c   :  { %2465 = vmatpush3.bf16.msra.mxu0 %v2464_v58  ;;  %2341 = vmatprep.mubr.msk.f32.mxu0 %vm2919_vm1, %v2920_v45  ;;  %v2731_v58 = vld [vmem:[%s3728_s0 + $0x58] sm:$0xff] }
 0x47d   :  { %2466 = vmatprep.subr.bf16.mxu0 %v3752_v22 }
 0x480   :  { %2468 = vmatpush3.bf16.msra.mxu0 %v2467_v1  ;;  %v2733_v1 = vld [vmem:[%s3728_s0 + $0x60] sm:$0xff] }
 0x481   :  { %2469 = vmatprep.subr.bf16.mxu0 %v3752_v22 }
 0x484   :  { %2471 = vmatpush3.bf16.msra.mxu0 %v2470_v15 }
 0x485   :  { %2472 = vmatprep.subr.bf16.mxu0 %v3752_v22 }
 0x488   :  { %2474 = vmatpush3.bf16.msra.mxu0 %v2473_v9  ;;  %v2736_v9 = vld [vmem:[%s3728_s0 + $0x70] sm:$0xff] }
 0x48b   :  { %2342 = vmatmul.mubr.msk.f32.vlgmr.msra.gmra.mrb[0].mxu0 %vm149_vm0, %v1066_v44 }
 0x48c   :  { %1476 = vmatprep.mubr.f32.mxu0 %v2920_v45 }
 0x55e   :  { %v1135_v4 = vpop.f32.mrb[0].mxu0 }
 0x55f   :  { %v2071_v13 = vmul.f32 -1.442695, %v1135_v4  ;;  %v2343_v7 = vpop.f32.mrb[1].mxu0 }
 0x560   :  { %v2738_v7 = vld [vmem:[%s3728_s0 + $0x78] sm:$0xff] }
 0x561   :  { %2722 = vpow2.f32 %v2071_v13 }
 0x56b   :  { %v2723_v10 = vpop.eup %2722 }
 0x56c   :  { %v1142_v23 = vadd.f32 1.0, %v2723_v10 }
 0x56e   :  { %2724 = vrcp.f32 %v1142_v23  ;;  %v2739_v23 = vld [vmem:[%s3728_s0 + $0x48] sm:$0xff] }
 0x578   :  { %v2725_v34 = vpop.eup %2724 }
 0x579   :  { %v1152_v40 = vrot.slane %v2725_v34, %v1151_v48 }
 0x57b   :  { %v1153_v50 = vcombine.high %v1152_v40, %v1152_v40  ;;  %v1160_v28 = vrot.slane %v1152_v40, %v1151_v48 }
 0x57d   :  { %v1167_v16 = vrot.slane %v1153_v50, %v1151_v48  ;;  %v1171_v36 = vrot.slane %v1160_v28, %v3505_v56  ;;  %v2740_v48 = vld [vmem:[%s3728_s0 + $0x30] sm:$0xff]  ;;  %v2741_v50 = vld [vmem:[%s3728_s0 + $0x38] sm:$0xff] }
 0x57f   :  { %v1175_v51 = vrot.slane %v1167_v16, %v3505_v56  ;;  %v1179_v35 = vmul.f32 %v2726_v21, %v1171_v36  ;;  %v1178_v55 = vmul.f32 %v2727_v38, %v1171_v36  ;;  %v1180_v30 = vmul.f32 %v2728_v19, %v1171_v36  ;;  %v1360_v21 = vld [vmem:[#allocation7 + $0x28] sm:$0xff] }
 0x580   :  { %v1181_v49 = vmul.f32 %v2730_v53, %v1171_v36  ;;  %v1182_v5 = vmul.f32 %v2732_v2, %v1171_v36  ;;  %v1183_v15 = vmul.f32 %v2734_v0, %v1171_v36  ;;  %v1184_v34 = vmul.f32 %v2740_v48, %v1171_v36  ;;  %v1366_v53 = vld [vmem:[#allocation7 + $0x58] sm:$0xff]  ;;  %v1381_v48 = vld [vmem:[#allocation7 + $0xd0] sm:$0xff] }
 0x581   :  { %v1197_v41 = vsel %vm149_vm0, %v1179_v35, 0.0  ;;  %v1194_v6 = vsel %vm149_vm0, %v1178_v55, 0.0  ;;  %v1188_v25 = vmul.f32 %v2729_v39, %v1175_v51  ;;  %v1200_v20 = vsel %vm149_vm0, %v1180_v30, 0.0  ;;  %v1358_v35 = vld [vmem:[#allocation7 + $0x18] sm:$0xff]  ;;  %v1357_v39 = vld [vmem:[#allocation7 + $0x10] sm:$0xff] }
 0x582   :  { %1198 = vadd.xlane.f32.xlu1 %v1197_v41  ;;  %1195 = vadd.xlane.f32.xlu0 %v1194_v6  ;;  %v1189_v52 = vmul.f32 %v2731_v58, %v1175_v51  ;;  %v1203_v59 = vsel %vm149_vm0, %v1181_v49, 0.0  ;;  %v1190_v61 = vmul.f32 %v2733_v1, %v1175_v51  ;;  %v1206_v63 = vsel %vm149_vm0, %v1182_v5, 0.0  ;;  %v1362_v55 = vld [vmem:[#allocation7 + $0x38] sm:$0xff]  ;;  %v1355_v41 = vld [vmem:[#allocation7] sm:$0xff]  ;;  %v1365_v5 = vld [vmem:[#allocation7 + $0x50] sm:$0xff] }
 0x583   :  { %v1224_v46 = vsel %vm149_vm0, %v1188_v25, 0.0  ;;  %v1191_v18 = vmul.f32 %v2735_v11, %v1175_v51  ;;  %v1209_v24 = vsel %vm149_vm0, %v1183_v15, 0.0  ;;  %v1192_v12 = vmul.f32 %v2736_v9, %v1175_v51  ;;  %v1359_v6 = vld [vmem:[#allocation7 + $0x20] sm:$0xff]  ;;  %v1361_v25 = vld [vmem:[#allocation7 + $0x30] sm:$0xff]  ;;  %v1370_v58 = vld [vmem:[#allocation7 + $0x78] sm:$0xff] }
 0x584   :  { %v1227_v60 = vsel %vm149_vm0, %v1189_v52, 0.0  ;;  %v1230_v8 = vsel %vm149_vm0, %v1190_v61, 0.0  ;;  %v1186_v44 = vmul.f32 %v2737_v3, %v1175_v51  ;;  %v1193_v10 = vmul.f32 %v2738_v7, %v1175_v51  ;;  %v1363_v52 = vld [vmem:[#allocation7 + $0x40] sm:$0xff]  ;;  %v1369_v1 = vld [vmem:[#allocation7 + $0x70] sm:$0xff]  ;;  %v1374_v0 = vld [vmem:[#allocation7 + $0x98] sm:$0xff] }
 0x585   :  { %v1233_v29 = vsel %vm149_vm0, %v1191_v18, 0.0  ;;  %v1236_v4 = vsel %vm149_vm0, %v1192_v12, 0.0  ;;  %v1187_v31 = vmul.f32 %v2739_v23, %v1175_v51  ;;  %v1212_v40 = vsel %vm149_vm0, %v1184_v34, 0.0  ;;  %v1356_v51 = vld [vmem:[#allocation7 + $0x8] sm:$0xff]  ;;  %v1378_v11 = vld [vmem:[#allocation7 + $0xb8] sm:$0xff]  ;;  %v1371_v18 = vld [vmem:[#allocation7 + $0x80] sm:$0xff] }
 0x586   :  { %1201 = vadd.xlane.f32.xlu0 %v1200_v20  ;;  %1225 = vadd.xlane.f32.xlu1 %v1224_v46  ;;  %v1218_v13 = vsel %vm149_vm0, %v1186_v44, 0.0  ;;  %v1239_v47 = vsel %vm149_vm0, %v1193_v10, 0.0  ;;  %v1185_v28 = vmul.f32 %v2741_v50, %v1171_v36  ;;  %v2475_v38 = vpack.c.bf16 %v1360_v21, %v1356_v51  ;;  %v1364_v36 = vld [vmem:[#allocation7 + $0x48] sm:$0xff]  ;;  %v1373_v12 = vld [vmem:[#allocation7 + $0x90] sm:$0xff]  ;;  %v1382_v7 = vld [vmem:[#allocation7 + $0xd8] sm:$0xff] }
 0x587   :  { %v1221_v17 = vsel %vm149_vm0, %v1187_v31, 0.0  ;;  %v2491_v19 = vpack.c.bf16 %v1362_v55, %v1358_v35  ;;  %v2477_v30 = vpack.c.bf16 %v1359_v6, %v1355_v41  ;;  %v2493_v20 = vpack.c.bf16 %v1361_v25, %v1357_v39  ;;  %v1368_v46 = vld [vmem:[#allocation7 + $0x68] sm:$0xff]  ;;  %v1377_v3 = vld [vmem:[#allocation7 + $0xb0] sm:$0xff]  ;;  %v1386_v10 = vld [vmem:[#allocation7 + $0xf8] sm:$0xff] }
 0x588   :  { %v1215_v16 = vsel %vm149_vm0, %v1185_v28, 0.0  ;;  %2476 = vmatprep.subr.bf16.mxu0 %v2475_v38  ;;  %v2479_v49 = vpack.c.bf16 %v1368_v46, %v1364_v36  ;;  %v2497_v61 = vpack.c.bf16 %v1369_v1, %v1365_v5  ;;  %v1380_v44 = vld [vmem:[#allocation7 + $0xc8] sm:$0xff]  ;;  %v2503_v31 = vpack.c.bf16 %v1386_v10, %v1382_v7  ;;  %v1561_v28 = vld [vmem:[#allocation8 + $0x18] sm:$0xff] }
 0x589   :  { %2492 = vmatprep.subr.bf16.mxu1 %v2491_v19  ;;  %2478 = vmatpush1.bf16.msra.mxu0 %v2477_v30  ;;  %v1559_v50 = vld [vmem:[#allocation8 + $0x8] sm:$0xff] }
 0x58a   :  { %1204 = vadd.xlane.f32.xlu0 %v1203_v59  ;;  %1228 = vadd.xlane.f32.xlu1 %v1227_v60  ;;  %v1367_v59 = vld [vmem:[#allocation7 + $0x60] sm:$0xff]  ;;  %v2495_v60 = vpack.c.bf16 %v1370_v58, %v1366_v53  ;;  %v2507_v51 = vpack.c.bf16 %v1561_v28, %v1559_v50 }
 0x58b   :  { %2494 = vmatpush1.bf16.msra.mxu1 %v2493_v20  ;;  %v2481_v2 = vpack.c.bf16 %v1367_v59, %v1363_v52  ;;  %2480 = vmatprep.subr.bf16.mxu0 %v2479_v49 }
 0x58c   :  { %2496 = vmatprep.subr.bf16.mxu1 %v2495_v60 }
 0x58d   :  { %2482 = vmatpush1.bf16.msra.mxu0 %v2481_v2 }
 0x58e   :  { %1207 = vadd.xlane.f32.xlu0 %v1206_v63  ;;  %1231 = vadd.xlane.f32.xlu1 %v1230_v8  ;;  %v1372_v63 = vld [vmem:[#allocation7 + $0x88] sm:$0xff] }
 0x58f   :  { %v1376_v8 = vld [vmem:[#allocation7 + $0xa8] sm:$0xff]  ;;  %2498 = vmatpush1.bf16.msra.mxu1 %v2497_v61 }
 0x590   :  { %v2483_v15 = vpack.c.bf16 %v1376_v8, %v1372_v63 }
 0x592   :  { %1210 = vadd.xlane.f32.xlu0 %v1209_v24  ;;  %1234 = vadd.xlane.f32.xlu1 %v1233_v29  ;;  %v1375_v24 = vld [vmem:[#allocation7 + $0xa0] sm:$0xff]  ;;  %v2499_v29 = vpack.c.bf16 %v1378_v11, %v1374_v0 }
 0x593   :  { %v2485_v9 = vpack.c.bf16 %v1375_v24, %v1371_v18  ;;  %2484 = vmatprep.subr.bf16.mxu0 %v2483_v15 }
 0x594   :  { %2500 = vmatprep.subr.bf16.mxu1 %v2499_v29 }
 0x595   :  { %2486 = vmatpush1.bf16.msra.mxu0 %v2485_v9 }
 0x596   :  { %1237 = vadd.xlane.f32.xlu1 %v1236_v4  ;;  %1219 = vadd.xlane.f32.xlu0 %v1218_v13  ;;  %v2501_v4 = vpack.c.bf16 %v1377_v3, %v1373_v12  ;;  %v1384_v13 = vld [vmem:[#allocation7 + $0xe8] sm:$0xff] }
 0x597   :  { %v2487_v23 = vpack.c.bf16 %v1384_v13, %v1380_v44 }
 0x598   :  { %2502 = vmatpush1.bf16.msra.mxu1 %v2501_v4 }
 0x599   :  { %2488 = vmatprep.subr.bf16.mxu0 %v2487_v23  ;;  %2504 = vmatprep.subr.bf16.mxu1 %v2503_v31 }
 0x59a   :  { %1240 = vadd.xlane.f32.xlu1 %v1239_v47  ;;  %1222 = vadd.xlane.f32.xlu0 %v1221_v17  ;;  %v1379_v47 = vld [vmem:[#allocation7 + $0xc0] sm:$0xff] }
 0x59b   :  { %v1383_v17 = vld [vmem:[#allocation7 + $0xe0] sm:$0xff] }
 0x59c   :  { %v2489_v34 = vpack.c.bf16 %v1383_v17, %v1379_v47 }
 0x59e   :  { %1213 = vadd.xlane.f32.xlu0 %v1212_v40  ;;  %v1385_v40 = vld [vmem:[#allocation7 + $0xf0] sm:$0xff]  ;;  %2490 = vmatpush1.bf16.msra.mxu0 %v2489_v34 }
 0x59f   :  { %2508 = vmatprep.subr.bf16.mxu0 %v2507_v51 }
 0x5a2   :  { %1216 = vadd.xlane.f32.xlu0 %v1215_v16  ;;  %v2505_v16 = vpack.c.bf16 %v1385_v40, %v1381_v48 }
 0x5a4   :  { %2506 = vmatpush1.bf16.msra.mxu1 %v2505_v16 }
 0x60f   :  { %v1199_v21 = vpop.xlane.xlu1 %1198  ;;  %v1196_v35 = vpop.xlane.xlu0 %1195 }
 0x610   :  { %v1243_v36 = vmul.f32 0.015625, %v1199_v21  ;;  %v1242_v46 = vmul.f32 0.015625, %v1196_v35 }
 0x612   :  { %v1281_v1 = vrot.slane %v1243_v36, %v3304_v32  ;;  %v1277_v61 = vrot.slane %v1242_v46, %v3301_v27 }
 0x613   :  { %v1202_v38 = vpop.xlane.xlu0 %1201  ;;  %v1226_v55 = vpop.xlane.xlu1 %1225 }
 0x614   :  { %v1244_v58 = vmul.f32 0.015625, %v1202_v38  ;;  %v1252_v52 = vmul.f32 0.015625, %v1226_v55  ;;  %v1282_v10 = vsel %vm305_vm2, %v1281_v1, %v1277_v61  ;;  %v1558_v55 = vld [vmem:[#allocation8] sm:$0xff]  ;;  %v1573_v1 = vld [vmem:[#allocation8 + $0x78] sm:$0xff] }
 0x616   :  { %v1286_v24 = vrot.slane %v1244_v58, %v3307_v33  ;;  %v1325_v29 = vrot.slane %v1252_v52, %v3307_v33  ;;  %v1567_v58 = vld [vmem:[#allocation8 + $0x48] sm:$0xff] }
 0x617   :  { %v1205_v41 = vpop.xlane.xlu0 %1204  ;;  %v1229_v6 = vpop.xlane.xlu1 %1228 }
 0x618   :  { %v1245_v60 = vmul.f32 0.015625, %v1205_v41  ;;  %v1253_v2 = vmul.f32 0.015625, %v1229_v6  ;;  %v1560_v41 = vld [vmem:[#allocation8 + $0x10] sm:$0xff]  ;;  %v1563_v6 = vld [vmem:[#allocation8 + $0x28] sm:$0xff] }
 0x61a   :  { %v1291_v44 = vrot.slane %v1245_v60, %v3310_v37  ;;  %v1330_v4 = vrot.slane %v1253_v2, %v3310_v37  ;;  %v1287_v37 = vsel %vm312_vm3, %v1286_v24, %v1282_v10  ;;  %v1566_v60 = vld [vmem:[#allocation8 + $0x40] sm:$0xff]  ;;  %v1568_v2 = vld [vmem:[#allocation8 + $0x50] sm:$0xff]  ;;  %v1585_v10 = vld [vmem:[#allocation8 + $0xd8] sm:$0xff] }
 0x61b   :  { %v1208_v19 = vpop.xlane.xlu0 %1207  ;;  %v1232_v30 = vpop.xlane.xlu1 %1231  ;;  %v2517_v61 = vpack.c.bf16 %v1568_v2, %v1566_v60  ;;  %v1574_v24 = vld [vmem:[#allocation8 + $0x80] sm:$0xff] }
 0x61c   :  { %v1246_v63 = vmul.f32 0.015625, %v1208_v19  ;;  %v1254_v8 = vmul.f32 0.015625, %v1232_v30  ;;  %v1565_v19 = vld [vmem:[#allocation8 + $0x38] sm:$0xff]  ;;  %v1606_v2 = vld [vmem:[#allocation8 + $0x180] sm:$0xff] }
 0x61d   :  { %v2511_v46 = vpack.c.bf16 %v1565_v19, %v1563_v6  ;;  %v1601_v6 = vld [vmem:[#allocation8 + $0x158] sm:$0xff] }
 0x61f   :  { %v1211_v39 = vpop.xlane.xlu0 %1210  ;;  %v1235_v25 = vpop.xlane.xlu1 %1234 }
 0x620   :  { %v1247_v0 = vmul.f32 0.015625, %v1211_v39  ;;  %v1255_v15 = vmul.f32 0.015625, %v1235_v25 }
 0x622   :  { %v1301_v33 = vrot.slane %v1247_v0, %v3316_v54  ;;  %v1340_v31 = vrot.slane %v1255_v15, %v3316_v54  ;;  %v1575_v0 = vld [vmem:[#allocation8 + $0x88] sm:$0xff]  ;;  %v1577_v15 = vld [vmem:[#allocation8 + $0x98] sm:$0xff] }
 0x623   :  { %v1220_v20 = vpop.xlane.xlu0 %1219  ;;  %v1238_v53 = vpop.xlane.xlu1 %1237 }
 0x624   :  { %v1250_v49 = vmul.f32 0.015625, %v1220_v20  ;;  %v1256_v9 = vmul.f32 0.015625, %v1238_v53  ;;  %v2509_v20 = vpack.c.bf16 %v1560_v41, %v1558_v55  ;;  %v1562_v53 = vld [vmem:[#allocation8 + $0x20] sm:$0xff]  ;;  %v1596_v41 = vld [vmem:[#allocation8 + $0x130] sm:$0xff] }
 0x625   :  { %v1594_v55 = vld [vmem:[#allocation8 + $0x120] sm:$0xff] }
 0x626   :  { %v1316_v11 = vrot.slane %v1250_v49, %v3301_v27  ;;  %v1296_v27 = vrot.slane %v1246_v63, %v3313_v43  ;;  %v1345_v48 = vrot.slane %v1256_v9, %v3319_v57  ;;  %v1564_v49 = vld [vmem:[#allocation8 + $0x30] sm:$0xff]  ;;  %v1570_v63 = vld [vmem:[#allocation8 + $0x60] sm:$0xff]  ;;  %v1579_v9 = vld [vmem:[#allocation8 + $0xa8] sm:$0xff]  ;;  %v2545_v19 = vpack.c.bf16 %v1596_v41, %v1594_v55 }
 0x627   :  { %v1223_v59 = vpop.xlane.xlu0 %1222  ;;  %v1241_v12 = vpop.xlane.xlu1 %1240  ;;  %v2513_v52 = vpack.c.bf16 %v1564_v49, %v1562_v53  ;;  %v1602_v49 = vld [vmem:[#allocation8 + $0x160] sm:$0xff]  ;;  %v1864_v55 = vld [vmem:[#allocation10 + $0xb0] sm:$0xff]  ;;  %v1865_v41 = vld [vmem:[#allocation10 + $0xb8] sm:$0xff] }
 0x628   :  { %v1251_v5 = vmul.f32 0.015625, %v1223_v59  ;;  %v1257_v47 = vmul.f32 0.015625, %v1241_v12  ;;  %v1581_v12 = vld [vmem:[#allocation8 + $0xb8] sm:$0xff] }
 0x62a   :  { %v1320_v18 = vrot.slane %v1251_v5, %v3304_v32  ;;  %v1335_v32 = vrot.slane %v1254_v8, %v3313_v43  ;;  %v1292_v43 = vsel %vm319_vm4, %v1291_v44, %v1287_v37  ;;  %v1350_v35 = vrot.slane %v1257_v47, %v3332_v26  ;;  %v1571_v5 = vld [vmem:[#allocation8 + $0x68] sm:$0xff]  ;;  %v1572_v8 = vld [vmem:[#allocation8 + $0x70] sm:$0xff]  ;;  %v1589_v47 = vld [vmem:[#allocation8 + $0xf8] sm:$0xff] }
 0x62b   :  { %v1214_v3 = vpop.xlane.xlu0 %1213  ;;  %v1297_v51 = vsel %vm326_vm5, %v1296_v27, %v1292_v43  ;;  %v2527_v44 = vpack.c.bf16 %v1581_v12, %v1579_v9  ;;  %v1616_v9 = vld [vmem:[#allocation8 + $0x1d0] sm:$0xff] }
 0x62c   :  { %v1321_v13 = vsel %vm305_vm2, %v1320_v18, %v1316_v11  ;;  %v1248_v7 = vmul.f32 0.015625, %v1214_v3  ;;  %v1302_v21 = vsel %vm333_vm6, %v1301_v33, %v1297_v51  ;;  %v2521_v11 = vpack.c.bf16 %v1572_v8, %v1570_v63  ;;  %v1584_v33 = vld [vmem:[#allocation8 + $0xd0] sm:$0xff]  ;;  %v1610_v8 = vld [vmem:[#allocation8 + $0x1a0] sm:$0xff] }
 0x62d   :  { %v1326_v23 = vsel %vm312_vm3, %v1325_v29, %v1321_v13  ;;  %v2523_v18 = vpack.c.bf16 %v1577_v15, %v1575_v0  ;;  %v1576_v29 = vld [vmem:[#allocation8 + $0x90] sm:$0xff]  ;;  %v1615_v15 = vld [vmem:[#allocation8 + $0x1c8] sm:$0xff] }
 0x62e   :  { %v1331_v17 = vsel %vm319_vm4, %v1330_v4, %v1326_v23  ;;  %v1306_v40 = vrot.slane %v1248_v7, %v3319_v57  ;;  %v2525_v3 = vpack.c.bf16 %v1576_v29, %v1574_v24  ;;  %v1578_v4 = vld [vmem:[#allocation8 + $0xa0] sm:$0xff]  ;;  %v1580_v13 = vld [vmem:[#allocation8 + $0xb0] sm:$0xff]  ;;  %v1583_v7 = vld [vmem:[#allocation8 + $0xc8] sm:$0xff] }
 0x62f   :  { %v1336_v34 = vsel %vm326_vm5, %v1335_v32, %v1331_v17  ;;  %v1217_v50 = vpop.xlane.xlu0 %1216  ;;  %v2529_v27 = vpack.c.bf16 %v1580_v13, %v1578_v4  ;;  %v2531_v32 = vpack.c.bf16 %v1585_v10, %v1583_v7  ;;  %v1582_v23 = vld [vmem:[#allocation8 + $0xc0] sm:$0xff]  ;;  %v1592_v51 = vld [vmem:[#allocation8 + $0x110] sm:$0xff] }
 0x630   :  { %v1341_v28 = vsel %vm333_vm6, %v1340_v31, %v1336_v34  ;;  %v1249_v16 = vmul.f32 0.015625, %v1217_v50  ;;  %v1307_v57 = vsel %vm340_vm7, %v1306_v40, %v1302_v21  ;;  %v1587_v31 = vld [vmem:[#allocation8 + $0xe8] sm:$0xff]  ;;  %v2533_v17 = vpack.c.bf16 %v1584_v33, %v1582_v23  ;;  %v1588_v34 = vld [vmem:[#allocation8 + $0xf0] sm:$0xff]  ;;  %v1593_v50 = vld [vmem:[#allocation8 + $0x118] sm:$0xff] }
 0x631   :  { %v1346_v54 = vsel %vm340_vm7, %v1345_v48, %v1341_v28  ;;  %v2535_v37 = vpack.c.bf16 %v1589_v47, %v1587_v31  ;;  %v1586_v48 = vld [vmem:[#allocation8 + $0xe0] sm:$0xff]  ;;  %v1591_v40 = vld [vmem:[#allocation8 + $0x108] sm:$0xff]  ;;  %v1597_v21 = vld [vmem:[#allocation8 + $0x138] sm:$0xff] }
 0x632   :  { %v1311_v38 = vrot.slane %v1249_v16, %v3332_v26  ;;  %v1351_v30 = vsel %vm347_vm8, %v1350_v35, %v1346_v54  ;;  %v1569_v26 = vld [vmem:[#allocation8 + $0x58] sm:$0xff]  ;;  %v2537_v43 = vpack.c.bf16 %v1588_v34, %v1586_v48  ;;  %v2539_v28 = vpack.c.bf16 %v1593_v50, %v1591_v40  ;;  %v1590_v16 = vld [vmem:[#allocation8 + $0x100] sm:$0xff]  ;;  %v1595_v54 = vld [vmem:[#allocation8 + $0x128] sm:$0xff] }
 0x633   :  { %v2515_v59 = vpack.c.bf16 %v1569_v26, %v1567_v58  ;;  %v2541_v35 = vpack.c.bf16 %v1592_v51, %v1590_v16  ;;  %v1604_v58 = vld [vmem:[#allocation8 + $0x170] sm:$0xff]  ;;  %v1607_v26 = vld [vmem:[#allocation8 + $0x188] sm:$0xff]  ;;  %v1614_v29 = vld [vmem:[#allocation8 + $0x1c0] sm:$0xff] }
 0x634   :  { %v1312_v39 = vsel %vm347_vm8, %v1311_v38, %v1307_v57  ;;  %v2543_v38 = vpack.c.bf16 %v1597_v21, %v1595_v54  ;;  %v1599_v57 = vld [vmem:[#allocation8 + $0x148] sm:$0xff]  ;;  %v1612_v0 = vld [vmem:[#allocation8 + $0x1b0] sm:$0xff]  ;;  %v2565_v12 = vpack.c.bf16 %v1616_v9, %v1614_v29  ;;  %v1618_v4 = vld [vmem:[#allocation8 + $0x1e0] sm:$0xff] }
 0x635   :  { %v1352_v25 = vsel %vm388_vm9, %v1351_v30, %v1312_v39  ;;  %v2547_v30 = vpack.c.bf16 %v1601_v6, %v1599_v57  ;;  %v1598_v39 = vld [vmem:[#allocation8 + $0x140] sm:$0xff]  ;;  %v1620_v7 = vld [vmem:[#allocation8 + $0x1f0] sm:$0xff]  ;;  %v1859_v31 = vld [vmem:[#allocation10 + $0x88] sm:$0xff]  ;;  %v2647_v6 = vpack.c.bf16 %v1865_v41, %v1864_v55 }
 0x636   :  { %v1354_v36 = vmul.f32 %v3507_v42, %v1352_v25  ;;  %v2519_v42 = vpack.c.bf16 %v1573_v1, %v1571_v5  ;;  %v1600_v25 = vld [vmem:[#allocation8 + $0x150] sm:$0xff]  ;;  %v1611_v1 = vld [vmem:[#allocation8 + $0x1a8] sm:$0xff]  ;;  %v2569_v10 = vpack.c.bf16 %v1620_v7, %v1618_v4  ;;  %v1858_v33 = vld [vmem:[#allocation10 + $0x80] sm:$0xff] }
 0x637   :  { %v1608_v5 = vld [vmem:[#allocation8 + $0x190] sm:$0xff]  ;;  %v1842_v47 = vld [vmem:[#allocation10] sm:$0xff]  ;;  %v1861_v34 = vld [vmem:[#allocation10 + $0x98] sm:$0xff] }
 0x638   :  { %2072 = vmatmul.mubr.msk.f32.vlgmr.msra.gmra.mrb[2].mxu0 %vm149_vm0, %v1354_v36  ;;  %2073 = vmatmul.mubr.msk.f32.vlgmr.msra.gmra.mrb[6].mxu1 %vm149_vm0, %v1354_v36  ;;  %v1605_v36 = vld [vmem:[#allocation8 + $0x178] sm:$0xff]  ;;  %v1860_v48 = vld [vmem:[#allocation10 + $0x90] sm:$0xff]  ;;  %v1862_v16 = vld [vmem:[#allocation10 + $0xa0] sm:$0xff] }
 0x639   :  { %2510 = vmatpush1.bf16.msra.mxu0 %v2509_v20  ;;  %v1603_v20 = vld [vmem:[#allocation8 + $0x168] sm:$0xff]  ;;  %v2639_v50 = vpack.c.bf16 %v1861_v34, %v1860_v48  ;;  %v1629_v7 = vld [vmem:[#allocation8 + $0x238] sm:$0xff] }
 0x63a   :  { %2512 = vmatprep.subr.bf16.mxu0 %v2511_v46  ;;  %v2549_v46 = vpack.c.bf16 %v1600_v25, %v1598_v39  ;;  %v2551_v53 = vpack.c.bf16 %v1605_v36, %v1603_v20  ;;  %v1863_v51 = vld [vmem:[#allocation10 + $0xa8] sm:$0xff]  ;;  %v1866_v39 = vld [vmem:[#allocation10 + $0xc0] sm:$0xff] }
 0x63b   :  { %v2643_v21 = vpack.c.bf16 %v1863_v51, %v1862_v16  ;;  %v1867_v25 = vld [vmem:[#allocation10 + $0xc8] sm:$0xff] }
 0x63c   :  { %v2651_v36 = vpack.c.bf16 %v1867_v25, %v1866_v39 }
 0x63d   :  { %2514 = vmatpush1.bf16.msra.mxu0 %v2513_v52  ;;  %v1609_v52 = vld [vmem:[#allocation8 + $0x198] sm:$0xff] }
 0x63e   :  { %2516 = vmatprep.subr.bf16.mxu0 %v2515_v59  ;;  %v2553_v59 = vpack.c.bf16 %v1604_v58, %v1602_v49  ;;  %v2555_v60 = vpack.c.bf16 %v1609_v52, %v1607_v26  ;;  %v1868_v49 = vld [vmem:[#allocation10 + $0xd0] sm:$0xff]  ;;  %v1869_v58 = vld [vmem:[#allocation10 + $0xd8] sm:$0xff] }
 0x63f   :  { %v2655_v52 = vpack.c.bf16 %v1869_v58, %v1868_v49 }
 0x641   :  { %2518 = vmatpush1.bf16.msra.mxu0 %v2517_v61  ;;  %v1613_v61 = vld [vmem:[#allocation8 + $0x1b8] sm:$0xff] }
 0x642   :  { %2520 = vmatprep.subr.bf16.mxu0 %v2519_v42  ;;  %v2557_v42 = vpack.c.bf16 %v1608_v5, %v1606_v2  ;;  %v2559_v63 = vpack.c.bf16 %v1613_v61, %v1611_v1  ;;  %v1870_v2 = vld [vmem:[#allocation10 + $0xe0] sm:$0xff]  ;;  %v1871_v5 = vld [vmem:[#allocation10 + $0xe8] sm:$0xff] }
 0x643   :  { %v2659_v61 = vpack.c.bf16 %v1871_v5, %v1870_v2 }
 0x645   :  { %2522 = vmatpush1.bf16.msra.mxu0 %v2521_v11  ;;  %v1617_v11 = vld [vmem:[#allocation8 + $0x1d8] sm:$0xff] }
 0x646   :  { %2524 = vmatprep.subr.bf16.mxu0 %v2523_v18  ;;  %v2561_v18 = vpack.c.bf16 %v1612_v0, %v1610_v8  ;;  %v2563_v24 = vpack.c.bf16 %v1617_v11, %v1615_v15 }
 0x649   :  { %2526 = vmatpush1.bf16.msra.mxu0 %v2525_v3  ;;  %v1619_v3 = vld [vmem:[#allocation8 + $0x1e8] sm:$0xff] }
 0x64a   :  { %2528 = vmatprep.subr.bf16.mxu0 %v2527_v44  ;;  %v1621_v44 = vld [vmem:[#allocation8 + $0x1f8] sm:$0xff] }
 0x64b   :  { %v2567_v13 = vpack.c.bf16 %v1621_v44, %v1619_v3  ;;  %v1624_v3 = vld [vmem:[#allocation8 + $0x210] sm:$0xff] }
 0x64d   :  { %2530 = vmatpush1.bf16.msra.mxu0 %v2529_v27  ;;  %v1623_v27 = vld [vmem:[#allocation8 + $0x208] sm:$0xff] }
 0x64e   :  { %2532 = vmatprep.subr.bf16.mxu0 %v2531_v32  ;;  %v1625_v32 = vld [vmem:[#allocation8 + $0x218] sm:$0xff] }
 0x64f   :  { %v2571_v23 = vpack.c.bf16 %v1625_v32, %v1623_v27 }
 0x651   :  { %2534 = vmatpush1.bf16.msra.mxu0 %v2533_v17  ;;  %v2635_v17 = vpack.c.bf16 %v1859_v31, %v1858_v33  ;;  %v1626_v33 = vld [vmem:[#allocation8 + $0x220] sm:$0xff]  ;;  %v1628_v31 = vld [vmem:[#allocation8 + $0x230] sm:$0xff] }
 0x652   :  { %2536 = vmatprep.subr.bf16.mxu0 %v2535_v37  ;;  %v1843_v37 = vld [vmem:[#allocation10 + $0x8] sm:$0xff]  ;;  %v2577_v48 = vpack.c.bf16 %v1628_v31, %v1626_v33  ;;  %v1669_v31 = vld [vmem:[#allocation8 + $0x378] sm:$0xff] }
 0x653   :  { %v2637_v40 = vpack.c.bf16 %v1843_v37, %v1842_v47  ;;  %2636 = vmatprep.subr.bf16.mxu1 %v2635_v17  ;;  %v1631_v17 = vld [vmem:[#allocation8 + $0x248] sm:$0xff]  ;;  %v1633_v37 = vld [vmem:[#allocation8 + $0x258] sm:$0xff] }
 0x654   :  { %v2579_v34 = vpack.c.bf16 %v1633_v37, %v1631_v17  ;;  %v1667_v33 = vld [vmem:[#allocation8 + $0x368] sm:$0xff]  ;;  %v1666_v37 = vld [vmem:[#allocation8 + $0x360] sm:$0xff] }
 0x655   :  { %2538 = vmatpush1.bf16.msra.mxu0 %v2537_v43  ;;  %v1844_v43 = vld [vmem:[#allocation10 + $0x10] sm:$0xff]  ;;  %2638 = vmatpush3.bf16.msra.mxu1 %v2637_v40  ;;  %v1630_v40 = vld [vmem:[#allocation8 + $0x240] sm:$0xff]  ;;  %v2615_v17 = vpack.c.bf16 %v1669_v31, %v1667_v33  ;;  %v1959_v31 = vld [vmem:[#allocation11 + $0x38] sm:$0xff] }
 0x656   :  { %2540 = vmatprep.subr.bf16.mxu0 %v2539_v28  ;;  %v1845_v28 = vld [vmem:[#allocation10 + $0x18] sm:$0xff]  ;;  %2640 = vmatprep.subr.bf16.mxu1 %v2639_v50  ;;  %v1632_v50 = vld [vmem:[#allocation8 + $0x250] sm:$0xff] }
 0x657   :  { %v2641_v54 = vpack.c.bf16 %v1845_v28, %v1844_v43  ;;  %v1635_v43 = vld [vmem:[#allocation8 + $0x268] sm:$0xff]  ;;  %v1637_v28 = vld [vmem:[#allocation8 + $0x278] sm:$0xff]  ;;  %v2581_v16 = vpack.c.bf16 %v1632_v50, %v1630_v40  ;;  %v1958_v33 = vld [vmem:[#allocation11 + $0x30] sm:$0xff] }
 0x658   :  { %v2583_v51 = vpack.c.bf16 %v1637_v28, %v1635_v43  ;;  %v1673_v40 = vld [vmem:[#allocation8 + $0x398] sm:$0xff]  ;;  %v1670_v28 = vld [vmem:[#allocation8 + $0x380] sm:$0xff] }
 0x659   :  { %2542 = vmatpush1.bf16.msra.mxu0 %v2541_v35  ;;  %v1846_v35 = vld [vmem:[#allocation10 + $0x20] sm:$0xff]  ;;  %2642 = vmatpush3.bf16.msra.mxu1 %v2641_v54 }
 0x65a   :  { %2544 = vmatprep.subr.bf16.mxu0 %v2543_v38  ;;  %v1847_v38 = vld [vmem:[#allocation10 + $0x28] sm:$0xff]  ;;  %2644 = vmatprep.subr.bf16.mxu1 %v2643_v21  ;;  %v1634_v54 = vld [vmem:[#allocation8 + $0x260] sm:$0xff]  ;;  %v1636_v21 = vld [vmem:[#allocation8 + $0x270] sm:$0xff] }
 0x65b   :  { %v2645_v57 = vpack.c.bf16 %v1847_v38, %v1846_v35  ;;  %v1639_v35 = vld [vmem:[#allocation8 + $0x288] sm:$0xff]  ;;  %v1641_v38 = vld [vmem:[#allocation8 + $0x298] sm:$0xff]  ;;  %v2585_v55 = vpack.c.bf16 %v1636_v21, %v1634_v54 }
 0x65c   :  { %v2587_v41 = vpack.c.bf16 %v1641_v38, %v1639_v35  ;;  %v1677_v54 = vld [vmem:[#allocation8 + $0x3b8] sm:$0xff]  ;;  %v1674_v38 = vld [vmem:[#allocation8 + $0x3a0] sm:$0xff] }
 0x65d   :  { %2546 = vmatpush1.bf16.msra.mxu0 %v2545_v19  ;;  %v1848_v19 = vld [vmem:[#allocation10 + $0x30] sm:$0xff]  ;;  %2646 = vmatpush3.bf16.msra.mxu1 %v2645_v57  ;;  %v1638_v57 = vld [vmem:[#allocation8 + $0x280] sm:$0xff] }
 0x65e   :  { %2548 = vmatprep.subr.bf16.mxu0 %v2547_v30  ;;  %v1849_v30 = vld [vmem:[#allocation10 + $0x38] sm:$0xff]  ;;  %2648 = vmatprep.subr.bf16.mxu1 %v2647_v6  ;;  %v1640_v6 = vld [vmem:[#allocation8 + $0x290] sm:$0xff] }
 0x65f   :  { %v2649_v20 = vpack.c.bf16 %v1849_v30, %v1848_v19  ;;  %v1643_v19 = vld [vmem:[#allocation8 + $0x2a8] sm:$0xff]  ;;  %v1645_v30 = vld [vmem:[#allocation8 + $0x2b8] sm:$0xff]  ;;  %v2589_v39 = vpack.c.bf16 %v1640_v6, %v1638_v57 }
 0x660   :  { %v2591_v25 = vpack.c.bf16 %v1645_v30, %v1643_v19  ;;  %v1681_v57 = vld [vmem:[#allocation8 + $0x3d8] sm:$0xff]  ;;  %v1399_v19 = vsub.s32 2, %v3298_v14 }
 0x661   :  { %2550 = vmatpush1.bf16.msra.mxu0 %v2549_v46  ;;  %v1850_v46 = vld [vmem:[#allocation10 + $0x40] sm:$0xff]  ;;  %2650 = vmatpush3.bf16.msra.mxu1 %v2649_v20 }
 0x662   :  { %2552 = vmatprep.subr.bf16.mxu0 %v2551_v53  ;;  %v1851_v53 = vld [vmem:[#allocation10 + $0x48] sm:$0xff]  ;;  %2652 = vmatprep.subr.bf16.mxu1 %v2651_v36  ;;  %v1642_v20 = vld [vmem:[#allocation8 + $0x2a0] sm:$0xff]  ;;  %v1644_v36 = vld [vmem:[#allocation8 + $0x2b0] sm:$0xff] }
 0x663   :  { %v2653_v26 = vpack.c.bf16 %v1851_v53, %v1850_v46  ;;  %v1647_v46 = vld [vmem:[#allocation8 + $0x2c8] sm:$0xff]  ;;  %v1649_v53 = vld [vmem:[#allocation8 + $0x2d8] sm:$0xff]  ;;  %v2593_v49 = vpack.c.bf16 %v1644_v36, %v1642_v20 }
 0x664   :  { %v2595_v58 = vpack.c.bf16 %v1649_v53, %v1647_v46  ;;  %v1683_v20 = vld [vmem:[#allocation8 + $0x3e8] sm:$0xff]  ;;  %v1685_v36 = vld [vmem:[#allocation8 + $0x3f8] sm:$0xff] }
 0x665   :  { %2554 = vmatpush1.bf16.msra.mxu0 %v2553_v59  ;;  %v1852_v59 = vld [vmem:[#allocation10 + $0x50] sm:$0xff]  ;;  %2654 = vmatpush3.bf16.msra.mxu1 %v2653_v26  ;;  %v1646_v26 = vld [vmem:[#allocation8 + $0x2c0] sm:$0xff] }
 0x666   :  { %2556 = vmatprep.subr.bf16.mxu0 %v2555_v60  ;;  %v1853_v60 = vld [vmem:[#allocation10 + $0x58] sm:$0xff]  ;;  %2656 = vmatprep.subr.bf16.mxu1 %v2655_v52  ;;  %v1648_v52 = vld [vmem:[#allocation8 + $0x2d0] sm:$0xff] }
 0x667   :  { %v2657_v1 = vpack.c.bf16 %v1853_v60, %v1852_v59  ;;  %v1651_v59 = vld [vmem:[#allocation8 + $0x2e8] sm:$0xff]  ;;  %v1653_v60 = vld [vmem:[#allocation8 + $0x2f8] sm:$0xff]  ;;  %v2597_v2 = vpack.c.bf16 %v1648_v52, %v1646_v26  ;;  %v1684_v26 = vld [vmem:[#allocation8 + $0x3f0] sm:$0xff] }
 0x668   :  { %v2599_v5 = vpack.c.bf16 %v1653_v60, %v1651_v59  ;;  %v1854_v60 = vld [vmem:[#allocation10 + $0x60] sm:$0xff] }
 0x669   :  { %2558 = vmatpush1.bf16.msra.mxu0 %v2557_v42  ;;  %2658 = vmatpush3.bf16.msra.mxu1 %v2657_v1  ;;  %v3682_v42 = vld [vmem:[%s3736_s8] sm:$0xf] }
 0x66a   :  { %2560 = vmatprep.subr.bf16.mxu0 %v2559_v63  ;;  %2660 = vmatprep.subr.bf16.mxu1 %v2659_v61  ;;  %v1403_v63 = vsub.s32 3, %v3298_v14  ;;  %v1392_v8 = vrot.slane %v3682_v42, %v3505_v56  ;;  %v1396_v0 = vrot.slane %v3682_v42, %v3512_v62  ;;  %v1650_v1 = vld [vmem:[#allocation8 + $0x2e0] sm:$0xff]  ;;  %v1652_v61 = vld [vmem:[#allocation8 + $0x2f0] sm:$0xff]  ;;  %v1400_v53 = vrot.slane %v3682_v42, %v1399_v19 }
 0x66c   :  { %v1404_v15 = vrot.slane %v3682_v42, %v1403_v63  ;;  %v1655_v63 = vld [vmem:[#allocation8 + $0x308] sm:$0xff]  ;;  %v1857_v42 = vld [vmem:[#allocation10 + $0x78] sm:$0xff] }
 0x66d   :  { %2562 = vmatpush1.bf16.msra.mxu0 %v2561_v18 }
 0x66e   :  { %2564 = vmatprep.subr.bf16.mxu0 %v2563_v24 }
 0x671   :  { %2566 = vmatpush1.bf16.msra.mxu0 %v2565_v12  ;;  %v1622_v12 = vld [vmem:[#allocation8 + $0x200] sm:$0xff] }
 0x672   :  { %2568 = vmatprep.subr.bf16.mxu0 %v2567_v13  ;;  %v1627_v13 = vld [vmem:[#allocation8 + $0x228] sm:$0xff]  ;;  %v2573_v27 = vpack.c.bf16 %v1624_v3, %v1622_v12 }
 0x675   :  { %2570 = vmatpush1.bf16.msra.mxu0 %v2569_v10 }
 0x676   :  { %2572 = vmatprep.subr.bf16.mxu0 %v2571_v23  ;;  %v2575_v23 = vpack.c.bf16 %v1629_v7, %v1627_v13  ;;  %v1663_v13 = vld [vmem:[#allocation8 + $0x348] sm:$0xff]  ;;  %v1665_v7 = vld [vmem:[#allocation8 + $0x358] sm:$0xff] }
 0x70b   :  { %v1478_v11 = vpop.f32.mrb[2].mxu0  ;;  %v3690_v18 = vpop.f32.mrb[6].mxu1 }
 0x70c   :  { %v1479_v24 = vadd.f32 %v1478_v11, %v1392_v8  ;;  %v1480_v29 = vpop.f32.mrb[3].mxu0  ;;  %v1551_v9 = vpop.f32.mrb[7].mxu1  ;;  %v1657_v8 = vld [vmem:[#allocation8 + $0x318] sm:$0xff]  ;;  %v1654_v11 = vld [vmem:[#allocation8 + $0x300] sm:$0xff]  ;;  %v1550_v59 = vadd.f32 %v3690_v18, %v1400_v53 }
 0x70d   :  { %v1481_v44 = vadd.f32 %v1480_v29, %v1396_v0  ;;  %v1552_v4 = vadd.f32 %v1551_v9, %v1404_v15  ;;  %v2601_v0 = vpack.c.bf16 %v1652_v61, %v1650_v1  ;;  %v2603_v15 = vpack.c.bf16 %v1657_v8, %v1655_v63  ;;  %v1659_v29 = vld [vmem:[#allocation8 + $0x328] sm:$0xff]  ;;  %v1661_v9 = vld [vmem:[#allocation8 + $0x338] sm:$0xff]  ;;  %v1872_v1 = vld [vmem:[#allocation10 + $0xf0] sm:$0xff] }
 0x70e   :  { %v1554_v32 = vmax.f32 %v1479_v24, 0.0  ;;  %v1656_v24 = vld [vmem:[#allocation8 + $0x310] sm:$0xff]  ;;  %v2607_v3 = vpack.c.bf16 %v1661_v9, %v1659_v29  ;;  %v1556_v14 = vmax.f32 %v1550_v59, 0.0  ;;  %v1873_v61 = vld [vmem:[#allocation10 + $0xf8] sm:$0xff]  ;;  %v1686_v18 = vld [vmem:[%s3738_s10] sm:$0x3] }
 0x70f   :  { %v1555_v10 = vmax.f32 %v1481_v44, 0.0  ;;  %v1557_v47 = vmax.f32 %v1552_v4, 0.0  ;;  %v2605_v12 = vpack.c.bf16 %v1656_v24, %v1654_v11  ;;  %v1658_v44 = vld [vmem:[#allocation8 + $0x320] sm:$0xff]  ;;  %v1660_v4 = vld [vmem:[#allocation8 + $0x330] sm:$0xff]  ;;  %v2663_v8 = vpack.c.bf16 %v1873_v61, %v1872_v1 }
 0x710   :  { %v1856_v63 = vld [vmem:[#allocation10 + $0x70] sm:$0xff]  ;;  %v1695_v11 = vrot.slane %v1686_v18, %v3512_v62  ;;  %v1957_v62 = vld [vmem:[#allocation11 + $0x28] sm:$0xff] }
 0x711   :  { %1762 = vmatprep.mubr.f32.mxu0 %v1555_v10  ;;  %v2609_v10 = vpack.c.bf16 %v1660_v4, %v1658_v44 }
 0x712   :  { %1763 = vmatmul.mubr.f32.vlgmr.msra.gmra.mrb[4].mxu0 %v1554_v32  ;;  %v1662_v32 = vld [vmem:[#allocation8 + $0x340] sm:$0xff] }
 0x713   :  { %2574 = vmatpush1.bf16.msra.mxu0 %v2573_v27  ;;  %1833 = vmatprep.mubr.f32.mxu0 %v1557_v47  ;;  %v2611_v27 = vpack.c.bf16 %v1665_v7, %v1663_v13 }
 0x714   :  { %2576 = vmatprep.subr.bf16.mxu0 %v2575_v23  ;;  %v1664_v23 = vld [vmem:[#allocation8 + $0x350] sm:$0xff] }
 0x715   :  { %v2613_v47 = vpack.c.bf16 %v1664_v23, %v1662_v32 }
 0x717   :  { %2578 = vmatpush1.bf16.msra.mxu0 %v2577_v48  ;;  %v1668_v48 = vld [vmem:[#allocation8 + $0x370] sm:$0xff] }
 0x718   :  { %2580 = vmatprep.subr.bf16.mxu0 %v2579_v34  ;;  %v1671_v34 = vld [vmem:[#allocation8 + $0x388] sm:$0xff]  ;;  %v2617_v50 = vpack.c.bf16 %v1668_v48, %v1666_v37 }
 0x719   :  { %v2619_v43 = vpack.c.bf16 %v1673_v40, %v1671_v34  ;;  %v1961_v37 = vld [vmem:[#allocation11 + $0x48] sm:$0xff]  ;;  %v1963_v34 = vld [vmem:[#allocation11 + $0x58] sm:$0xff] }
 0x71b   :  { %2582 = vmatpush1.bf16.msra.mxu0 %v2581_v16  ;;  %v1672_v16 = vld [vmem:[#allocation8 + $0x390] sm:$0xff] }
 0x71c   :  { %2584 = vmatprep.subr.bf16.mxu0 %v2583_v51  ;;  %v1675_v51 = vld [vmem:[#allocation8 + $0x3a8] sm:$0xff]  ;;  %v2621_v21 = vpack.c.bf16 %v1672_v16, %v1670_v28  ;;  %v1966_v16 = vld [vmem:[#allocation11 + $0x70] sm:$0xff] }
 0x71d   :  { %v2623_v35 = vpack.c.bf16 %v1677_v54, %v1675_v51  ;;  %v1967_v51 = vld [vmem:[#allocation11 + $0x78] sm:$0xff] }
 0x71e   :  { %v2689_v54 = vpack.c.bf16 %v1967_v51, %v1966_v16 }
 0x71f   :  { %2586 = vmatpush1.bf16.msra.mxu0 %v2585_v55  ;;  %v1676_v55 = vld [vmem:[#allocation8 + $0x3b0] sm:$0xff] }
 0x720   :  { %2588 = vmatprep.subr.bf16.mxu0 %v2587_v41  ;;  %v1679_v41 = vld [vmem:[#allocation8 + $0x3c8] sm:$0xff]  ;;  %v2625_v6 = vpack.c.bf16 %v1676_v55, %v1674_v38 }
 0x721   :  { %v2627_v30 = vpack.c.bf16 %v1681_v57, %v1679_v41 }
 0x723   :  { %2590 = vmatpush1.bf16.msra.mxu0 %v2589_v39  ;;  %v1678_v39 = vld [vmem:[#allocation8 + $0x3c0] sm:$0xff] }
 0x724   :  { %2592 = vmatprep.subr.bf16.mxu0 %v2591_v25  ;;  %v1680_v25 = vld [vmem:[#allocation8 + $0x3d0] sm:$0xff] }
 0x725   :  { %v2629_v46 = vpack.c.bf16 %v1680_v25, %v1678_v39 }
 0x727   :  { %2594 = vmatpush1.bf16.msra.mxu0 %v2593_v49  ;;  %v2631_v49 = vpack.c.bf16 %v1685_v36, %v1683_v20 }
 0x728   :  { %2596 = vmatprep.subr.bf16.mxu0 %v2595_v58  ;;  %v1682_v58 = vld [vmem:[#allocation8 + $0x3e0] sm:$0xff] }
 0x729   :  { %v2633_v52 = vpack.c.bf16 %v1684_v26, %v1682_v58 }
 0x72b   :  { %2598 = vmatpush1.bf16.msra.mxu0 %v2597_v2  ;;  %v1855_v2 = vld [vmem:[#allocation10 + $0x68] sm:$0xff] }
 0x72c   :  { %2600 = vmatprep.subr.bf16.mxu0 %v2599_v5  ;;  %v2661_v5 = vpack.c.bf16 %v1855_v2, %v1854_v60 }
 0x72e   :  { %2662 = vmatpush3.bf16.msra.mxu1 %v2661_v5 }
 0x72f   :  { %2602 = vmatpush1.bf16.msra.mxu0 %v2601_v0  ;;  %v2665_v0 = vpack.c.bf16 %v1857_v42, %v1856_v63  ;;  %2664 = vmatprep.subr.bf16.mxu1 %v2663_v8 }
 0x730   :  { %2604 = vmatprep.subr.bf16.mxu0 %v2603_v15  ;;  %v1691_v15 = vrot.slane %v1686_v18, %v3505_v56  ;;  %v1956_v56 = vld [vmem:[#allocation11 + $0x20] sm:$0xff] }
 0x731   :  { %v2674_v23 = vpack.c.bf16 %v1957_v62, %v1956_v56 }
 0x732   :  { %2666 = vmatpush3.bf16.msra.mxu1 %v2665_v0 }
 0x733   :  { %2606 = vmatpush1.bf16.msra.mxu0 %v2605_v12  ;;  %2667 = vmatprep.subr.bf16.mxu1 %v3752_v22  ;;  %v1952_v12 = vld [vmem:[#allocation11] sm:$0xff] }
 0x734   :  { %2608 = vmatprep.subr.bf16.mxu0 %v2607_v3  ;;  %v1953_v3 = vld [vmem:[#allocation11 + $0x8] sm:$0xff] }
 0x735   :  { %v2668_v13 = vpack.c.bf16 %v1953_v3, %v1952_v12 }
 0x737   :  { %2610 = vmatpush1.bf16.msra.mxu0 %v2609_v10  ;;  %v1954_v10 = vld [vmem:[#allocation11 + $0x10] sm:$0xff] }
 0x738   :  { %2612 = vmatprep.subr.bf16.mxu0 %v2611_v27  ;;  %v1955_v27 = vld [vmem:[#allocation11 + $0x18] sm:$0xff] }
 0x739   :  { %v2671_v32 = vpack.c.bf16 %v1955_v27, %v1954_v10 }
 0x73b   :  { %2614 = vmatpush1.bf16.msra.mxu0 %v2613_v47  ;;  %v2677_v47 = vpack.c.bf16 %v1959_v31, %v1958_v33 }
 0x73c   :  { %2616 = vmatprep.subr.bf16.mxu0 %v2615_v17  ;;  %v1960_v17 = vld [vmem:[#allocation11 + $0x40] sm:$0xff] }
 0x73d   :  { %v2680_v48 = vpack.c.bf16 %v1961_v37, %v1960_v17 }
 0x73f   :  { %2618 = vmatpush1.bf16.msra.mxu0 %v2617_v50  ;;  %v1964_v50 = vld [vmem:[#allocation11 + $0x60] sm:$0xff] }
 0x740   :  { %2620 = vmatprep.subr.bf16.mxu0 %v2619_v43  ;;  %v1965_v43 = vld [vmem:[#allocation11 + $0x68] sm:$0xff] }
 0x741   :  { %v2686_v28 = vpack.c.bf16 %v1965_v43, %v1964_v50 }
 0x743   :  { %2622 = vmatpush1.bf16.msra.mxu0 %v2621_v21 }
 0x744   :  { %2624 = vmatprep.subr.bf16.mxu0 %v2623_v35  ;;  %v2074_v35 = vld [vmem:[%s3740_s12] ss:$0 sm:$0xff] }
 0x747   :  { %2626 = vmatpush1.bf16.msra.mxu0 %v2625_v6  ;;  %v2075_v6 = vld [vmem:[%s3742_s14] ss:$0 sm:$0xff] }
 0x748   :  { %2628 = vmatprep.subr.bf16.mxu0 %v2627_v30 }
 0x74b   :  { %2630 = vmatpush1.bf16.msra.mxu0 %v2629_v46 }
 0x74c   :  { %2632 = vmatprep.subr.bf16.mxu0 %v2631_v49 }
 0x74f   :  { %2634 = vmatpush1.bf16.msra.mxu0 %v2633_v52 }
 0x752   :  { %1834 = vmatmul.mubr.f32.vlgmr.msra.gmra.mrb[4].mxu0 %v1556_v14 }
 0x825   :  { %v1835_v24 = vpop.f32.mrb[4].mxu0 }
 0x826   :  { %v2693_v29 = vadd.f32 %v1835_v24, %v1691_v15  ;;  %v1837_v9 = vpop.f32.mrb[5].mxu0 }
 0x827   :  { %v2694_v44 = vadd.f32 %v1837_v9, %v1695_v11 }
 0x828   :  { %v1840_v7 = vmax.f32 %v2693_v29, 0.0 }
 0x829   :  { %v1841_v4 = vmax.f32 %v2694_v44, 0.0 }
 0x82b   :  { %1945 = vmatprep.mubr.f32.mxu1 %v1841_v4 }
 0x82c   :  { %1946 = vmatmul.mubr.f32.vlgmr.msra.gmra.mrb[8].mxu1 %v1840_v7 }
 0x82d   :  { %2669 = vmatpush3.bf16.msra.mxu1 %v2668_v13  ;;  %2376 = vmatprep.mubr.msk.f32.mxu1 %vm2919_vm1, %v2920_v45  ;;  %v1962_v45 = vld [vmem:[#allocation11 + $0x50] sm:$0xff] }
 0x82e   :  { %2670 = vmatprep.subr.bf16.mxu1 %v3752_v22  ;;  %v2683_v40 = vpack.c.bf16 %v1963_v34, %v1962_v45 }
 0x831   :  { %2672 = vmatpush3.bf16.msra.mxu1 %v2671_v32 }
 0x832   :  { %2673 = vmatprep.subr.bf16.mxu1 %v3752_v22 }
 0x835   :  { %2675 = vmatpush3.bf16.msra.mxu1 %v2674_v23 }
 0x836   :  { %2676 = vmatprep.subr.bf16.mxu1 %v3752_v22 }
 0x839   :  { %2678 = vmatpush3.bf16.msra.mxu1 %v2677_v47 }
 0x83a   :  { %2679 = vmatprep.subr.bf16.mxu1 %v3752_v22 }
 0x83d   :  { %2681 = vmatpush3.bf16.msra.mxu1 %v2680_v48 }
 0x83e   :  { %2682 = vmatprep.subr.bf16.mxu1 %v3752_v22 }
 0x841   :  { %2684 = vmatpush3.bf16.msra.mxu1 %v2683_v40 }
 0x842   :  { %2685 = vmatprep.subr.bf16.mxu1 %v3752_v22 }
 0x845   :  { %2687 = vmatpush3.bf16.msra.mxu1 %v2686_v28 }
 0x846   :  { %2688 = vmatprep.subr.bf16.mxu1 %v3752_v22 }
 0x849   :  { %2690 = vmatpush3.bf16.msra.mxu1 %v2689_v54 }
 0x8ff   :  { %v2178_v21 = vpop.f32.mrb[8].mxu1 }
 0x900   :  { %v2179_v38 = vpop.f32.mrb[9].mxu1 }
 0x901   :  { %v2180_v55 = vadd.f32 %v2179_v38, %v2178_v21 }
 0x903   :  { %v1948_v41 = vadd.f32 %v2180_v55, %v2074_v35 }
 0x905   :  { %v1951_v57 = vmax.f32 %v1948_v41, 0.0 }
 0x907   :  { %2377 = vmatmul.mubr.f32.vlgmr.msra.gmra.mrb[10].mxu1 %v1951_v57 }
 0x9da   :  { %v2041_v19 = vpop.f32.mrb[10].mxu1 }
 0x9db   :  { %v2042_v30 = vadd.f32 %v2075_v6, %v2041_v19  ;;  %v2378_v22 = vpop.f32.mrb[11].mxu1 }
 0x9dd   :  { %2045 = vst [vmem:[#allocation13] sm:$0x3] %v2042_v30 }
 0x9de   :  { %2885 = shalt.err (!%p2882_p10)
}
 0x9df   :  { %s2886_s5 = scalar_lea.hbm %s3743_s15, 32 }
 0x9e0   :  { %p2887_p11 = scmp.ne.s32.totalorder %s3743_s15, %s2886_s5  ;;  %p2890_p12 = scmp.lt.u32.totalorder %s2886_s5, %s3743_s15 }
 0x9e2   :  { %p2892_p13 = pnand %p2890_p12, %p2887_p11 }
 0x9e4   :  { %2895 = shalt.err (!%p2892_p13)
}
 0x9e5   :  { %2055 = dma.vmem_to_hbm [thread:$0]  %s2053_s17, 32, %s3743_s15, [#allocation4]  }
 0x9e6   :  { %2904 = dma.done.wait [#allocation4], 32  }
 0x9e7   :  { %2905 = vsyncadd [#allocation4], 4294967264 }
 0x9e8   :  { %2059 = vsyncpa [#allocation3], 1 }
 0x9e9   :  { %2060 = vsyncpa [#allocation6], 1 }
 0x9ea   :  { %2061 = vsyncpa [#allocation9], 1 }
 0x9eb   :  { %2062 = vsyncpa [#allocation12], 1 }
 0x9ec   :  { %2063 = vsyncpa [#allocation4], 1 }

// kernel: tpu_custom_call.1
= control target key start
LH: loop header
LB: loop body
LE: loop exit
PB: predicated region body
PF: predicated region fallthrough
CT: control target
= control target key end

     0   :  { %20 = vsyncpa [#allocation3], 0  ;;  %s3728_s0 = inlined_call_operand.vmem [shape: f32[2,64,64], index: 0, kind: input, shape index: {}]   ;;  %s3729_s1 = inlined_call_operand.vmem [shape: f32[64,128], index: 1, kind: input, shape index: {}]   ;;  %s3730_s2 = inlined_call_operand.vmem [shape: f32[1,128], index: 2, kind: input, shape index: {}]   ;;  %s3731_s3 = inlined_call_operand.vmem [shape: f32[128,64], index: 3, kind: input, shape index: {}]   ;;  %s3732_s4 = inlined_call_operand.vmem [shape: f32[1,64], index: 4, kind: input, shape index: {}]   ;;  %s3733_s5 = inlined_call_operand.hbm [shape: f32[64,64], index: 5, kind: input, shape index: {}]   ;;  %s3734_s6 = inlined_call_operand.hbm [shape: f32[64,64], index: 6, kind: input, shape index: {}]   ;;  %s3735_s7 = inlined_call_operand.hbm [shape: f32[64,512], index: 7, kind: input, shape index: {}]   ;;  %s3736_s8 = inlined_call_operand.vmem [shape: f32[1,512], index: 8, kind: input, shape index: {}]   ;;  %s3737_s9 = inlined_call_operand.hbm [shape: f32[512,256], index: 9, kind: input, shape index: {}]   ;;  %s3738_s10 = inlined_call_operand.vmem [shape: f32[1,256], index: 10, kind: input, shape index: {}]   ;;  %s3739_s11 = inlined_call_operand.hbm [shape: f32[256,128], index: 11, kind: input, shape index: {}]   ;;  %s3740_s12 = inlined_call_operand.vmem [shape: f32[1,128], index: 12, kind: input, shape index: {}]   ;;  %s3741_s13 = inlined_call_operand.hbm [shape: f32[128,128], index: 13, kind: input, shape index: {}]   ;;  %s3742_s14 = inlined_call_operand.vmem [shape: f32[1,128], index: 14, kind: input, shape index: {}]   ;;  %s3743_s15 = inlined_call_operand.hbm [shape: f32[1,2,128], index: 15, kind: output, shape index: {}]  }
   0x1   :  { %21 = vsyncpa [#allocation6], 0 }
   0x2   :  { %22 = vsyncpa [#allocation9], 0 }
   0x3   :  { %23 = vsyncpa [#allocation12], 0 }
   0x4   :  { %24 = vsyncpa [#allocation4], 0  ;;  %s2906_s18 = smov [#allocation5]   ;;  %s2907_s20 = smov [#allocation8]  }
   0x5   :  { %s52_s19 = sshll.u32 %s2906_s18, 4  ;;  %s78_s21 = sshll.u32 %s2907_s20, 4  ;;  %s53_s19 = int_to_ptr.vmem [resolvable:$true] %s52_s19  ;;  %s3003_s21 = int_to_ptr.vmem [resolvable:$true] %s78_s21 }
   0x6   :  { %s2742_s24 = scalar_lea.hbm %s3734_s6, 1024 }
   0x7   :  { %p2743_p0 = scmp.ne.s32.totalorder %s3734_s6, %s2742_s24  ;;  %p2746_p1 = scmp.lt.u32.totalorder %s2742_s24, %s3734_s6 }
   0x9   :  { %p2748_p2 = pnand %p2746_p1, %p2743_p0 }
   0xb   :  { %2751 = shalt.err (!%p2748_p2)
}
   0xc   :  { %s2752_s29 = scalar_lea.vmem %s53_s19, 1024  ;;  %p2757_p4 = scmp.lt.s32.totalorder %s53_s19, %s53_s19 }
   0xd   :  { %p2753_p3 = scmp.ne.s32.totalorder %s53_s19, %s2752_s29  ;;  %p2758_p5 = scmp.lt.s32.totalorder %s2752_s29, %s2752_s29 }
   0xf   :  { %p2759_p6 = por %p2758_p5, %p2757_p4 }
  0x11   :  { %p2760_p7 = pnand %p2759_p6, %p2753_p3 }
  0x13   :  { %2763 = shalt.err (!%p2760_p7)
}
  0x14   :  { %s3744_s30 = smov 128   ;;  %s3746_s16 = smov 8  }
  0x15   :  { %58 = dma.hbm_to_vmem [thread:$0]  %s3734_s6, 1024, %s53_s19, [#allocation6], %s3744_s30, %s3744_s30, %s3746_s16  }
  0x16   :  { %s2764_s23 = scalar_lea.hbm %s3737_s9, 16384 }
  0x17   :  { %p2765_p8 = scmp.ne.s32.totalorder %s3737_s9, %s2764_s23  ;;  %p2768_p9 = scmp.lt.u32.totalorder %s2764_s23, %s3737_s9 }
  0x19   :  { %p2770_p10 = pnand %p2768_p9, %p2765_p8 }
  0x1b   :  { %2773 = shalt.err (!%p2770_p10)
}
  0x1c   :  { %s2774_s28 = scalar_lea.vmem %s3003_s21, 16384  ;;  %p2779_p12 = scmp.lt.s32.totalorder %s3003_s21, %s3003_s21 }
  0x1d   :  { %p2775_p11 = scmp.ne.s32.totalorder %s3003_s21, %s2774_s28  ;;  %p2780_p13 = scmp.lt.s32.totalorder %s2774_s28, %s2774_s28 }
  0x1f   :  { %p2781_p0 = por %p2780_p13, %p2779_p12 }
  0x21   :  { %p2782_p1 = pnand %p2781_p0, %p2775_p11 }
  0x23   :  { %2785 = shalt.err (!%p2782_p1)
}
  0x24   :  { %s2910_s6 = smov 256   ;;  %s2911_s19 = smov 16  }
  0x25   :  { %84 = dma.hbm_to_vmem [thread:$0]  %s3737_s9, 16384, %s3003_s21, [#allocation9], %s2910_s6, %s2910_s6, %s2911_s19  }
  0x26   :  { %s2912_s18 = smov [#allocation2]   ;;  %s2913_s22 = smov [#allocation7]  }
  0x27   :  { %s40_s20 = sshll.u32 %s2912_s18, 4  ;;  %s64_s23 = sshll.u32 %s2913_s22, 4  ;;  %s41_s20 = int_to_ptr.vmem [resolvable:$true] %s40_s20  ;;  %s3037_s23 = int_to_ptr.vmem [resolvable:$true] %s64_s23 }
  0x28   :  { %s2786_s26 = scalar_lea.hbm %s3733_s5, 1024 }
  0x29   :  { %p2787_p2 = scmp.ne.s32.totalorder %s3733_s5, %s2786_s26  ;;  %p2790_p3 = scmp.lt.u32.totalorder %s2786_s26, %s3733_s5 }
  0x2b   :  { %p2792_p4 = pnand %p2790_p3, %p2787_p2 }
  0x2d   :  { %2795 = shalt.err (!%p2792_p4)
}
  0x2e   :  { %s2796_s9 = scalar_lea.vmem %s41_s20, 1024  ;;  %p2801_p6 = scmp.lt.s32.totalorder %s41_s20, %s41_s20 }
  0x2f   :  { %p2797_p5 = scmp.ne.s32.totalorder %s41_s20, %s2796_s9  ;;  %p2802_p7 = scmp.lt.s32.totalorder %s2796_s9, %s2796_s9 }
  0x31   :  { %p2803_p8 = por %p2802_p7, %p2801_p6 }
  0x33   :  { %p2804_p9 = pnand %p2803_p8, %p2797_p5 }
  0x35   :  { %2807 = shalt.err (!%p2804_p9)
}
  0x36   :  { %s3750_s21 = smov 8   ;;  %s3751_s6 = smov 128  }
  0x37   :  { %46 = dma.hbm_to_vmem [thread:$0]  %s3733_s5, 1024, %s41_s20, [#allocation3], %s3751_s6, %s3751_s6, %s3750_s21  }
  0x38   :  { %s2808_s30 = scalar_lea.hbm %s3735_s7, 4096 }
  0x39   :  { %p2809_p10 = scmp.ne.s32.totalorder %s3735_s7, %s2808_s30  ;;  %p2812_p11 = scmp.lt.u32.totalorder %s2808_s30, %s3735_s7 }
  0x3b   :  { %p2814_p12 = pnand %p2812_p11, %p2809_p10 }
  0x3d   :  { %2817 = shalt.err (!%p2814_p12)
}
  0x3e   :  { %s2818_s26 = scalar_lea.vmem %s3037_s23, 4096  ;;  %p2823_p0 = scmp.lt.s32.totalorder %s3037_s23, %s3037_s23 }
  0x3f   :  { %p2819_p13 = scmp.ne.s32.totalorder %s3037_s23, %s2818_s26  ;;  %p2824_p1 = scmp.lt.s32.totalorder %s2818_s26, %s2818_s26 }
  0x41   :  { %p2825_p2 = por %p2824_p1, %p2823_p0 }
  0x43   :  { %p2826_p3 = pnand %p2825_p2, %p2819_p13 }
  0x45   :  { %2829 = shalt.err (!%p2826_p3)
}
  0x46   :  { %s2914_s5 = smov 512   ;;  %s2915_s20 = smov 32  }
  0x47   :  { %70 = dma.hbm_to_vmem [thread:$0]  %s3735_s7, 4096, %s3037_s23, [#allocation6], %s2914_s5, %s2914_s5, %s2915_s20  }
  0x48   :  { %s2916_s9 = smov [#allocation10]   ;;  %s2917_s29 = smov [#allocation11]  }
  0x49   :  { %s92_s19 = sshll.u32 %s2916_s9, 4  ;;  %s106_s17 = sshll.u32 %s2917_s29, 4  ;;  %s93_s19 = int_to_ptr.vmem [resolvable:$true] %s92_s19  ;;  %s3071_s17 = int_to_ptr.vmem [resolvable:$true] %s106_s17 }
  0x4a   :  { %s2830_s16 = scalar_lea.hbm %s3739_s11, 4096 }
  0x4b   :  { %p2831_p4 = scmp.ne.s32.totalorder %s3739_s11, %s2830_s16  ;;  %p2834_p5 = scmp.lt.u32.totalorder %s2830_s16, %s3739_s11 }
  0x4d   :  { %p2836_p6 = pnand %p2834_p5, %p2831_p4 }
  0x4f   :  { %2839 = shalt.err (!%p2836_p6)
}
  0x50   :  { %s2840_s7 = scalar_lea.vmem %s93_s19, 4096  ;;  %p2845_p8 = scmp.lt.s32.totalorder %s93_s19, %s93_s19 }
  0x51   :  { %p2841_p7 = scmp.ne.s32.totalorder %s93_s19, %s2840_s7  ;;  %p2846_p9 = scmp.lt.s32.totalorder %s2840_s7, %s2840_s7 }
  0x53   :  { %p2847_p10 = por %p2846_p9, %p2845_p8 }
  0x55   :  { %p2848_p11 = pnand %p2847_p10, %p2841_p7 }
  0x57   :  { %2851 = shalt.err (!%p2848_p11)
}
  0x58   :  { %98 = dma.hbm_to_vmem [thread:$0]  %s3739_s11, 4096, %s93_s19, [#allocation9], %s3751_s6, %s3751_s6, %s3750_s21  }
  0x59   :  { %s2852_s28 = scalar_lea.hbm %s3741_s13, 2048 }
  0x5a   :  { %p2853_p12 = scmp.ne.s32.totalorder %s3741_s13, %s2852_s28  ;;  %p2856_p13 = scmp.lt.u32.totalorder %s2852_s28, %s3741_s13 }
  0x5c   :  { %p2858_p0 = pnand %p2856_p13, %p2853_p12 }
  0x5e   :  { %2861 = shalt.err (!%p2858_p0)
}
  0x5f   :  { %s2862_s16 = scalar_lea.vmem %s3071_s17, 2048  ;;  %p2867_p2 = scmp.lt.s32.totalorder %s3071_s17, %s3071_s17 }
  0x60   :  { %p2863_p1 = scmp.ne.s32.totalorder %s3071_s17, %s2862_s16  ;;  %p2868_p3 = scmp.lt.s32.totalorder %s2862_s16, %s2862_s16 }
  0x62   :  { %p2869_p4 = por %p2868_p3, %p2867_p2 }
  0x64   :  { %p2870_p5 = pnand %p2869_p4, %p2863_p1 }
  0x66   :  { %2873 = shalt.err (!%p2870_p5)
}
  0x67   :  { %112 = dma.hbm_to_vmem [thread:$0]  %s3741_s13, 2048, %s3071_s17, [#allocation12], %s3751_s6, %s3751_s6, %s3750_s21  }
  0x68   :  { %2896 = dma.done.wait [#allocation3], 1024  }
  0x69   :  { %2897 = vsyncadd [#allocation3], 4294966272 }
  0x6a   :  { %2898 = dma.done.wait [#allocation6], 5120  }
  0x6b   :  { %2899 = vsyncadd [#allocation6], 4294962176 }
  0x6c   :  { %2900 = dma.done.wait [#allocation9], 20480  }
  0x6d   :  { %2901 = vsyncadd [#allocation9], 4294946816 }
  0x6e   :  { %2902 = dma.done.wait [#allocation12], 2048  }
  0x6f   :  { %2903 = vsyncadd [#allocation12], 4294965248  ;;  %vm149_vm0 = vcmask 523264   ;;  %v3111_v0 = vld [vmem:[%s3728_s0 + $0x40] sm:$0xff]  ;;  %v3121_v2 = vld [vmem:[%s3728_s0 + $0x48] sm:$0xff]  ;;  %v3748_v35 = vmov 0.0|0.0  }
  0x70   :  { %v3116_v1 = vld [vmem:[%s3728_s0] sm:$0xff]  ;;  %v174_v3 = vsel %vm149_vm0, %v3111_v0, 0.0  ;;  %v3130_v5 = vld [vmem:[%s3728_s0 + $0x8] sm:$0xff]  ;;  %v177_v6 = vsel %vm149_vm0, %v3121_v2, 0.0  ;;  %v3139_v8 = vld [vmem:[%s3728_s0 + $0x50] sm:$0xff]  ;;  %2379 = vmatprep.subr.bf16.mxu1 %v3748_v35  ;;  %2451 = vmatprep.subr.bf16.mxu0 %v3748_v35  ;;  %vm2919_vm1 = vmmov 0  }
  0x71   :  { %v150_v4 = vsel %vm149_vm0, %v3116_v1, 0.0  ;;  %175 = vadd.xlane.f32.xlu1 %v174_v3  ;;  %v153_v7 = vsel %vm149_vm0, %v3130_v5, 0.0  ;;  %v3144_v9 = vld [vmem:[%s3728_s0 + $0x10] sm:$0xff]  ;;  %v180_v10 = vsel %vm149_vm0, %v3139_v8, 0.0  ;;  %v3153_v12 = vld [vmem:[%s3728_s0 + $0x58] sm:$0xff]  ;;  %v3167_v16 = vld [vmem:[%s3728_s0 + $0x60] sm:$0xff] }
  0x72   :  { %151 = vadd.xlane.f32.xlu0 %v150_v4  ;;  %v156_v11 = vsel %vm149_vm0, %v3144_v9, 0.0  ;;  %v3158_v13 = vld [vmem:[%s3728_s0 + $0x18] sm:$0xff]  ;;  %v183_v14 = vsel %vm149_vm0, %v3153_v12, 0.0  ;;  %v3172_v17 = vld [vmem:[%s3728_s0 + $0x20] sm:$0xff]  ;;  %v186_v18 = vsel %vm149_vm0, %v3167_v16, 0.0  ;;  %v3181_v20 = vld [vmem:[%s3728_s0 + $0x68] sm:$0xff] }
  0x73   :  { %v159_v15 = vsel %vm149_vm0, %v3158_v13, 0.0  ;;  %v162_v19 = vsel %vm149_vm0, %v3172_v17, 0.0  ;;  %v3186_v21 = vld [vmem:[%s3728_s0 + $0x28] sm:$0xff]  ;;  %v189_v22 = vsel %vm149_vm0, %v3181_v20, 0.0  ;;  %v3195_v24 = vld [vmem:[%s3728_s0 + $0x70] sm:$0xff]  ;;  %v3209_v28 = vld [vmem:[%s3728_s0 + $0x78] sm:$0xff] }
  0x74   :  { %v165_v23 = vsel %vm149_vm0, %v3186_v21, 0.0  ;;  %v3200_v25 = vld [vmem:[%s3728_s0 + $0x30] sm:$0xff]  ;;  %v192_v26 = vsel %vm149_vm0, %v3195_v24, 0.0  ;;  %v3214_v29 = vld [vmem:[%s3728_s0 + $0x38] sm:$0xff]  ;;  %v195_v30 = vsel %vm149_vm0, %v3209_v28, 0.0  ;;  %v263_v32 = vld [vmem:[%s3729_s1] sm:$0xff] }
  0x75   :  { %178 = vadd.xlane.f32.xlu1 %v177_v6  ;;  %v168_v27 = vsel %vm149_vm0, %v3200_v25, 0.0  ;;  %v171_v31 = vsel %vm149_vm0, %v3214_v29, 0.0  ;;  %v264_v33 = vld [vmem:[%s3729_s1 + $0x8] sm:$0xff]  ;;  %v265_v36 = vld [vmem:[%s3729_s1 + $0x10] sm:$0xff]  ;;  %v266_v37 = vld [vmem:[%s3729_s1 + $0x18] sm:$0xff]  ;;  %v2920_v45 = vmov 0.0   ;;  %v294_v6 = vlaneseq }
  0x76   :  { %154 = vadd.xlane.f32.xlu0 %v153_v7  ;;  %v3226_v34 = vpack.c.bf16 %v264_v33, %v263_v32  ;;  %v3238_v38 = vpack.c.bf16 %v266_v37, %v265_v36  ;;  %v267_v39 = vld [vmem:[%s3729_s1 + $0x20] sm:$0xff]  ;;  %v268_v40 = vld [vmem:[%s3729_s1 + $0x28] sm:$0xff]  ;;  %v269_v42 = vld [vmem:[%s3729_s1 + $0x30] sm:$0xff]  ;;  %2214 = vmatprep.mubr.msk.f32.mxu1 %vm2919_vm1, %v2920_v45  ;;  %v218_v46 = vsel %vm149_vm0, %v3130_v5, -inf  ;;  %v215_v47 = vsel %vm149_vm0, %v3116_v1, -inf  ;;  %s2922_s6 = smov [#allocation13]  }
  0x77   :  { %v3248_v41 = vpack.c.bf16 %v268_v40, %v267_v39  ;;  %v270_v43 = vld [vmem:[%s3729_s1 + $0x38] sm:$0xff]  ;;  %2322 = vmatprep.mubr.msk.f32.mxu0 %vm2919_vm1, %v2920_v45  ;;  %v242_v48 = vsel %vm149_vm0, %v3121_v2, -inf  ;;  %v239_v49 = vsel %vm149_vm0, %v3111_v0, -inf  ;;  %v245_v50 = vsel %vm149_vm0, %v3139_v8, -inf  ;;  %s2052_s17 = sshll.u32 %s2922_s6, 4  ;;  %s2053_s17 = int_to_ptr.vmem [resolvable:$true] %s2052_s17 }
  0x78   :  { %2381 = vmatpush3.bf16.msra.mxu1 %v3226_v34  ;;  %v3258_v44 = vpack.c.bf16 %v270_v43, %v269_v42  ;;  %v221_v51 = vsel %vm149_vm0, %v3144_v9, -inf  ;;  %v248_v52 = vsel %vm149_vm0, %v3153_v12, -inf  ;;  %v224_v53 = vsel %vm149_vm0, %v3158_v13, -inf  ;;  %s2874_s7 = scalar_lea.vmem %s2053_s17, 32  ;;  %p2879_p7 = scmp.lt.s32.totalorder %s2053_s17, %s2053_s17 }
  0x79   :  { %181 = vadd.xlane.f32.xlu1 %v180_v10  ;;  %2382 = vmatprep.subr.bf16.mxu1 %v3748_v35  ;;  %v251_v54 = vsel %vm149_vm0, %v3167_v16, -inf  ;;  %v227_v55 = vsel %vm149_vm0, %v3172_v17, -inf  ;;  %v254_v56 = vsel %vm149_vm0, %v3181_v20, -inf  ;;  %v230_v57 = vsel %vm149_vm0, %v3186_v21, -inf  ;;  %p2875_p6 = scmp.ne.s32.totalorder %s2053_s17, %s2874_s7  ;;  %p2880_p8 = scmp.lt.s32.totalorder %s2874_s7, %s2874_s7 }
  0x7a   :  { %157 = vadd.xlane.f32.xlu0 %v156_v11  ;;  %v257_v58 = vsel %vm149_vm0, %v3195_v24, -inf  ;;  %v233_v59 = vsel %vm149_vm0, %v3200_v25, -inf  ;;  %v260_v60 = vsel %vm149_vm0, %v3209_v28, -inf  ;;  %v236_v61 = vsel %vm149_vm0, %v3214_v29, -inf }
  0x7b   :  { %v295_v11 = vand.u32 127, %v294_v6  ;;  %vm305_vm2 = vcmask 130112   ;;  %vm312_vm3 = vcmask 195712   ;;  %vm319_vm4 = vcmask 261312   ;;  %p2881_p9 = por %p2880_p8, %p2879_p7 }
  0x7c   :  { %2384 = vmatpush3.bf16.msra.mxu1 %v3238_v38  ;;  %vm326_vm5 = vcmask 326912   ;;  %vm333_vm6 = vcmask 392512   ;;  %vm340_vm7 = vcmask 458112   ;;  %vm347_vm8 = vcmask 523712  }
  0x7d   :  { %184 = vadd.xlane.f32.xlu1 %v183_v14  ;;  %2385 = vmatprep.subr.bf16.mxu1 %v3748_v35  ;;  %v3298_v14 = vshrl.u32 %v294_v6, 7  ;;  %v328_v36 = vadd.s32 4294967256, %v295_v11  ;;  %v335_v39 = vadd.s32 4294967248, %v295_v11  ;;  %vm388_vm9 = vcmask 1041409   ;;  %p2882_p10 = pnand %p2881_p9, %p2875_p6 }
  0x7e   :  { %160 = vadd.xlane.f32.xlu0 %v159_v15 }
  0x80   :  { %2387 = vmatpush3.bf16.msra.mxu1 %v3248_v41 }
  0x81   :  { %187 = vadd.xlane.f32.xlu1 %v186_v18  ;;  %2388 = vmatprep.subr.bf16.mxu1 %v3748_v35 }
  0x82   :  { %163 = vadd.xlane.f32.xlu0 %v162_v19  ;;  %v300_v19 = vadd.s32 4294967288, %v295_v11 }
  0x84   :  { %2390 = vmatpush3.bf16.msra.mxu1 %v3258_v44  ;;  %v3304_v32 = vsub.s32 %v300_v19, %v3298_v14 }
  0x85   :  { %190 = vadd.xlane.f32.xlu1 %v189_v22  ;;  %2391 = vmatprep.subr.bf16.mxu1 %v3748_v35  ;;  %v307_v22 = vadd.s32 4294967280, %v295_v11 }
  0x86   :  { %166 = vadd.xlane.f32.xlu0 %v165_v23  ;;  %v314_v23 = vadd.s32 4294967272, %v295_v11 }
  0x87   :  { %v3307_v33 = vsub.s32 %v307_v22, %v3298_v14 }
  0x88   :  { %v3310_v37 = vsub.s32 %v314_v23, %v3298_v14 }
  0x89   :  { %193 = vadd.xlane.f32.xlu1 %v192_v26  ;;  %v321_v26 = vadd.s32 4294967264, %v295_v11 }
  0x8a   :  { %169 = vadd.xlane.f32.xlu0 %v168_v27  ;;  %v3301_v27 = vsub.s32 %v295_v11, %v3298_v14 }
  0x8b   :  { %v3313_v43 = vsub.s32 %v321_v26, %v3298_v14 }
  0x8d   :  { %196 = vadd.xlane.f32.xlu1 %v195_v30 }
  0x8e   :  { %172 = vadd.xlane.f32.xlu0 %v171_v31 }
  0x91   :  { %219 = vmax.xlane.f32.xlu1 %v218_v46 }
  0x92   :  { %216 = vmax.xlane.f32.xlu0 %v215_v47 }
  0x95   :  { %243 = vmax.xlane.f32.xlu1 %v242_v48 }
  0x96   :  { %240 = vmax.xlane.f32.xlu0 %v239_v49 }
  0x99   :  { %246 = vmax.xlane.f32.xlu1 %v245_v50 }
  0x9a   :  { %222 = vmax.xlane.f32.xlu0 %v221_v51 }
  0x9d   :  { %249 = vmax.xlane.f32.xlu1 %v248_v52 }
  0x9e   :  { %225 = vmax.xlane.f32.xlu0 %v224_v53 }
  0xa1   :  { %252 = vmax.xlane.f32.xlu1 %v251_v54  ;;  %v3316_v54 = vsub.s32 %v328_v36, %v3298_v14 }
  0xa2   :  { %228 = vmax.xlane.f32.xlu0 %v227_v55 }
  0xa5   :  { %255 = vmax.xlane.f32.xlu1 %v254_v56 }
  0xa6   :  { %231 = vmax.xlane.f32.xlu0 %v230_v57  ;;  %v3319_v57 = vsub.s32 %v335_v39, %v3298_v14 }
  0xa9   :  { %258 = vmax.xlane.f32.xlu1 %v257_v58  ;;  %v342_v58 = vadd.s32 4294967240, %v295_v11 }
  0xaa   :  { %234 = vmax.xlane.f32.xlu0 %v233_v59 }
  0xab   :  { %v3332_v26 = vsub.s32 %v342_v58, %v3298_v14 }
  0xad   :  { %261 = vmax.xlane.f32.xlu1 %v260_v60 }
  0xae   :  { %237 = vmax.xlane.f32.xlu0 %v236_v61 }
  0xfe   :  { %v176_v62 = vpop.xlane.xlu1 %175 }
  0xff   :  { %v152_v63 = vpop.xlane.xlu0 %151  ;;  %v207_v46 = vmul.f32 0.015625, %v176_v62 }
 0x100   :  { %v199_v47 = vmul.f32 0.015625, %v152_v63 }
 0x101   :  { %v352_v63 = vrot.slane %v207_v46, %v3301_v27 }
 0x102   :  { %v179_v3 = vpop.xlane.xlu1 %178 }
 0x103   :  { %v155_v4 = vpop.xlane.xlu0 %154  ;;  %v208_v40 = vmul.f32 0.015625, %v179_v3  ;;  %v299_v3 = vrot.slane %v199_v47, %v3301_v27 }
 0x104   :  { %v200_v42 = vmul.f32 0.015625, %v155_v4 }
 0x105   :  { %v356_v59 = vrot.slane %v208_v40, %v3304_v32 }
 0x106   :  { %v182_v7 = vpop.xlane.xlu1 %181  ;;  %v304_v60 = vrot.slane %v200_v42, %v3304_v32 }
 0x107   :  { %v158_v10 = vpop.xlane.xlu0 %157  ;;  %v209_v48 = vmul.f32 0.015625, %v182_v7 }
 0x108   :  { %v201_v49 = vmul.f32 0.015625, %v158_v10 }
 0x109   :  { %v361_v4 = vrot.slane %v209_v48, %v3307_v33 }
 0x10a   :  { %v185_v15 = vpop.xlane.xlu1 %184  ;;  %v311_v6 = vrot.slane %v201_v49, %v3307_v33 }
 0x10b   :  { %v161_v18 = vpop.xlane.xlu0 %160  ;;  %v210_v52 = vmul.f32 0.015625, %v185_v15 }
 0x10c   :  { %v202_v53 = vmul.f32 0.015625, %v161_v18 }
 0x10d   :  { %v366_v15 = vrot.slane %v210_v52, %v3310_v37 }
 0x10e   :  { %v188_v30 = vpop.xlane.xlu1 %187  ;;  %v318_v11 = vrot.slane %v202_v53, %v3310_v37 }
 0x10f   :  { %v164_v31 = vpop.xlane.xlu0 %163  ;;  %v211_v55 = vmul.f32 0.015625, %v188_v30  ;;  %v357_v30 = vsel %vm305_vm2, %v356_v59, %v352_v63 }
 0x110   :  { %v203_v56 = vmul.f32 0.015625, %v164_v31  ;;  %v306_v31 = vsel %vm305_vm2, %v304_v60, %v299_v3  ;;  %v362_v40 = vsel %vm312_vm3, %v361_v4, %v357_v30 }
 0x111   :  { %v371_v22 = vrot.slane %v211_v55, %v3313_v43  ;;  %v313_v42 = vsel %vm312_vm3, %v311_v6, %v306_v31  ;;  %v463_v55 = vld [vmem:[%s3731_s3] sm:$0xff]  ;;  %v469_v31 = vld [vmem:[%s3731_s3 + $0x30] sm:$0xff] }
 0x112   :  { %v191_v50 = vpop.xlane.xlu1 %190  ;;  %v325_v23 = vrot.slane %v203_v56, %v3313_v43  ;;  %v464_v56 = vld [vmem:[%s3731_s3 + $0x8] sm:$0xff] }
 0x113   :  { %v167_v51 = vpop.xlane.xlu0 %166  ;;  %v212_v61 = vmul.f32 0.015625, %v191_v50  ;;  %v367_v50 = vsel %vm319_vm4, %v366_v15, %v362_v40  ;;  %v3358_v6 = vpack.c.bf16 %v464_v56, %v463_v55  ;;  %v465_v15 = vld [vmem:[%s3731_s3 + $0x10] sm:$0xff]  ;;  %v471_v40 = vld [vmem:[%s3731_s3 + $0x40] sm:$0xff]  ;;  %v478_v55 = vld [vmem:[%s3731_s3 + $0x78] sm:$0xff] }
 0x114   :  { %v204_v62 = vmul.f32 0.015625, %v167_v51  ;;  %v320_v51 = vsel %vm319_vm4, %v318_v11, %v313_v42  ;;  %v372_v58 = vsel %vm326_vm5, %v371_v22, %v367_v50  ;;  %v466_v11 = vld [vmem:[%s3731_s3 + $0x18] sm:$0xff]  ;;  %v467_v22 = vld [vmem:[%s3731_s3 + $0x20] sm:$0xff]  ;;  %v472_v42 = vld [vmem:[%s3731_s3 + $0x48] sm:$0xff] }
 0x115   :  { %v376_v36 = vrot.slane %v212_v61, %v3316_v54  ;;  %v327_v59 = vsel %vm326_vm5, %v325_v23, %v320_v51  ;;  %v468_v23 = vld [vmem:[%s3731_s3 + $0x28] sm:$0xff]  ;;  %v475_v50 = vld [vmem:[%s3731_s3 + $0x60] sm:$0xff] }
 0x116   :  { %v194_v7 = vpop.xlane.xlu1 %193  ;;  %v332_v39 = vrot.slane %v204_v62, %v3316_v54  ;;  %v3383_v30 = vpack.c.bf16 %v468_v23, %v467_v22  ;;  %v476_v51 = vld [vmem:[%s3731_s3 + $0x68] sm:$0xff] }
 0x117   :  { %v170_v10 = vpop.xlane.xlu0 %169  ;;  %v213_v18 = vmul.f32 0.015625, %v194_v7  ;;  %v377_v60 = vsel %vm333_vm6, %v376_v36, %v372_v58  ;;  %v470_v36 = vld [vmem:[%s3731_s3 + $0x38] sm:$0xff] }
 0x118   :  { %v205_v19 = vmul.f32 0.015625, %v170_v10  ;;  %v334_v61 = vsel %vm333_vm6, %v332_v39, %v327_v59  ;;  %v3393_v39 = vpack.c.bf16 %v470_v36, %v469_v31 }
 0x119   :  { %v381_v46 = vrot.slane %v213_v18, %v3319_v57 }
 0x11a   :  { %v339_v47 = vrot.slane %v205_v19, %v3319_v57  ;;  %v197_v48 = vpop.xlane.xlu1 %196  ;;  %v3371_v19 = vpack.c.bf16 %v466_v11, %v465_v15 }
 0x11b   :  { %v173_v49 = vpop.xlane.xlu0 %172  ;;  %v214_v52 = vmul.f32 0.015625, %v197_v48  ;;  %v382_v3 = vsel %vm340_vm7, %v381_v46, %v377_v60  ;;  %v3403_v46 = vpack.c.bf16 %v472_v42, %v471_v40  ;;  %v474_v48 = vld [vmem:[%s3731_s3 + $0x58] sm:$0xff]  ;;  %v2064_v42 = vld [vmem:[%s3730_s2] ss:$0 sm:$0xff] }
 0x11c   :  { %v206_v53 = vmul.f32 0.015625, %v173_v49  ;;  %v341_v4 = vsel %vm340_vm7, %v339_v47, %v334_v61  ;;  %v473_v47 = vld [vmem:[%s3731_s3 + $0x50] sm:$0xff] }
 0x11d   :  { %v386_v62 = vrot.slane %v214_v52, %v3332_v26  ;;  %v3413_v49 = vpack.c.bf16 %v474_v48, %v473_v47  ;;  %v3423_v52 = vpack.c.bf16 %v476_v51, %v475_v50 }
 0x11e   :  { %v346_v63 = vrot.slane %v206_v53, %v3332_v26  ;;  %v477_v53 = vld [vmem:[%s3731_s3 + $0x70] sm:$0xff]  ;;  %v220_v58 = vpop.xlane.xlu1 %219 }
 0x11f   :  { %v387_v10 = vsel %vm347_vm8, %v386_v62, %v382_v3  ;;  %v3434_v56 = vpack.c.bf16 %v478_v55, %v477_v53  ;;  %v217_v59 = vpop.xlane.xlu0 %216  ;;  %v579_v15 = vrot.slane %v220_v58, %v3304_v32 }
 0x120   :  { %v348_v7 = vsel %vm347_vm8, %v346_v63, %v341_v4  ;;  %v575_v11 = vrot.slane %v217_v59, %v3301_v27 }
 0x121   :  { %v389_v18 = vsel %vm388_vm9, %v387_v10, %v348_v7 }
 0x122   :  { %2215 = vmatmul.mubr.msk.f32.vlgmr.msra.gmra.mrb[0].mxu1 %vm149_vm0, %v389_v18  ;;  %v244_v60 = vpop.xlane.xlu1 %243  ;;  %v580_v47 = vsel %vm305_vm2, %v579_v15, %v575_v11 }
 0x123   :  { %2393 = vmatpush3.bf16.msra.mxu1 %v3358_v6  ;;  %2249 = vmatprep.mubr.msk.f32.mxu1 %vm2919_vm1, %v2920_v45  ;;  %v241_v61 = vpop.xlane.xlu0 %240  ;;  %v618_v18 = vrot.slane %v244_v60, %v3304_v32 }
 0x124   :  { %2394 = vmatprep.subr.bf16.mxu1 %v3748_v35  ;;  %v614_v22 = vrot.slane %v241_v61, %v3301_v27 }
 0x126   :  { %v247_v62 = vpop.xlane.xlu1 %246  ;;  %v619_v48 = vsel %vm305_vm2, %v618_v18, %v614_v22  ;;  %v3752_v22 = vmov 0.0|0.0  }
 0x127   :  { %2396 = vmatpush3.bf16.msra.mxu1 %v3371_v19  ;;  %v223_v63 = vpop.xlane.xlu0 %222  ;;  %v623_v23 = vrot.slane %v247_v62, %v3307_v33 }
 0x128   :  { %2397 = vmatprep.subr.bf16.mxu1 %v3748_v35  ;;  %v584_v31 = vrot.slane %v223_v63, %v3307_v33 }
 0x129   :  { %v624_v59 = vsel %vm312_vm3, %v623_v23, %v619_v48 }
 0x12a   :  { %v250_v3 = vpop.xlane.xlu1 %249  ;;  %v585_v60 = vsel %vm312_vm3, %v584_v31, %v580_v47 }
 0x12b   :  { %2399 = vmatpush3.bf16.msra.mxu1 %v3383_v30  ;;  %v226_v4 = vpop.xlane.xlu0 %225  ;;  %v628_v51 = vrot.slane %v250_v3, %v3310_v37 }
 0x12c   :  { %2400 = vmatprep.subr.bf16.mxu1 %v3748_v35  ;;  %v589_v53 = vrot.slane %v226_v4, %v3310_v37 }
 0x12d   :  { %v629_v11 = vsel %vm319_vm4, %v628_v51, %v624_v59 }
 0x12e   :  { %v253_v7 = vpop.xlane.xlu1 %252  ;;  %v590_v18 = vsel %vm319_vm4, %v589_v53, %v585_v60 }
 0x12f   :  { %2402 = vmatpush3.bf16.msra.mxu1 %v3393_v39  ;;  %v229_v10 = vpop.xlane.xlu0 %228  ;;  %v633_v62 = vrot.slane %v253_v7, %v3313_v43 }
 0x130   :  { %2403 = vmatprep.subr.bf16.mxu1 %v3748_v35  ;;  %v594_v63 = vrot.slane %v229_v10, %v3313_v43 }
 0x131   :  { %v634_v7 = vsel %vm326_vm5, %v633_v62, %v629_v11  ;;  %v3512_v62 = vsub.s32 1, %v3298_v14  ;;  %v982_v11 = vld [vmem:[#allocation5 + $0x8] sm:$0xff] }
 0x132   :  { %v256_v36 = vpop.xlane.xlu1 %255  ;;  %v595_v10 = vsel %vm326_vm5, %v594_v63, %v590_v18 }
 0x133   :  { %2405 = vmatpush3.bf16.msra.mxu1 %v3403_v46  ;;  %v232_v40 = vpop.xlane.xlu0 %231  ;;  %v638_v3 = vrot.slane %v256_v36, %v3316_v54 }
 0x134   :  { %2406 = vmatprep.subr.bf16.mxu1 %v3748_v35  ;;  %v599_v4 = vrot.slane %v232_v40, %v3316_v54 }
 0x136   :  { %v600_v36 = vsel %vm333_vm6, %v599_v4, %v595_v10  ;;  %v984_v4 = vld [vmem:[#allocation5 + $0x18] sm:$0xff]  ;;  %v985_v10 = vld [vmem:[#allocation5 + $0x20] sm:$0xff] }
 0x137   :  { %2408 = vmatpush3.bf16.msra.mxu1 %v3413_v49  ;;  %v235_v15 = vpop.xlane.xlu0 %234 }
 0x138   :  { %2409 = vmatprep.subr.bf16.mxu1 %v3748_v35  ;;  %v604_v31 = vrot.slane %v235_v15, %v3319_v57  ;;  %v981_v15 = vld [vmem:[#allocation5] sm:$0xff] }
 0x139   :  { %v2452_v18 = vpack.c.bf16 %v982_v11, %v981_v15 }
 0x13b   :  { %2411 = vmatpush3.bf16.msra.mxu1 %v3423_v52  ;;  %v238_v48 = vpop.xlane.xlu0 %237  ;;  %2453 = vmatpush3.bf16.msra.mxu0 %v2452_v18 }
 0x13c   :  { %2412 = vmatprep.subr.bf16.mxu1 %v3748_v35  ;;  %2454 = vmatprep.subr.bf16.mxu0 %v3752_v22 }
 0x13f   :  { %2414 = vmatpush3.bf16.msra.mxu1 %v3434_v56 }
 0x140   :  { %2415 = vmatprep.subr.bf16.mxu1 %v3748_v35  ;;  %v259_v35 = vpop.xlane.xlu1 %258 }
 0x141   :  { %v643_v23 = vrot.slane %v259_v35, %v3319_v57  ;;  %v605_v35 = vsel %vm340_vm7, %v604_v31, %v600_v36 }
 0x144   :  { %v262_v47 = vpop.xlane.xlu1 %261 }
 0x145   :  { %v648_v40 = vrot.slane %v262_v47, %v3332_v26  ;;  %v987_v47 = vld [vmem:[#allocation5 + $0x30] sm:$0xff] }
 0x1f5   :  { %v458_v50 = vpop.f32.mrb[0].mxu1 }
 0x1f6   :  { %v459_v55 = vadd.f32 %v2064_v42, %v458_v50  ;;  %v2216_v58 = vpop.f32.mrb[1].mxu1  ;;  %v609_v50 = vrot.slane %v238_v48, %v3332_v26  ;;  %v988_v48 = vld [vmem:[#allocation5 + $0x38] sm:$0xff] }
 0x1f8   :  { %v462_v61 = vmax.f32 %v459_v55, 0.0  ;;  %v610_v53 = vsel %vm347_vm8, %v609_v50, %v605_v35 }
 0x1fa   :  { %2250 = vmatmul.mubr.f32.vlgmr.msra.gmra.mrb[2].mxu1 %v462_v61 }
 0x1fb   :  { %2417 = vmatpush3.bf16.msra.mxu1 %v3226_v34  ;;  %2268 = vmatprep.mubr.msk.f32.mxu1 %vm2919_vm1, %v2920_v45  ;;  %v639_v34 = vsel %vm333_vm6, %v638_v3, %v634_v7  ;;  %v983_v3 = vld [vmem:[#allocation5 + $0x10] sm:$0xff] }
 0x1fc   :  { %2418 = vmatprep.subr.bf16.mxu1 %v3752_v22  ;;  %v644_v51 = vsel %vm340_vm7, %v643_v23, %v639_v34  ;;  %v2455_v7 = vpack.c.bf16 %v984_v4, %v983_v3  ;;  %v986_v23 = vld [vmem:[#allocation5 + $0x28] sm:$0xff]  ;;  %v2461_v34 = vpack.c.bf16 %v988_v48, %v987_v47 }
 0x1fd   :  { %v2458_v31 = vpack.c.bf16 %v986_v23, %v985_v10 }
 0x1fe   :  { %2456 = vmatpush3.bf16.msra.mxu0 %v2455_v7 }
 0x1ff   :  { %2420 = vmatpush3.bf16.msra.mxu1 %v3238_v38  ;;  %v649_v38 = vsel %vm347_vm8, %v648_v40, %v644_v51  ;;  %2457 = vmatprep.subr.bf16.mxu0 %v3752_v22 }
 0x200   :  { %2421 = vmatprep.subr.bf16.mxu1 %v3752_v22  ;;  %v650_v55 = vsel %vm388_vm9, %v649_v38, %v610_v53 }
 0x202   :  { %2459 = vmatpush3.bf16.msra.mxu0 %v2458_v31 }
 0x203   :  { %2423 = vmatpush3.bf16.msra.mxu1 %v3248_v41  ;;  %2460 = vmatprep.subr.bf16.mxu0 %v3752_v22 }
 0x204   :  { %2424 = vmatprep.subr.bf16.mxu1 %v3752_v22 }
 0x206   :  { %2462 = vmatpush3.bf16.msra.mxu0 %v2461_v34 }
 0x207   :  { %2426 = vmatpush3.bf16.msra.mxu1 %v3258_v44  ;;  %2463 = vmatprep.subr.bf16.mxu0 %v3752_v22 }
 0x208   :  { %2427 = vmatprep.subr.bf16.mxu1 %v3752_v22 }
 0x20a   :  { %2269 = vmatmul.mubr.msk.f32.vlgmr.msra.gmra.mrb[4].mxu1 %vm149_vm0, %v650_v55 }
 0x20b   :  { %2429 = vmatpush3.bf16.msra.mxu1 %v3358_v6  ;;  %2303 = vmatprep.mubr.msk.f32.mxu1 %vm2919_vm1, %v2920_v45 }
 0x20c   :  { %2430 = vmatprep.subr.bf16.mxu1 %v3752_v22 }
 0x20f   :  { %2432 = vmatpush3.bf16.msra.mxu1 %v3371_v19 }
 0x210   :  { %2433 = vmatprep.subr.bf16.mxu1 %v3752_v22 }
 0x213   :  { %2435 = vmatpush3.bf16.msra.mxu1 %v3383_v30  ;;  %v2066_v30 = vld [vmem:[%s3732_s4] ss:$0 sm:$0xff] }
 0x214   :  { %2436 = vmatprep.subr.bf16.mxu1 %v3752_v22 }
 0x217   :  { %2438 = vmatpush3.bf16.msra.mxu1 %v3393_v39  ;;  %v2691_v39 = vadd.f32 %v2066_v30, %v2066_v30 }
 0x218   :  { %2439 = vmatprep.subr.bf16.mxu1 %v3752_v22 }
 0x21b   :  { %2441 = vmatpush3.bf16.msra.mxu1 %v3403_v46 }
 0x21c   :  { %2442 = vmatprep.subr.bf16.mxu1 %v3752_v22 }
 0x21f   :  { %2444 = vmatpush3.bf16.msra.mxu1 %v3413_v49 }
 0x220   :  { %2445 = vmatprep.subr.bf16.mxu1 %v3752_v22 }
 0x223   :  { %2447 = vmatpush3.bf16.msra.mxu1 %v3423_v52 }
 0x224   :  { %2448 = vmatprep.subr.bf16.mxu1 %v3752_v22 }
 0x227   :  { %2450 = vmatpush3.bf16.msra.mxu1 %v3434_v56  ;;  %v3505_v56 = vsub.s32 0, %v3298_v14 }
 0x2dd   :  { %v719_v41 = vpop.f32.mrb[4].mxu1 }
 0x2de   :  { %v720_v44 = vadd.f32 %v2064_v42, %v719_v41  ;;  %v2270_v6 = vpop.f32.mrb[5].mxu1 }
 0x2e0   :  { %v723_v19 = vmax.f32 %v720_v44, 0.0 }
 0x2e2   :  { %2304 = vmatmul.mubr.f32.vlgmr.msra.gmra.mrb[2].mxu1 %v723_v19 }
 0x2e3   :  { %1547 = vmatprep.mubr.f32.mxu1 %v2920_v45 }
 0x3b5   :  { %v790_v46 = vpop.f32.mrb[2].mxu1 }
 0x3b6   :  { %v2692_v49 = vadd.f32 %v2691_v39, %v790_v46  ;;  %v2305_v58 = vpop.f32.mrb[3].mxu1 }
 0x3b8   :  { %v2068_v52 = vmul.f32 -1.442695, %v2692_v49 }
 0x3ba   :  { %2718 = vpow2.f32 %v2068_v52 }
 0x3c4   :  { %v2719_v59 = vpop.eup %2718 }
 0x3c5   :  { %v798_v60 = vadd.f32 1.0, %v2719_v59 }
 0x3c7   :  { %2720 = vrcp.f32 %v798_v60 }
 0x3d1   :  { %v3507_v42 = vpop.eup %2720 }
 0x3d2   :  { %v804_v61 = vrot.slane %v3507_v42, %v3505_v56  ;;  %v839_v63 = vrot.slane %v3507_v42, %v3512_v62 }
 0x3d4   :  { %810 = vbcast.lane.b32.xlu1 %v804_v61, 264  ;;  %806 = vbcast.lane.b32.xlu0 %v804_v61, 256 }
 0x3d8   :  { %814 = vbcast.lane.b32.xlu1 %v804_v61, 272  ;;  %841 = vbcast.lane.b32.xlu0 %v839_v63, 256 }
 0x3dc   :  { %818 = vbcast.lane.b32.xlu1 %v804_v61, 280  ;;  %849 = vbcast.lane.b32.xlu0 %v839_v63, 272 }
 0x3e0   :  { %845 = vbcast.lane.b32.xlu1 %v839_v63, 264  ;;  %822 = vbcast.lane.b32.xlu0 %v804_v61, 288 }
 0x3e4   :  { %853 = vbcast.lane.b32.xlu1 %v839_v63, 280  ;;  %857 = vbcast.lane.b32.xlu0 %v839_v63, 288 }
 0x3e8   :  { %826 = vbcast.lane.b32.xlu1 %v804_v61, 296  ;;  %830 = vbcast.lane.b32.xlu0 %v804_v61, 304 }
 0x3ec   :  { %861 = vbcast.lane.b32.xlu1 %v839_v63, 296  ;;  %865 = vbcast.lane.b32.xlu0 %v839_v63, 304 }
 0x3f0   :  { %834 = vbcast.lane.b32.xlu1 %v804_v61, 312 }
 0x3f4   :  { %869 = vbcast.lane.b32.xlu1 %v839_v63, 312 }
 0x446   :  { %v811_v36 = vpop.permute.xlu1 %810  ;;  %v807_v40 = vpop.permute.xlu0 %806 }
 0x447   :  { %v872_v6 = vmul.f32 %v811_v36, %v3130_v5  ;;  %v871_v19 = vmul.f32 %v807_v40, %v3116_v1 }
 0x449   :  { %v888_v60 = vsel %vm149_vm0, %v872_v6, 0.0  ;;  %v932_v10 = vsel %vm149_vm0, %v872_v6, -inf  ;;  %v931_v23 = vsel %vm149_vm0, %v871_v19, -inf }
 0x44a   :  { %v815_v50 = vpop.permute.xlu1 %814  ;;  %v842_v51 = vpop.permute.xlu0 %841 }
 0x44b   :  { %v879_v53 = vmul.f32 %v842_v51, %v3111_v0  ;;  %v873_v59 = vmul.f32 %v815_v50, %v3144_v9 }
 0x44d   :  { %v908_v30 = vsel %vm149_vm0, %v879_v53, 0.0  ;;  %v890_v15 = vsel %vm149_vm0, %v873_v59, 0.0 }
 0x44e   :  { %v819_v35 = vpop.permute.xlu1 %818  ;;  %v850_v38 = vpop.permute.xlu0 %849 }
 0x44f   :  { %v881_v39 = vmul.f32 %v850_v38, %v3139_v8  ;;  %v874_v5 = vmul.f32 %v819_v35, %v3158_v13 }
 0x451   :  { %v911_v1 = vsel %vm149_vm0, %v881_v39, 0.0  ;;  %v892_v3 = vsel %vm149_vm0, %v874_v5, 0.0  ;;  %v935_v4 = vsel %vm149_vm0, %v874_v5, -inf  ;;  %v954_v48 = vsel %vm149_vm0, %v881_v39, -inf }
 0x452   :  { %v846_v55 = vpop.permute.xlu1 %845  ;;  %v823_v41 = vpop.permute.xlu0 %822 }
 0x453   :  { %v880_v44 = vmul.f32 %v846_v55, %v3121_v2  ;;  %v887_v2 = vsel %vm149_vm0, %v871_v19, 0.0  ;;  %v875_v11 = vmul.f32 %v823_v41, %v3172_v17 }
 0x454   :  { %v889_v9 = vadd.f32 %v888_v60, %v887_v2 }
 0x455   :  { %v909_v46 = vsel %vm149_vm0, %v880_v44, 0.0  ;;  %v894_v34 = vsel %vm149_vm0, %v875_v11, 0.0  ;;  %v937_v38 = vsel %vm149_vm0, %v875_v11, -inf  ;;  %v953_v5 = vsel %vm149_vm0, %v880_v44, -inf }
 0x456   :  { %v910_v49 = vadd.f32 %v909_v46, %v908_v30  ;;  %v854_v58 = vpop.permute.xlu1 %853  ;;  %v858_v52 = vpop.permute.xlu0 %857  ;;  %v891_v31 = vadd.f32 %v890_v15, %v889_v9 }
 0x457   :  { %v882_v0 = vmul.f32 %v854_v58, %v3153_v12  ;;  %v933_v12 = vsel %vm149_vm0, %v873_v59, -inf  ;;  %v883_v13 = vmul.f32 %v858_v52, %v3167_v16  ;;  %v952_v16 = vsel %vm149_vm0, %v879_v53, -inf }
 0x458   :  { %v912_v61 = vadd.f32 %v911_v1, %v910_v49  ;;  %v934_v50 = vmax.f32 %v931_v23, %v933_v12  ;;  %v893_v51 = vadd.f32 %v892_v3, %v891_v31  ;;  %v955_v19 = vmax.f32 %v952_v16, %v954_v48 }
 0x459   :  { %v913_v18 = vsel %vm149_vm0, %v882_v0, 0.0  ;;  %v915_v55 = vsel %vm149_vm0, %v883_v13, 0.0  ;;  %v956_v46 = vsel %vm149_vm0, %v882_v0, -inf  ;;  %v958_v59 = vsel %vm149_vm0, %v883_v13, -inf }
 0x45a   :  { %v827_v63 = vpop.permute.xlu1 %826  ;;  %v831_v8 = vpop.permute.xlu0 %830  ;;  %v914_v47 = vadd.f32 %v913_v18, %v912_v61  ;;  %v895_v30 = vadd.f32 %v894_v34, %v893_v51  ;;  %v938_v52 = vmax.f32 %v934_v50, %v937_v38  ;;  %v959_v18 = vmax.f32 %v955_v19, %v958_v59  ;;  %v976_v59 = vld [vmem:[#allocation2 + $0x18] sm:$0xff] }
 0x45b   :  { %v876_v7 = vmul.f32 %v827_v63, %v3186_v21  ;;  %v877_v36 = vmul.f32 %v831_v8, %v3200_v25  ;;  %v936_v21 = vmax.f32 %v932_v10, %v935_v4  ;;  %v957_v8 = vmax.f32 %v953_v5, %v956_v46 }
 0x45c   :  { %v916_v39 = vadd.f32 %v915_v55, %v914_v47 }
 0x45d   :  { %v939_v41 = vsel %vm149_vm0, %v876_v7, -inf  ;;  %v896_v25 = vsel %vm149_vm0, %v876_v7, 0.0  ;;  %v941_v53 = vsel %vm149_vm0, %v877_v36, -inf  ;;  %v898_v12 = vsel %vm149_vm0, %v877_v36, 0.0 }
 0x45e   :  { %v862_v17 = vpop.permute.xlu1 %861  ;;  %v866_v35 = vpop.permute.xlu0 %865  ;;  %v940_v60 = vmax.f32 %v936_v21, %v939_v41  ;;  %v897_v1 = vadd.f32 %v896_v25, %v895_v30  ;;  %v942_v0 = vmax.f32 %v938_v52, %v941_v53  ;;  %v973_v30 = vld [vmem:[#allocation2] sm:$0xff]  ;;  %v975_v52 = vld [vmem:[#allocation2 + $0x10] sm:$0xff] }
 0x45f   :  { %v884_v40 = vmul.f32 %v862_v17, %v3181_v20  ;;  %v885_v49 = vmul.f32 %v866_v35, %v3195_v24 }
 0x460   :  { %v899_v13 = vadd.f32 %v898_v12, %v897_v1  ;;  %v2467_v1 = vpack.c.bf16 %v976_v59, %v975_v52 }
 0x461   :  { %v917_v6 = vsel %vm149_vm0, %v884_v40, 0.0  ;;  %v960_v61 = vsel %vm149_vm0, %v884_v40, -inf  ;;  %v919_v24 = vsel %vm149_vm0, %v885_v49, 0.0 }
 0x462   :  { %v835_v20 = vpop.permute.xlu1 %834  ;;  %v918_v2 = vadd.f32 %v917_v6, %v916_v39  ;;  %v961_v3 = vmax.f32 %v957_v8, %v960_v61  ;;  %v974_v39 = vld [vmem:[#allocation2 + $0x8] sm:$0xff]  ;;  %v977_v61 = vld [vmem:[#allocation2 + $0x20] sm:$0xff] }
 0x463   :  { %v878_v58 = vmul.f32 %v835_v20, %v3214_v29  ;;  %v962_v29 = vsel %vm149_vm0, %v885_v49, -inf }
 0x464   :  { %v920_v44 = vadd.f32 %v919_v24, %v918_v2  ;;  %v963_v31 = vmax.f32 %v959_v18, %v962_v29  ;;  %v980_v18 = vld [vmem:[#allocation2 + $0x38] sm:$0xff] }
 0x465   :  { %v943_v63 = vsel %vm149_vm0, %v878_v58, -inf  ;;  %v900_v7 = vsel %vm149_vm0, %v878_v58, 0.0  ;;  %v2464_v58 = vpack.c.bf16 %v974_v39, %v973_v30  ;;  %v2729_v39 = vld [vmem:[%s3728_s0 + $0x50] sm:$0xff] }
 0x466   :  { %v944_v15 = vmax.f32 %v940_v60, %v943_v63  ;;  %v870_v11 = vpop.permute.xlu1 %869  ;;  %v901_v34 = vadd.f32 %v900_v7, %v899_v13  ;;  %v978_v63 = vld [vmem:[#allocation2 + $0x28] sm:$0xff] }
 0x467   :  { %v886_v9 = vmul.f32 %v870_v11, %v3209_v28  ;;  %v979_v11 = vld [vmem:[#allocation2 + $0x30] sm:$0xff] }
 0x468   :  { %v945_v4 = vmax.f32 %v942_v0, %v944_v15  ;;  %v902_v51 = vrot.slane %v901_v34, 4  ;;  %v2470_v15 = vpack.c.bf16 %v978_v63, %v977_v61 }
 0x469   :  { %v921_v10 = vsel %vm149_vm0, %v886_v9, 0.0  ;;  %v964_v23 = vsel %vm149_vm0, %v886_v9, -inf  ;;  %v2473_v9 = vpack.c.bf16 %v980_v18, %v979_v11  ;;  %v2735_v11 = vld [vmem:[%s3728_s0 + $0x68] sm:$0xff] }
 0x46a   :  { %v946_v47 = vrot.slane %v945_v4, 4  ;;  %v922_v17 = vadd.f32 %v921_v10, %v920_v44  ;;  %v965_v48 = vmax.f32 %v961_v3, %v964_v23  ;;  %v903_v41 = vadd.f32 %v902_v51, %v901_v34 }
 0x46c   :  { %v947_v40 = vmax.f32 %v945_v4, %v946_v47  ;;  %v966_v50 = vmax.f32 %v963_v31, %v965_v48  ;;  %v923_v16 = vrot.slane %v922_v17, 4  ;;  %v904_v46 = vrot.slane %v903_v41, 2 }
 0x46d   :  { %v2921_v31 = vmov 1966171168  }
 0x46e   :  { %v948_v28 = vrot.slane %v947_v40, 2  ;;  %v967_v36 = vrot.slane %v966_v50, 4  ;;  %v924_v38 = vadd.f32 %v923_v16, %v922_v17  ;;  %v905_v5 = vadd.f32 %v904_v46, %v903_v41 }
 0x46f   :  { %v1147_v47 = vunpack.c.l.s4 %v2921_v31 }
 0x470   :  { %v949_v21 = vmax.f32 %v947_v40, %v948_v28  ;;  %v968_v35 = vmax.f32 %v966_v50, %v967_v36  ;;  %v925_v25 = vrot.slane %v924_v38, 2  ;;  %v906_v0 = vrot.slane %v905_v5, 1 }
 0x471   :  { %v1148_v17 = vunpack.c.0.s8 %v1147_v47 }
 0x472   :  { %v969_v55 = vrot.slane %v968_v35, 2  ;;  %v950_v19 = vrot.slane %v949_v21, 1  ;;  %v926_v60 = vadd.f32 %v925_v25, %v924_v38  ;;  %v907_v29 = vadd.f32 %v906_v0, %v905_v5  ;;  %v2727_v38 = vld [vmem:[%s3728_s0] sm:$0xff]  ;;  %v2734_v0 = vld [vmem:[%s3728_s0 + $0x28] sm:$0xff] }
 0x473   :  { %v1151_v48 = vsub.s32 %v1148_v17, %v3298_v14 }
 0x474   :  { %v970_v6 = vmax.f32 %v968_v35, %v969_v55  ;;  %v951_v53 = vmax.f32 %v949_v21, %v950_v19  ;;  %v927_v8 = vrot.slane %v926_v60, 1  ;;  %v929_v3 = vmul.f32 0.015625, %v907_v29  ;;  %v2726_v21 = vld [vmem:[%s3728_s0 + $0x8] sm:$0xff]  ;;  %v2728_v19 = vld [vmem:[%s3728_s0 + $0x10] sm:$0xff] }
 0x476   :  { %v971_v20 = vrot.slane %v970_v6, 1  ;;  %v928_v24 = vadd.f32 %v927_v8, %v926_v60 }
 0x478   :  { %v972_v49 = vmax.f32 %v970_v6, %v971_v20  ;;  %v930_v12 = vmul.f32 0.015625, %v928_v24 }
 0x47a   :  { %v991_v2 = vsel %vm388_vm9, %v972_v49, %v951_v53  ;;  %v1066_v44 = vsel %vm388_vm9, %v930_v12, %v929_v3  ;;  %v2730_v53 = vld [vmem:[%s3728_s0 + $0x18] sm:$0xff]  ;;  %v2737_v3 = vld [vmem:[%s3728_s0 + $0x40] sm:$0xff] }
 0x47b   :  { %2323 = vmatmul.mubr.msk.f32.vlgmr.msra.gmra.mrb[0].mxu0 %vm149_vm0, %v991_v2  ;;  %v2732_v2 = vld [vmem:[%s3728_s0 + $0x20] sm:$0xff] }
 0x47c   :  { %2465 = vmatpush3.bf16.msra.mxu0 %v2464_v58  ;;  %2341 = vmatprep.mubr.msk.f32.mxu0 %vm2919_vm1, %v2920_v45  ;;  %v2731_v58 = vld [vmem:[%s3728_s0 + $0x58] sm:$0xff] }
 0x47d   :  { %2466 = vmatprep.subr.bf16.mxu0 %v3752_v22 }
 0x480   :  { %2468 = vmatpush3.bf16.msra.mxu0 %v2467_v1  ;;  %v2733_v1 = vld [vmem:[%s3728_s0 + $0x60] sm:$0xff] }
 0x481   :  { %2469 = vmatprep.subr.bf16.mxu0 %v3752_v22 }
 0x484   :  { %2471 = vmatpush3.bf16.msra.mxu0 %v2470_v15 }
 0x485   :  { %2472 = vmatprep.subr.bf16.mxu0 %v3752_v22 }
 0x488   :  { %2474 = vmatpush3.bf16.msra.mxu0 %v2473_v9  ;;  %v2736_v9 = vld [vmem:[%s3728_s0 + $0x70] sm:$0xff] }
 0x48b   :  { %2342 = vmatmul.mubr.msk.f32.vlgmr.msra.gmra.mrb[0].mxu0 %vm149_vm0, %v1066_v44 }
 0x48c   :  { %1476 = vmatprep.mubr.f32.mxu0 %v2920_v45 }
 0x55e   :  { %v1135_v4 = vpop.f32.mrb[0].mxu0 }
 0x55f   :  { %v2071_v13 = vmul.f32 -1.442695, %v1135_v4  ;;  %v2343_v7 = vpop.f32.mrb[1].mxu0 }
 0x560   :  { %v2738_v7 = vld [vmem:[%s3728_s0 + $0x78] sm:$0xff] }
 0x561   :  { %2722 = vpow2.f32 %v2071_v13 }
 0x56b   :  { %v2723_v10 = vpop.eup %2722 }
 0x56c   :  { %v1142_v23 = vadd.f32 1.0, %v2723_v10 }
 0x56e   :  { %2724 = vrcp.f32 %v1142_v23  ;;  %v2739_v23 = vld [vmem:[%s3728_s0 + $0x48] sm:$0xff] }
 0x578   :  { %v2725_v34 = vpop.eup %2724 }
 0x579   :  { %v1152_v40 = vrot.slane %v2725_v34, %v1151_v48 }
 0x57b   :  { %v1153_v50 = vcombine.high %v1152_v40, %v1152_v40  ;;  %v1160_v28 = vrot.slane %v1152_v40, %v1151_v48 }
 0x57d   :  { %v1167_v16 = vrot.slane %v1153_v50, %v1151_v48  ;;  %v1171_v36 = vrot.slane %v1160_v28, %v3505_v56  ;;  %v2740_v48 = vld [vmem:[%s3728_s0 + $0x30] sm:$0xff]  ;;  %v2741_v50 = vld [vmem:[%s3728_s0 + $0x38] sm:$0xff] }
 0x57f   :  { %v1175_v51 = vrot.slane %v1167_v16, %v3505_v56  ;;  %v1179_v35 = vmul.f32 %v2726_v21, %v1171_v36  ;;  %v1178_v55 = vmul.f32 %v2727_v38, %v1171_v36  ;;  %v1180_v30 = vmul.f32 %v2728_v19, %v1171_v36  ;;  %v1360_v21 = vld [vmem:[#allocation7 + $0x28] sm:$0xff] }
 0x580   :  { %v1181_v49 = vmul.f32 %v2730_v53, %v1171_v36  ;;  %v1182_v5 = vmul.f32 %v2732_v2, %v1171_v36  ;;  %v1183_v15 = vmul.f32 %v2734_v0, %v1171_v36  ;;  %v1184_v34 = vmul.f32 %v2740_v48, %v1171_v36  ;;  %v1366_v53 = vld [vmem:[#allocation7 + $0x58] sm:$0xff]  ;;  %v1381_v48 = vld [vmem:[#allocation7 + $0xd0] sm:$0xff] }
 0x581   :  { %v1197_v41 = vsel %vm149_vm0, %v1179_v35, 0.0  ;;  %v1194_v6 = vsel %vm149_vm0, %v1178_v55, 0.0  ;;  %v1188_v25 = vmul.f32 %v2729_v39, %v1175_v51  ;;  %v1200_v20 = vsel %vm149_vm0, %v1180_v30, 0.0  ;;  %v1358_v35 = vld [vmem:[#allocation7 + $0x18] sm:$0xff]  ;;  %v1357_v39 = vld [vmem:[#allocation7 + $0x10] sm:$0xff] }
 0x582   :  { %1198 = vadd.xlane.f32.xlu1 %v1197_v41  ;;  %1195 = vadd.xlane.f32.xlu0 %v1194_v6  ;;  %v1189_v52 = vmul.f32 %v2731_v58, %v1175_v51  ;;  %v1203_v59 = vsel %vm149_vm0, %v1181_v49, 0.0  ;;  %v1190_v61 = vmul.f32 %v2733_v1, %v1175_v51  ;;  %v1206_v63 = vsel %vm149_vm0, %v1182_v5, 0.0  ;;  %v1362_v55 = vld [vmem:[#allocation7 + $0x38] sm:$0xff]  ;;  %v1355_v41 = vld [vmem:[#allocation7] sm:$0xff]  ;;  %v1365_v5 = vld [vmem:[#allocation7 + $0x50] sm:$0xff] }
 0x583   :  { %v1224_v46 = vsel %vm149_vm0, %v1188_v25, 0.0  ;;  %v1191_v18 = vmul.f32 %v2735_v11, %v1175_v51  ;;  %v1209_v24 = vsel %vm149_vm0, %v1183_v15, 0.0  ;;  %v1192_v12 = vmul.f32 %v2736_v9, %v1175_v51  ;;  %v1359_v6 = vld [vmem:[#allocation7 + $0x20] sm:$0xff]  ;;  %v1361_v25 = vld [vmem:[#allocation7 + $0x30] sm:$0xff]  ;;  %v1370_v58 = vld [vmem:[#allocation7 + $0x78] sm:$0xff] }
 0x584   :  { %v1227_v60 = vsel %vm149_vm0, %v1189_v52, 0.0  ;;  %v1230_v8 = vsel %vm149_vm0, %v1190_v61, 0.0  ;;  %v1186_v44 = vmul.f32 %v2737_v3, %v1175_v51  ;;  %v1193_v10 = vmul.f32 %v2738_v7, %v1175_v51  ;;  %v1363_v52 = vld [vmem:[#allocation7 + $0x40] sm:$0xff]  ;;  %v1369_v1 = vld [vmem:[#allocation7 + $0x70] sm:$0xff]  ;;  %v1374_v0 = vld [vmem:[#allocation7 + $0x98] sm:$0xff] }
 0x585   :  { %v1233_v29 = vsel %vm149_vm0, %v1191_v18, 0.0  ;;  %v1236_v4 = vsel %vm149_vm0, %v1192_v12, 0.0  ;;  %v1187_v31 = vmul.f32 %v2739_v23, %v1175_v51  ;;  %v1212_v40 = vsel %vm149_vm0, %v1184_v34, 0.0  ;;  %v1356_v51 = vld [vmem:[#allocation7 + $0x8] sm:$0xff]  ;;  %v1378_v11 = vld [vmem:[#allocation7 + $0xb8] sm:$0xff]  ;;  %v1371_v18 = vld [vmem:[#allocation7 + $0x80] sm:$0xff] }
 0x586   :  { %1201 = vadd.xlane.f32.xlu0 %v1200_v20  ;;  %1225 = vadd.xlane.f32.xlu1 %v1224_v46  ;;  %v1218_v13 = vsel %vm149_vm0, %v1186_v44, 0.0  ;;  %v1239_v47 = vsel %vm149_vm0, %v1193_v10, 0.0  ;;  %v1185_v28 = vmul.f32 %v2741_v50, %v1171_v36  ;;  %v2475_v38 = vpack.c.bf16 %v1360_v21, %v1356_v51  ;;  %v1364_v36 = vld [vmem:[#allocation7 + $0x48] sm:$0xff]  ;;  %v1373_v12 = vld [vmem:[#allocation7 + $0x90] sm:$0xff]  ;;  %v1382_v7 = vld [vmem:[#allocation7 + $0xd8] sm:$0xff] }
 0x587   :  { %v1221_v17 = vsel %vm149_vm0, %v1187_v31, 0.0  ;;  %v2491_v19 = vpack.c.bf16 %v1362_v55, %v1358_v35  ;;  %v2477_v30 = vpack.c.bf16 %v1359_v6, %v1355_v41  ;;  %v2493_v20 = vpack.c.bf16 %v1361_v25, %v1357_v39  ;;  %v1368_v46 = vld [vmem:[#allocation7 + $0x68] sm:$0xff]  ;;  %v1377_v3 = vld [vmem:[#allocation7 + $0xb0] sm:$0xff]  ;;  %v1386_v10 = vld [vmem:[#allocation7 + $0xf8] sm:$0xff] }
 0x588   :  { %v1215_v16 = vsel %vm149_vm0, %v1185_v28, 0.0  ;;  %2476 = vmatprep.subr.bf16.mxu0 %v2475_v38  ;;  %v2479_v49 = vpack.c.bf16 %v1368_v46, %v1364_v36  ;;  %v2497_v61 = vpack.c.bf16 %v1369_v1, %v1365_v5  ;;  %v1380_v44 = vld [vmem:[#allocation7 + $0xc8] sm:$0xff]  ;;  %v2503_v31 = vpack.c.bf16 %v1386_v10, %v1382_v7  ;;  %v1561_v28 = vld [vmem:[#allocation8 + $0x18] sm:$0xff] }
 0x589   :  { %2492 = vmatprep.subr.bf16.mxu1 %v2491_v19  ;;  %2478 = vmatpush1.bf16.msra.mxu0 %v2477_v30  ;;  %v1559_v50 = vld [vmem:[#allocation8 + $0x8] sm:$0xff] }
 0x58a   :  { %1204 = vadd.xlane.f32.xlu0 %v1203_v59  ;;  %1228 = vadd.xlane.f32.xlu1 %v1227_v60  ;;  %v1367_v59 = vld [vmem:[#allocation7 + $0x60] sm:$0xff]  ;;  %v2495_v60 = vpack.c.bf16 %v1370_v58, %v1366_v53  ;;  %v2507_v51 = vpack.c.bf16 %v1561_v28, %v1559_v50 }
 0x58b   :  { %2494 = vmatpush1.bf16.msra.mxu1 %v2493_v20  ;;  %v2481_v2 = vpack.c.bf16 %v1367_v59, %v1363_v52  ;;  %2480 = vmatprep.subr.bf16.mxu0 %v2479_v49 }
 0x58c   :  { %2496 = vmatprep.subr.bf16.mxu1 %v2495_v60 }
 0x58d   :  { %2482 = vmatpush1.bf16.msra.mxu0 %v2481_v2 }
 0x58e   :  { %1207 = vadd.xlane.f32.xlu0 %v1206_v63  ;;  %1231 = vadd.xlane.f32.xlu1 %v1230_v8  ;;  %v1372_v63 = vld [vmem:[#allocation7 + $0x88] sm:$0xff] }
 0x58f   :  { %v1376_v8 = vld [vmem:[#allocation7 + $0xa8] sm:$0xff]  ;;  %2498 = vmatpush1.bf16.msra.mxu1 %v2497_v61 }
 0x590   :  { %v2483_v15 = vpack.c.bf16 %v1376_v8, %v1372_v63 }
 0x592   :  { %1210 = vadd.xlane.f32.xlu0 %v1209_v24  ;;  %1234 = vadd.xlane.f32.xlu1 %v1233_v29  ;;  %v1375_v24 = vld [vmem:[#allocation7 + $0xa0] sm:$0xff]  ;;  %v2499_v29 = vpack.c.bf16 %v1378_v11, %v1374_v0 }
 0x593   :  { %v2485_v9 = vpack.c.bf16 %v1375_v24, %v1371_v18  ;;  %2484 = vmatprep.subr.bf16.mxu0 %v2483_v15 }
 0x594   :  { %2500 = vmatprep.subr.bf16.mxu1 %v2499_v29 }
 0x595   :  { %2486 = vmatpush1.bf16.msra.mxu0 %v2485_v9 }
 0x596   :  { %1237 = vadd.xlane.f32.xlu1 %v1236_v4  ;;  %1219 = vadd.xlane.f32.xlu0 %v1218_v13  ;;  %v2501_v4 = vpack.c.bf16 %v1377_v3, %v1373_v12  ;;  %v1384_v13 = vld [vmem:[#allocation7 + $0xe8] sm:$0xff] }
 0x597   :  { %v2487_v23 = vpack.c.bf16 %v1384_v13, %v1380_v44 }
 0x598   :  { %2502 = vmatpush1.bf16.msra.mxu1 %v2501_v4 }
 0x599   :  { %2488 = vmatprep.subr.bf16.mxu0 %v2487_v23  ;;  %2504 = vmatprep.subr.bf16.mxu1 %v2503_v31 }
 0x59a   :  { %1240 = vadd.xlane.f32.xlu1 %v1239_v47  ;;  %1222 = vadd.xlane.f32.xlu0 %v1221_v17  ;;  %v1379_v47 = vld [vmem:[#allocation7 + $0xc0] sm:$0xff] }
 0x59b   :  { %v1383_v17 = vld [vmem:[#allocation7 + $0xe0] sm:$0xff] }
 0x59c   :  { %v2489_v34 = vpack.c.bf16 %v1383_v17, %v1379_v47 }
 0x59e   :  { %1213 = vadd.xlane.f32.xlu0 %v1212_v40  ;;  %v1385_v40 = vld [vmem:[#allocation7 + $0xf0] sm:$0xff]  ;;  %2490 = vmatpush1.bf16.msra.mxu0 %v2489_v34 }
 0x59f   :  { %2508 = vmatprep.subr.bf16.mxu0 %v2507_v51 }
 0x5a2   :  { %1216 = vadd.xlane.f32.xlu0 %v1215_v16  ;;  %v2505_v16 = vpack.c.bf16 %v1385_v40, %v1381_v48 }
 0x5a4   :  { %2506 = vmatpush1.bf16.msra.mxu1 %v2505_v16 }
 0x60f   :  { %v1199_v21 = vpop.xlane.xlu1 %1198  ;;  %v1196_v35 = vpop.xlane.xlu0 %1195 }
 0x610   :  { %v1243_v36 = vmul.f32 0.015625, %v1199_v21  ;;  %v1242_v46 = vmul.f32 0.015625, %v1196_v35 }
 0x612   :  { %v1281_v1 = vrot.slane %v1243_v36, %v3304_v32  ;;  %v1277_v61 = vrot.slane %v1242_v46, %v3301_v27 }
 0x613   :  { %v1202_v38 = vpop.xlane.xlu0 %1201  ;;  %v1226_v55 = vpop.xlane.xlu1 %1225 }
 0x614   :  { %v1244_v58 = vmul.f32 0.015625, %v1202_v38  ;;  %v1252_v52 = vmul.f32 0.015625, %v1226_v55  ;;  %v1282_v10 = vsel %vm305_vm2, %v1281_v1, %v1277_v61  ;;  %v1558_v55 = vld [vmem:[#allocation8] sm:$0xff]  ;;  %v1573_v1 = vld [vmem:[#allocation8 + $0x78] sm:$0xff] }
 0x616   :  { %v1286_v24 = vrot.slane %v1244_v58, %v3307_v33  ;;  %v1325_v29 = vrot.slane %v1252_v52, %v3307_v33  ;;  %v1567_v58 = vld [vmem:[#allocation8 + $0x48] sm:$0xff] }
 0x617   :  { %v1205_v41 = vpop.xlane.xlu0 %1204  ;;  %v1229_v6 = vpop.xlane.xlu1 %1228 }
 0x618   :  { %v1245_v60 = vmul.f32 0.015625, %v1205_v41  ;;  %v1253_v2 = vmul.f32 0.015625, %v1229_v6  ;;  %v1560_v41 = vld [vmem:[#allocation8 + $0x10] sm:$0xff]  ;;  %v1563_v6 = vld [vmem:[#allocation8 + $0x28] sm:$0xff] }
 0x61a   :  { %v1291_v44 = vrot.slane %v1245_v60, %v3310_v37  ;;  %v1330_v4 = vrot.slane %v1253_v2, %v3310_v37  ;;  %v1287_v37 = vsel %vm312_vm3, %v1286_v24, %v1282_v10  ;;  %v1566_v60 = vld [vmem:[#allocation8 + $0x40] sm:$0xff]  ;;  %v1568_v2 = vld [vmem:[#allocation8 + $0x50] sm:$0xff]  ;;  %v1585_v10 = vld [vmem:[#allocation8 + $0xd8] sm:$0xff] }
 0x61b   :  { %v1208_v19 = vpop.xlane.xlu0 %1207  ;;  %v1232_v30 = vpop.xlane.xlu1 %1231  ;;  %v2517_v61 = vpack.c.bf16 %v1568_v2, %v1566_v60  ;;  %v1574_v24 = vld [vmem:[#allocation8 + $0x80] sm:$0xff] }
 0x61c   :  { %v1246_v63 = vmul.f32 0.015625, %v1208_v19  ;;  %v1254_v8 = vmul.f32 0.015625, %v1232_v30  ;;  %v1565_v19 = vld [vmem:[#allocation8 + $0x38] sm:$0xff]  ;;  %v1606_v2 = vld [vmem:[#allocation8 + $0x180] sm:$0xff] }
 0x61d   :  { %v2511_v46 = vpack.c.bf16 %v1565_v19, %v1563_v6  ;;  %v1601_v6 = vld [vmem:[#allocation8 + $0x158] sm:$0xff] }
 0x61f   :  { %v1211_v39 = vpop.xlane.xlu0 %1210  ;;  %v1235_v25 = vpop.xlane.xlu1 %1234 }
 0x620   :  { %v1247_v0 = vmul.f32 0.015625, %v1211_v39  ;;  %v1255_v15 = vmul.f32 0.015625, %v1235_v25 }
 0x622   :  { %v1301_v33 = vrot.slane %v1247_v0, %v3316_v54  ;;  %v1340_v31 = vrot.slane %v1255_v15, %v3316_v54  ;;  %v1575_v0 = vld [vmem:[#allocation8 + $0x88] sm:$0xff]  ;;  %v1577_v15 = vld [vmem:[#allocation8 + $0x98] sm:$0xff] }
 0x623   :  { %v1220_v20 = vpop.xlane.xlu0 %1219  ;;  %v1238_v53 = vpop.xlane.xlu1 %1237 }
 0x624   :  { %v1250_v49 = vmul.f32 0.015625, %v1220_v20  ;;  %v1256_v9 = vmul.f32 0.015625, %v1238_v53  ;;  %v2509_v20 = vpack.c.bf16 %v1560_v41, %v1558_v55  ;;  %v1562_v53 = vld [vmem:[#allocation8 + $0x20] sm:$0xff]  ;;  %v1596_v41 = vld [vmem:[#allocation8 + $0x130] sm:$0xff] }
 0x625   :  { %v1594_v55 = vld [vmem:[#allocation8 + $0x120] sm:$0xff] }
 0x626   :  { %v1316_v11 = vrot.slane %v1250_v49, %v3301_v27  ;;  %v1296_v27 = vrot.slane %v1246_v63, %v3313_v43  ;;  %v1345_v48 = vrot.slane %v1256_v9, %v3319_v57  ;;  %v1564_v49 = vld [vmem:[#allocation8 + $0x30] sm:$0xff]  ;;  %v1570_v63 = vld [vmem:[#allocation8 + $0x60] sm:$0xff]  ;;  %v1579_v9 = vld [vmem:[#allocation8 + $0xa8] sm:$0xff]  ;;  %v2545_v19 = vpack.c.bf16 %v1596_v41, %v1594_v55 }
 0x627   :  { %v1223_v59 = vpop.xlane.xlu0 %1222  ;;  %v1241_v12 = vpop.xlane.xlu1 %1240  ;;  %v2513_v52 = vpack.c.bf16 %v1564_v49, %v1562_v53  ;;  %v1602_v49 = vld [vmem:[#allocation8 + $0x160] sm:$0xff]  ;;  %v1864_v55 = vld [vmem:[#allocation10 + $0xb0] sm:$0xff]  ;;  %v1865_v41 = vld [vmem:[#allocation10 + $0xb8] sm:$0xff] }
 0x628   :  { %v1251_v5 = vmul.f32 0.015625, %v1223_v59  ;;  %v1257_v47 = vmul.f32 0.015625, %v1241_v12  ;;  %v1581_v12 = vld [vmem:[#allocation8 + $0xb8] sm:$0xff] }
 0x62a   :  { %v1320_v18 = vrot.slane %v1251_v5, %v3304_v32  ;;  %v1335_v32 = vrot.slane %v1254_v8, %v3313_v43  ;;  %v1292_v43 = vsel %vm319_vm4, %v1291_v44, %v1287_v37  ;;  %v1350_v35 = vrot.slane %v1257_v47, %v3332_v26  ;;  %v1571_v5 = vld [vmem:[#allocation8 + $0x68] sm:$0xff]  ;;  %v1572_v8 = vld [vmem:[#allocation8 + $0x70] sm:$0xff]  ;;  %v1589_v47 = vld [vmem:[#allocation8 + $0xf8] sm:$0xff] }
 0x62b   :  { %v1214_v3 = vpop.xlane.xlu0 %1213  ;;  %v1297_v51 = vsel %vm326_vm5, %v1296_v27, %v1292_v43  ;;  %v2527_v44 = vpack.c.bf16 %v1581_v12, %v1579_v9  ;;  %v1616_v9 = vld [vmem:[#allocation8 + $0x1d0] sm:$0xff] }
 0x62c   :  { %v1321_v13 = vsel %vm305_vm2, %v1320_v18, %v1316_v11  ;;  %v1248_v7 = vmul.f32 0.015625, %v1214_v3  ;;  %v1302_v21 = vsel %vm333_vm6, %v1301_v33, %v1297_v51  ;;  %v2521_v11 = vpack.c.bf16 %v1572_v8, %v1570_v63  ;;  %v1584_v33 = vld [vmem:[#allocation8 + $0xd0] sm:$0xff]  ;;  %v1610_v8 = vld [vmem:[#allocation8 + $0x1a0] sm:$0xff] }
 0x62d   :  { %v1326_v23 = vsel %vm312_vm3, %v1325_v29, %v1321_v13  ;;  %v2523_v18 = vpack.c.bf16 %v1577_v15, %v1575_v0  ;;  %v1576_v29 = vld [vmem:[#allocation8 + $0x90] sm:$0xff]  ;;  %v1615_v15 = vld [vmem:[#allocation8 + $0x1c8] sm:$0xff] }
 0x62e   :  { %v1331_v17 = vsel %vm319_vm4, %v1330_v4, %v1326_v23  ;;  %v1306_v40 = vrot.slane %v1248_v7, %v3319_v57  ;;  %v2525_v3 = vpack.c.bf16 %v1576_v29, %v1574_v24  ;;  %v1578_v4 = vld [vmem:[#allocation8 + $0xa0] sm:$0xff]  ;;  %v1580_v13 = vld [vmem:[#allocation8 + $0xb0] sm:$0xff]  ;;  %v1583_v7 = vld [vmem:[#allocation8 + $0xc8] sm:$0xff] }
 0x62f   :  { %v1336_v34 = vsel %vm326_vm5, %v1335_v32, %v1331_v17  ;;  %v1217_v50 = vpop.xlane.xlu0 %1216  ;;  %v2529_v27 = vpack.c.bf16 %v1580_v13, %v1578_v4  ;;  %v2531_v32 = vpack.c.bf16 %v1585_v10, %v1583_v7  ;;  %v1582_v23 = vld [vmem:[#allocation8 + $0xc0] sm:$0xff]  ;;  %v1592_v51 = vld [vmem:[#allocation8 + $0x110] sm:$0xff] }
 0x630   :  { %v1341_v28 = vsel %vm333_vm6, %v1340_v31, %v1336_v34  ;;  %v1249_v16 = vmul.f32 0.015625, %v1217_v50  ;;  %v1307_v57 = vsel %vm340_vm7, %v1306_v40, %v1302_v21  ;;  %v1587_v31 = vld [vmem:[#allocation8 + $0xe8] sm:$0xff]  ;;  %v2533_v17 = vpack.c.bf16 %v1584_v33, %v1582_v23  ;;  %v1588_v34 = vld [vmem:[#allocation8 + $0xf0] sm:$0xff]  ;;  %v1593_v50 = vld [vmem:[#allocation8 + $0x118] sm:$0xff] }
 0x631   :  { %v1346_v54 = vsel %vm340_vm7, %v1345_v48, %v1341_v28  ;;  %v2535_v37 = vpack.c.bf16 %v1589_v47, %v1587_v31  ;;  %v1586_v48 = vld [vmem:[#allocation8 + $0xe0] sm:$0xff]  ;;  %v1591_v40 = vld [vmem:[#allocation8 + $0x108] sm:$0xff]  ;;  %v1597_v21 = vld [vmem:[#allocation8 + $0x138] sm:$0xff] }
 0x632   :  { %v1311_v38 = vrot.slane %v1249_v16, %v3332_v26  ;;  %v1351_v30 = vsel %vm347_vm8, %v1350_v35, %v1346_v54  ;;  %v1569_v26 = vld [vmem:[#allocation8 + $0x58] sm:$0xff]  ;;  %v2537_v43 = vpack.c.bf16 %v1588_v34, %v1586_v48  ;;  %v2539_v28 = vpack.c.bf16 %v1593_v50, %v1591_v40  ;;  %v1590_v16 = vld [vmem:[#allocation8 + $0x100] sm:$0xff]  ;;  %v1595_v54 = vld [vmem:[#allocation8 + $0x128] sm:$0xff] }
 0x633   :  { %v2515_v59 = vpack.c.bf16 %v1569_v26, %v1567_v58  ;;  %v2541_v35 = vpack.c.bf16 %v1592_v51, %v1590_v16  ;;  %v1604_v58 = vld [vmem:[#allocation8 + $0x170] sm:$0xff]  ;;  %v1607_v26 = vld [vmem:[#allocation8 + $0x188] sm:$0xff]  ;;  %v1614_v29 = vld [vmem:[#allocation8 + $0x1c0] sm:$0xff] }
 0x634   :  { %v1312_v39 = vsel %vm347_vm8, %v1311_v38, %v1307_v57  ;;  %v2543_v38 = vpack.c.bf16 %v1597_v21, %v1595_v54  ;;  %v1599_v57 = vld [vmem:[#allocation8 + $0x148] sm:$0xff]  ;;  %v1612_v0 = vld [vmem:[#allocation8 + $0x1b0] sm:$0xff]  ;;  %v2565_v12 = vpack.c.bf16 %v1616_v9, %v1614_v29  ;;  %v1618_v4 = vld [vmem:[#allocation8 + $0x1e0] sm:$0xff] }
 0x635   :  { %v1352_v25 = vsel %vm388_vm9, %v1351_v30, %v1312_v39  ;;  %v2547_v30 = vpack.c.bf16 %v1601_v6, %v1599_v57  ;;  %v1598_v39 = vld [vmem:[#allocation8 + $0x140] sm:$0xff]  ;;  %v1620_v7 = vld [vmem:[#allocation8 + $0x1f0] sm:$0xff]  ;;  %v1859_v31 = vld [vmem:[#allocation10 + $0x88] sm:$0xff]  ;;  %v2647_v6 = vpack.c.bf16 %v1865_v41, %v1864_v55 }
 0x636   :  { %v1354_v36 = vmul.f32 %v3507_v42, %v1352_v25  ;;  %v2519_v42 = vpack.c.bf16 %v1573_v1, %v1571_v5  ;;  %v1600_v25 = vld [vmem:[#allocation8 + $0x150] sm:$0xff]  ;;  %v1611_v1 = vld [vmem:[#allocation8 + $0x1a8] sm:$0xff]  ;;  %v2569_v10 = vpack.c.bf16 %v1620_v7, %v1618_v4  ;;  %v1858_v33 = vld [vmem:[#allocation10 + $0x80] sm:$0xff] }
 0x637   :  { %v1608_v5 = vld [vmem:[#allocation8 + $0x190] sm:$0xff]  ;;  %v1842_v47 = vld [vmem:[#allocation10] sm:$0xff]  ;;  %v1861_v34 = vld [vmem:[#allocation10 + $0x98] sm:$0xff] }
 0x638   :  { %2072 = vmatmul.mubr.msk.f32.vlgmr.msra.gmra.mrb[2].mxu0 %vm149_vm0, %v1354_v36  ;;  %2073 = vmatmul.mubr.msk.f32.vlgmr.msra.gmra.mrb[6].mxu1 %vm149_vm0, %v1354_v36  ;;  %v1605_v36 = vld [vmem:[#allocation8 + $0x178] sm:$0xff]  ;;  %v1860_v48 = vld [vmem:[#allocation10 + $0x90] sm:$0xff]  ;;  %v1862_v16 = vld [vmem:[#allocation10 + $0xa0] sm:$0xff] }
 0x639   :  { %2510 = vmatpush1.bf16.msra.mxu0 %v2509_v20  ;;  %v1603_v20 = vld [vmem:[#allocation8 + $0x168] sm:$0xff]  ;;  %v2639_v50 = vpack.c.bf16 %v1861_v34, %v1860_v48  ;;  %v1629_v7 = vld [vmem:[#allocation8 + $0x238] sm:$0xff] }
 0x63a   :  { %2512 = vmatprep.subr.bf16.mxu0 %v2511_v46  ;;  %v2549_v46 = vpack.c.bf16 %v1600_v25, %v1598_v39  ;;  %v2551_v53 = vpack.c.bf16 %v1605_v36, %v1603_v20  ;;  %v1863_v51 = vld [vmem:[#allocation10 + $0xa8] sm:$0xff]  ;;  %v1866_v39 = vld [vmem:[#allocation10 + $0xc0] sm:$0xff] }
 0x63b   :  { %v2643_v21 = vpack.c.bf16 %v1863_v51, %v1862_v16  ;;  %v1867_v25 = vld [vmem:[#allocation10 + $0xc8] sm:$0xff] }
 0x63c   :  { %v2651_v36 = vpack.c.bf16 %v1867_v25, %v1866_v39 }
 0x63d   :  { %2514 = vmatpush1.bf16.msra.mxu0 %v2513_v52  ;;  %v1609_v52 = vld [vmem:[#allocation8 + $0x198] sm:$0xff] }
 0x63e   :  { %2516 = vmatprep.subr.bf16.mxu0 %v2515_v59  ;;  %v2553_v59 = vpack.c.bf16 %v1604_v58, %v1602_v49  ;;  %v2555_v60 = vpack.c.bf16 %v1609_v52, %v1607_v26  ;;  %v1868_v49 = vld [vmem:[#allocation10 + $0xd0] sm:$0xff]  ;;  %v1869_v58 = vld [vmem:[#allocation10 + $0xd8] sm:$0xff] }
 0x63f   :  { %v2655_v52 = vpack.c.bf16 %v1869_v58, %v1868_v49 }
 0x641   :  { %2518 = vmatpush1.bf16.msra.mxu0 %v2517_v61  ;;  %v1613_v61 = vld [vmem:[#allocation8 + $0x1b8] sm:$0xff] }
 0x642   :  { %2520 = vmatprep.subr.bf16.mxu0 %v2519_v42  ;;  %v2557_v42 = vpack.c.bf16 %v1608_v5, %v1606_v2  ;;  %v2559_v63 = vpack.c.bf16 %v1613_v61, %v1611_v1  ;;  %v1870_v2 = vld [vmem:[#allocation10 + $0xe0] sm:$0xff]  ;;  %v1871_v5 = vld [vmem:[#allocation10 + $0xe8] sm:$0xff] }
 0x643   :  { %v2659_v61 = vpack.c.bf16 %v1871_v5, %v1870_v2 }
 0x645   :  { %2522 = vmatpush1.bf16.msra.mxu0 %v2521_v11  ;;  %v1617_v11 = vld [vmem:[#allocation8 + $0x1d8] sm:$0xff] }
 0x646   :  { %2524 = vmatprep.subr.bf16.mxu0 %v2523_v18  ;;  %v2561_v18 = vpack.c.bf16 %v1612_v0, %v1610_v8  ;;  %v2563_v24 = vpack.c.bf16 %v1617_v11, %v1615_v15 }
 0x649   :  { %2526 = vmatpush1.bf16.msra.mxu0 %v2525_v3  ;;  %v1619_v3 = vld [vmem:[#allocation8 + $0x1e8] sm:$0xff] }
 0x64a   :  { %2528 = vmatprep.subr.bf16.mxu0 %v2527_v44  ;;  %v1621_v44 = vld [vmem:[#allocation8 + $0x1f8] sm:$0xff] }
 0x64b   :  { %v2567_v13 = vpack.c.bf16 %v1621_v44, %v1619_v3  ;;  %v1624_v3 = vld [vmem:[#allocation8 + $0x210] sm:$0xff] }
 0x64d   :  { %2530 = vmatpush1.bf16.msra.mxu0 %v2529_v27  ;;  %v1623_v27 = vld [vmem:[#allocation8 + $0x208] sm:$0xff] }
 0x64e   :  { %2532 = vmatprep.subr.bf16.mxu0 %v2531_v32  ;;  %v1625_v32 = vld [vmem:[#allocation8 + $0x218] sm:$0xff] }
 0x64f   :  { %v2571_v23 = vpack.c.bf16 %v1625_v32, %v1623_v27 }
 0x651   :  { %2534 = vmatpush1.bf16.msra.mxu0 %v2533_v17  ;;  %v2635_v17 = vpack.c.bf16 %v1859_v31, %v1858_v33  ;;  %v1626_v33 = vld [vmem:[#allocation8 + $0x220] sm:$0xff]  ;;  %v1628_v31 = vld [vmem:[#allocation8 + $0x230] sm:$0xff] }
 0x652   :  { %2536 = vmatprep.subr.bf16.mxu0 %v2535_v37  ;;  %v1843_v37 = vld [vmem:[#allocation10 + $0x8] sm:$0xff]  ;;  %v2577_v48 = vpack.c.bf16 %v1628_v31, %v1626_v33  ;;  %v1669_v31 = vld [vmem:[#allocation8 + $0x378] sm:$0xff] }
 0x653   :  { %v2637_v40 = vpack.c.bf16 %v1843_v37, %v1842_v47  ;;  %2636 = vmatprep.subr.bf16.mxu1 %v2635_v17  ;;  %v1631_v17 = vld [vmem:[#allocation8 + $0x248] sm:$0xff]  ;;  %v1633_v37 = vld [vmem:[#allocation8 + $0x258] sm:$0xff] }
 0x654   :  { %v2579_v34 = vpack.c.bf16 %v1633_v37, %v1631_v17  ;;  %v1667_v33 = vld [vmem:[#allocation8 + $0x368] sm:$0xff]  ;;  %v1666_v37 = vld [vmem:[#allocation8 + $0x360] sm:$0xff] }
 0x655   :  { %2538 = vmatpush1.bf16.msra.mxu0 %v2537_v43  ;;  %v1844_v43 = vld [vmem:[#allocation10 + $0x10] sm:$0xff]  ;;  %2638 = vmatpush3.bf16.msra.mxu1 %v2637_v40  ;;  %v1630_v40 = vld [vmem:[#allocation8 + $0x240] sm:$0xff]  ;;  %v2615_v17 = vpack.c.bf16 %v1669_v31, %v1667_v33  ;;  %v1959_v31 = vld [vmem:[#allocation11 + $0x38] sm:$0xff] }
 0x656   :  { %2540 = vmatprep.subr.bf16.mxu0 %v2539_v28  ;;  %v1845_v28 = vld [vmem:[#allocation10 + $0x18] sm:$0xff]  ;;  %2640 = vmatprep.subr.bf16.mxu1 %v2639_v50  ;;  %v1632_v50 = vld [vmem:[#allocation8 + $0x250] sm:$0xff] }
 0x657   :  { %v2641_v54 = vpack.c.bf16 %v1845_v28, %v1844_v43  ;;  %v1635_v43 = vld [vmem:[#allocation8 + $0x268] sm:$0xff]  ;;  %v1637_v28 = vld [vmem:[#allocation8 + $0x278] sm:$0xff]  ;;  %v2581_v16 = vpack.c.bf16 %v1632_v50, %v1630_v40  ;;  %v1958_v33 = vld [vmem:[#allocation11 + $0x30] sm:$0xff] }
 0x658   :  { %v2583_v51 = vpack.c.bf16 %v1637_v28, %v1635_v43  ;;  %v1673_v40 = vld [vmem:[#allocation8 + $0x398] sm:$0xff]  ;;  %v1670_v28 = vld [vmem:[#allocation8 + $0x380] sm:$0xff] }
 0x659   :  { %2542 = vmatpush1.bf16.msra.mxu0 %v2541_v35  ;;  %v1846_v35 = vld [vmem:[#allocation10 + $0x20] sm:$0xff]  ;;  %2642 = vmatpush3.bf16.msra.mxu1 %v2641_v54 }
 0x65a   :  { %2544 = vmatprep.subr.bf16.mxu0 %v2543_v38  ;;  %v1847_v38 = vld [vmem:[#allocation10 + $0x28] sm:$0xff]  ;;  %2644 = vmatprep.subr.bf16.mxu1 %v2643_v21  ;;  %v1634_v54 = vld [vmem:[#allocation8 + $0x260] sm:$0xff]  ;;  %v1636_v21 = vld [vmem:[#allocation8 + $0x270] sm:$0xff] }
 0x65b   :  { %v2645_v57 = vpack.c.bf16 %v1847_v38, %v1846_v35  ;;  %v1639_v35 = vld [vmem:[#allocation8 + $0x288] sm:$0xff]  ;;  %v1641_v38 = vld [vmem:[#allocation8 + $0x298] sm:$0xff]  ;;  %v2585_v55 = vpack.c.bf16 %v1636_v21, %v1634_v54 }
 0x65c   :  { %v2587_v41 = vpack.c.bf16 %v1641_v38, %v1639_v35  ;;  %v1677_v54 = vld [vmem:[#allocation8 + $0x3b8] sm:$0xff]  ;;  %v1674_v38 = vld [vmem:[#allocation8 + $0x3a0] sm:$0xff] }
 0x65d   :  { %2546 = vmatpush1.bf16.msra.mxu0 %v2545_v19  ;;  %v1848_v19 = vld [vmem:[#allocation10 + $0x30] sm:$0xff]  ;;  %2646 = vmatpush3.bf16.msra.mxu1 %v2645_v57  ;;  %v1638_v57 = vld [vmem:[#allocation8 + $0x280] sm:$0xff] }
 0x65e   :  { %2548 = vmatprep.subr.bf16.mxu0 %v2547_v30  ;;  %v1849_v30 = vld [vmem:[#allocation10 + $0x38] sm:$0xff]  ;;  %2648 = vmatprep.subr.bf16.mxu1 %v2647_v6  ;;  %v1640_v6 = vld [vmem:[#allocation8 + $0x290] sm:$0xff] }
 0x65f   :  { %v2649_v20 = vpack.c.bf16 %v1849_v30, %v1848_v19  ;;  %v1643_v19 = vld [vmem:[#allocation8 + $0x2a8] sm:$0xff]  ;;  %v1645_v30 = vld [vmem:[#allocation8 + $0x2b8] sm:$0xff]  ;;  %v2589_v39 = vpack.c.bf16 %v1640_v6, %v1638_v57 }
 0x660   :  { %v2591_v25 = vpack.c.bf16 %v1645_v30, %v1643_v19  ;;  %v1681_v57 = vld [vmem:[#allocation8 + $0x3d8] sm:$0xff]  ;;  %v1399_v19 = vsub.s32 2, %v3298_v14 }
 0x661   :  { %2550 = vmatpush1.bf16.msra.mxu0 %v2549_v46  ;;  %v1850_v46 = vld [vmem:[#allocation10 + $0x40] sm:$0xff]  ;;  %2650 = vmatpush3.bf16.msra.mxu1 %v2649_v20 }
 0x662   :  { %2552 = vmatprep.subr.bf16.mxu0 %v2551_v53  ;;  %v1851_v53 = vld [vmem:[#allocation10 + $0x48] sm:$0xff]  ;;  %2652 = vmatprep.subr.bf16.mxu1 %v2651_v36  ;;  %v1642_v20 = vld [vmem:[#allocation8 + $0x2a0] sm:$0xff]  ;;  %v1644_v36 = vld [vmem:[#allocation8 + $0x2b0] sm:$0xff] }
 0x663   :  { %v2653_v26 = vpack.c.bf16 %v1851_v53, %v1850_v46  ;;  %v1647_v46 = vld [vmem:[#allocation8 + $0x2c8] sm:$0xff]  ;;  %v1649_v53 = vld [vmem:[#allocation8 + $0x2d8] sm:$0xff]  ;;  %v2593_v49 = vpack.c.bf16 %v1644_v36, %v1642_v20 }
 0x664   :  { %v2595_v58 = vpack.c.bf16 %v1649_v53, %v1647_v46  ;;  %v1683_v20 = vld [vmem:[#allocation8 + $0x3e8] sm:$0xff]  ;;  %v1685_v36 = vld [vmem:[#allocation8 + $0x3f8] sm:$0xff] }
 0x665   :  { %2554 = vmatpush1.bf16.msra.mxu0 %v2553_v59  ;;  %v1852_v59 = vld [vmem:[#allocation10 + $0x50] sm:$0xff]  ;;  %2654 = vmatpush3.bf16.msra.mxu1 %v2653_v26  ;;  %v1646_v26 = vld [vmem:[#allocation8 + $0x2c0] sm:$0xff] }
 0x666   :  { %2556 = vmatprep.subr.bf16.mxu0 %v2555_v60  ;;  %v1853_v60 = vld [vmem:[#allocation10 + $0x58] sm:$0xff]  ;;  %2656 = vmatprep.subr.bf16.mxu1 %v2655_v52  ;;  %v1648_v52 = vld [vmem:[#allocation8 + $0x2d0] sm:$0xff] }
 0x667   :  { %v2657_v1 = vpack.c.bf16 %v1853_v60, %v1852_v59  ;;  %v1651_v59 = vld [vmem:[#allocation8 + $0x2e8] sm:$0xff]  ;;  %v1653_v60 = vld [vmem:[#allocation8 + $0x2f8] sm:$0xff]  ;;  %v2597_v2 = vpack.c.bf16 %v1648_v52, %v1646_v26  ;;  %v1684_v26 = vld [vmem:[#allocation8 + $0x3f0] sm:$0xff] }
 0x668   :  { %v2599_v5 = vpack.c.bf16 %v1653_v60, %v1651_v59  ;;  %v1854_v60 = vld [vmem:[#allocation10 + $0x60] sm:$0xff] }
 0x669   :  { %2558 = vmatpush1.bf16.msra.mxu0 %v2557_v42  ;;  %2658 = vmatpush3.bf16.msra.mxu1 %v2657_v1  ;;  %v3682_v42 = vld [vmem:[%s3736_s8] sm:$0xf] }
 0x66a   :  { %2560 = vmatprep.subr.bf16.mxu0 %v2559_v63  ;;  %2660 = vmatprep.subr.bf16.mxu1 %v2659_v61  ;;  %v1403_v63 = vsub.s32 3, %v3298_v14  ;;  %v1392_v8 = vrot.slane %v3682_v42, %v3505_v56  ;;  %v1396_v0 = vrot.slane %v3682_v42, %v3512_v62  ;;  %v1650_v1 = vld [vmem:[#allocation8 + $0x2e0] sm:$0xff]  ;;  %v1652_v61 = vld [vmem:[#allocation8 + $0x2f0] sm:$0xff]  ;;  %v1400_v53 = vrot.slane %v3682_v42, %v1399_v19 }
 0x66c   :  { %v1404_v15 = vrot.slane %v3682_v42, %v1403_v63  ;;  %v1655_v63 = vld [vmem:[#allocation8 + $0x308] sm:$0xff]  ;;  %v1857_v42 = vld [vmem:[#allocation10 + $0x78] sm:$0xff] }
 0x66d   :  { %2562 = vmatpush1.bf16.msra.mxu0 %v2561_v18 }
 0x66e   :  { %2564 = vmatprep.subr.bf16.mxu0 %v2563_v24 }
 0x671   :  { %2566 = vmatpush1.bf16.msra.mxu0 %v2565_v12  ;;  %v1622_v12 = vld [vmem:[#allocation8 + $0x200] sm:$0xff] }
 0x672   :  { %2568 = vmatprep.subr.bf16.mxu0 %v2567_v13  ;;  %v1627_v13 = vld [vmem:[#allocation8 + $0x228] sm:$0xff]  ;;  %v2573_v27 = vpack.c.bf16 %v1624_v3, %v1622_v12 }
 0x675   :  { %2570 = vmatpush1.bf16.msra.mxu0 %v2569_v10 }
 0x676   :  { %2572 = vmatprep.subr.bf16.mxu0 %v2571_v23  ;;  %v2575_v23 = vpack.c.bf16 %v1629_v7, %v1627_v13  ;;  %v1663_v13 = vld [vmem:[#allocation8 + $0x348] sm:$0xff]  ;;  %v1665_v7 = vld [vmem:[#allocation8 + $0x358] sm:$0xff] }
 0x70b   :  { %v1478_v11 = vpop.f32.mrb[2].mxu0  ;;  %v3690_v18 = vpop.f32.mrb[6].mxu1 }
 0x70c   :  { %v1479_v24 = vadd.f32 %v1478_v11, %v1392_v8  ;;  %v1480_v29 = vpop.f32.mrb[3].mxu0  ;;  %v1551_v9 = vpop.f32.mrb[7].mxu1  ;;  %v1657_v8 = vld [vmem:[#allocation8 + $0x318] sm:$0xff]  ;;  %v1654_v11 = vld [vmem:[#allocation8 + $0x300] sm:$0xff]  ;;  %v1550_v59 = vadd.f32 %v3690_v18, %v1400_v53 }
 0x70d   :  { %v1481_v44 = vadd.f32 %v1480_v29, %v1396_v0  ;;  %v1552_v4 = vadd.f32 %v1551_v9, %v1404_v15  ;;  %v2601_v0 = vpack.c.bf16 %v1652_v61, %v1650_v1  ;;  %v2603_v15 = vpack.c.bf16 %v1657_v8, %v1655_v63  ;;  %v1659_v29 = vld [vmem:[#allocation8 + $0x328] sm:$0xff]  ;;  %v1661_v9 = vld [vmem:[#allocation8 + $0x338] sm:$0xff]  ;;  %v1872_v1 = vld [vmem:[#allocation10 + $0xf0] sm:$0xff] }
 0x70e   :  { %v1554_v32 = vmax.f32 %v1479_v24, 0.0  ;;  %v1656_v24 = vld [vmem:[#allocation8 + $0x310] sm:$0xff]  ;;  %v2607_v3 = vpack.c.bf16 %v1661_v9, %v1659_v29  ;;  %v1556_v14 = vmax.f32 %v1550_v59, 0.0  ;;  %v1873_v61 = vld [vmem:[#allocation10 + $0xf8] sm:$0xff]  ;;  %v1686_v18 = vld [vmem:[%s3738_s10] sm:$0x3] }
 0x70f   :  { %v1555_v10 = vmax.f32 %v1481_v44, 0.0  ;;  %v1557_v47 = vmax.f32 %v1552_v4, 0.0  ;;  %v2605_v12 = vpack.c.bf16 %v1656_v24, %v1654_v11  ;;  %v1658_v44 = vld [vmem:[#allocation8 + $0x320] sm:$0xff]  ;;  %v1660_v4 = vld [vmem:[#allocation8 + $0x330] sm:$0xff]  ;;  %v2663_v8 = vpack.c.bf16 %v1873_v61, %v1872_v1 }
 0x710   :  { %v1856_v63 = vld [vmem:[#allocation10 + $0x70] sm:$0xff]  ;;  %v1695_v11 = vrot.slane %v1686_v18, %v3512_v62  ;;  %v1957_v62 = vld [vmem:[#allocation11 + $0x28] sm:$0xff] }
 0x711   :  { %1762 = vmatprep.mubr.f32.mxu0 %v1555_v10  ;;  %v2609_v10 = vpack.c.bf16 %v1660_v4, %v1658_v44 }
 0x712   :  { %1763 = vmatmul.mubr.f32.vlgmr.msra.gmra.mrb[4].mxu0 %v1554_v32  ;;  %v1662_v32 = vld [vmem:[#allocation8 + $0x340] sm:$0xff] }
 0x713   :  { %2574 = vmatpush1.bf16.msra.mxu0 %v2573_v27  ;;  %1833 = vmatprep.mubr.f32.mxu0 %v1557_v47  ;;  %v2611_v27 = vpack.c.bf16 %v1665_v7, %v1663_v13 }
 0x714   :  { %2576 = vmatprep.subr.bf16.mxu0 %v2575_v23  ;;  %v1664_v23 = vld [vmem:[#allocation8 + $0x350] sm:$0xff] }
 0x715   :  { %v2613_v47 = vpack.c.bf16 %v1664_v23, %v1662_v32 }
 0x717   :  { %2578 = vmatpush1.bf16.msra.mxu0 %v2577_v48  ;;  %v1668_v48 = vld [vmem:[#allocation8 + $0x370] sm:$0xff] }
 0x718   :  { %2580 = vmatprep.subr.bf16.mxu0 %v2579_v34  ;;  %v1671_v34 = vld [vmem:[#allocation8 + $0x388] sm:$0xff]  ;;  %v2617_v50 = vpack.c.bf16 %v1668_v48, %v1666_v37 }
 0x719   :  { %v2619_v43 = vpack.c.bf16 %v1673_v40, %v1671_v34  ;;  %v1961_v37 = vld [vmem:[#allocation11 + $0x48] sm:$0xff]  ;;  %v1963_v34 = vld [vmem:[#allocation11 + $0x58] sm:$0xff] }
 0x71b   :  { %2582 = vmatpush1.bf16.msra.mxu0 %v2581_v16  ;;  %v1672_v16 = vld [vmem:[#allocation8 + $0x390] sm:$0xff] }
 0x71c   :  { %2584 = vmatprep.subr.bf16.mxu0 %v2583_v51  ;;  %v1675_v51 = vld [vmem:[#allocation8 + $0x3a8] sm:$0xff]  ;;  %v2621_v21 = vpack.c.bf16 %v1672_v16, %v1670_v28  ;;  %v1966_v16 = vld [vmem:[#allocation11 + $0x70] sm:$0xff] }
 0x71d   :  { %v2623_v35 = vpack.c.bf16 %v1677_v54, %v1675_v51  ;;  %v1967_v51 = vld [vmem:[#allocation11 + $0x78] sm:$0xff] }
 0x71e   :  { %v2689_v54 = vpack.c.bf16 %v1967_v51, %v1966_v16 }
 0x71f   :  { %2586 = vmatpush1.bf16.msra.mxu0 %v2585_v55  ;;  %v1676_v55 = vld [vmem:[#allocation8 + $0x3b0] sm:$0xff] }
 0x720   :  { %2588 = vmatprep.subr.bf16.mxu0 %v2587_v41  ;;  %v1679_v41 = vld [vmem:[#allocation8 + $0x3c8] sm:$0xff]  ;;  %v2625_v6 = vpack.c.bf16 %v1676_v55, %v1674_v38 }
 0x721   :  { %v2627_v30 = vpack.c.bf16 %v1681_v57, %v1679_v41 }
 0x723   :  { %2590 = vmatpush1.bf16.msra.mxu0 %v2589_v39  ;;  %v1678_v39 = vld [vmem:[#allocation8 + $0x3c0] sm:$0xff] }
 0x724   :  { %2592 = vmatprep.subr.bf16.mxu0 %v2591_v25  ;;  %v1680_v25 = vld [vmem:[#allocation8 + $0x3d0] sm:$0xff] }
 0x725   :  { %v2629_v46 = vpack.c.bf16 %v1680_v25, %v1678_v39 }
 0x727   :  { %2594 = vmatpush1.bf16.msra.mxu0 %v2593_v49  ;;  %v2631_v49 = vpack.c.bf16 %v1685_v36, %v1683_v20 }
 0x728   :  { %2596 = vmatprep.subr.bf16.mxu0 %v2595_v58  ;;  %v1682_v58 = vld [vmem:[#allocation8 + $0x3e0] sm:$0xff] }
 0x729   :  { %v2633_v52 = vpack.c.bf16 %v1684_v26, %v1682_v58 }
 0x72b   :  { %2598 = vmatpush1.bf16.msra.mxu0 %v2597_v2  ;;  %v1855_v2 = vld [vmem:[#allocation10 + $0x68] sm:$0xff] }
 0x72c   :  { %2600 = vmatprep.subr.bf16.mxu0 %v2599_v5  ;;  %v2661_v5 = vpack.c.bf16 %v1855_v2, %v1854_v60 }
 0x72e   :  { %2662 = vmatpush3.bf16.msra.mxu1 %v2661_v5 }
 0x72f   :  { %2602 = vmatpush1.bf16.msra.mxu0 %v2601_v0  ;;  %v2665_v0 = vpack.c.bf16 %v1857_v42, %v1856_v63  ;;  %2664 = vmatprep.subr.bf16.mxu1 %v2663_v8 }
 0x730   :  { %2604 = vmatprep.subr.bf16.mxu0 %v2603_v15  ;;  %v1691_v15 = vrot.slane %v1686_v18, %v3505_v56  ;;  %v1956_v56 = vld [vmem:[#allocation11 + $0x20] sm:$0xff] }
 0x731   :  { %v2674_v23 = vpack.c.bf16 %v1957_v62, %v1956_v56 }
 0x732   :  { %2666 = vmatpush3.bf16.msra.mxu1 %v2665_v0 }
 0x733   :  { %2606 = vmatpush1.bf16.msra.mxu0 %v2605_v12  ;;  %2667 = vmatprep.subr.bf16.mxu1 %v3752_v22  ;;  %v1952_v12 = vld [vmem:[#allocation11] sm:$0xff] }
 0x734   :  { %2608 = vmatprep.subr.bf16.mxu0 %v2607_v3  ;;  %v1953_v3 = vld [vmem:[#allocation11 + $0x8] sm:$0xff] }
 0x735   :  { %v2668_v13 = vpack.c.bf16 %v1953_v3, %v1952_v12 }
 0x737   :  { %2610 = vmatpush1.bf16.msra.mxu0 %v2609_v10  ;;  %v1954_v10 = vld [vmem:[#allocation11 + $0x10] sm:$0xff] }
 0x738   :  { %2612 = vmatprep.subr.bf16.mxu0 %v2611_v27  ;;  %v1955_v27 = vld [vmem:[#allocation11 + $0x18] sm:$0xff] }
 0x739   :  { %v2671_v32 = vpack.c.bf16 %v1955_v27, %v1954_v10 }
 0x73b   :  { %2614 = vmatpush1.bf16.msra.mxu0 %v2613_v47  ;;  %v2677_v47 = vpack.c.bf16 %v1959_v31, %v1958_v33 }
 0x73c   :  { %2616 = vmatprep.subr.bf16.mxu0 %v2615_v17  ;;  %v1960_v17 = vld [vmem:[#allocation11 + $0x40] sm:$0xff] }
 0x73d   :  { %v2680_v48 = vpack.c.bf16 %v1961_v37, %v1960_v17 }
 0x73f   :  { %2618 = vmatpush1.bf16.msra.mxu0 %v2617_v50  ;;  %v1964_v50 = vld [vmem:[#allocation11 + $0x60] sm:$0xff] }
 0x740   :  { %2620 = vmatprep.subr.bf16.mxu0 %v2619_v43  ;;  %v1965_v43 = vld [vmem:[#allocation11 + $0x68] sm:$0xff] }
 0x741   :  { %v2686_v28 = vpack.c.bf16 %v1965_v43, %v1964_v50 }
 0x743   :  { %2622 = vmatpush1.bf16.msra.mxu0 %v2621_v21 }
 0x744   :  { %2624 = vmatprep.subr.bf16.mxu0 %v2623_v35  ;;  %v2074_v35 = vld [vmem:[%s3740_s12] ss:$0 sm:$0xff] }
 0x747   :  { %2626 = vmatpush1.bf16.msra.mxu0 %v2625_v6  ;;  %v2075_v6 = vld [vmem:[%s3742_s14] ss:$0 sm:$0xff] }
 0x748   :  { %2628 = vmatprep.subr.bf16.mxu0 %v2627_v30 }
 0x74b   :  { %2630 = vmatpush1.bf16.msra.mxu0 %v2629_v46 }
 0x74c   :  { %2632 = vmatprep.subr.bf16.mxu0 %v2631_v49 }
 0x74f   :  { %2634 = vmatpush1.bf16.msra.mxu0 %v2633_v52 }
 0x752   :  { %1834 = vmatmul.mubr.f32.vlgmr.msra.gmra.mrb[4].mxu0 %v1556_v14 }
 0x825   :  { %v1835_v24 = vpop.f32.mrb[4].mxu0 }
 0x826   :  { %v2693_v29 = vadd.f32 %v1835_v24, %v1691_v15  ;;  %v1837_v9 = vpop.f32.mrb[5].mxu0 }
 0x827   :  { %v2694_v44 = vadd.f32 %v1837_v9, %v1695_v11 }
 0x828   :  { %v1840_v7 = vmax.f32 %v2693_v29, 0.0 }
 0x829   :  { %v1841_v4 = vmax.f32 %v2694_v44, 0.0 }
 0x82b   :  { %1945 = vmatprep.mubr.f32.mxu1 %v1841_v4 }
 0x82c   :  { %1946 = vmatmul.mubr.f32.vlgmr.msra.gmra.mrb[8].mxu1 %v1840_v7 }
 0x82d   :  { %2669 = vmatpush3.bf16.msra.mxu1 %v2668_v13  ;;  %2376 = vmatprep.mubr.msk.f32.mxu1 %vm2919_vm1, %v2920_v45  ;;  %v1962_v45 = vld [vmem:[#allocation11 + $0x50] sm:$0xff] }
 0x82e   :  { %2670 = vmatprep.subr.bf16.mxu1 %v3752_v22  ;;  %v2683_v40 = vpack.c.bf16 %v1963_v34, %v1962_v45 }
 0x831   :  { %2672 = vmatpush3.bf16.msra.mxu1 %v2671_v32 }
 0x832   :  { %2673 = vmatprep.subr.bf16.mxu1 %v3752_v22 }
 0x835   :  { %2675 = vmatpush3.bf16.msra.mxu1 %v2674_v23 }
 0x836   :  { %2676 = vmatprep.subr.bf16.mxu1 %v3752_v22 }
 0x839   :  { %2678 = vmatpush3.bf16.msra.mxu1 %v2677_v47 }
 0x83a   :  { %2679 = vmatprep.subr.bf16.mxu1 %v3752_v22 }
 0x83d   :  { %2681 = vmatpush3.bf16.msra.mxu1 %v2680_v48 }
 0x83e   :  { %2682 = vmatprep.subr.bf16.mxu1 %v3752_v22 }
 0x841   :  { %2684 = vmatpush3.bf16.msra.mxu1 %v2683_v40 }
 0x842   :  { %2685 = vmatprep.subr.bf16.mxu1 %v3752_v22 }
 0x845   :  { %2687 = vmatpush3.bf16.msra.mxu1 %v2686_v28 }
 0x846   :  { %2688 = vmatprep.subr.bf16.mxu1 %v3752_v22 }
 0x849   :  { %2690 = vmatpush3.bf16.msra.mxu1 %v2689_v54 }
 0x8ff   :  { %v2178_v21 = vpop.f32.mrb[8].mxu1 }
 0x900   :  { %v2179_v38 = vpop.f32.mrb[9].mxu1 }
 0x901   :  { %v2180_v55 = vadd.f32 %v2179_v38, %v2178_v21 }
 0x903   :  { %v1948_v41 = vadd.f32 %v2180_v55, %v2074_v35 }
 0x905   :  { %v1951_v57 = vmax.f32 %v1948_v41, 0.0 }
 0x907   :  { %2377 = vmatmul.mubr.f32.vlgmr.msra.gmra.mrb[10].mxu1 %v1951_v57 }
 0x9da   :  { %v2041_v19 = vpop.f32.mrb[10].mxu1 }
 0x9db   :  { %v2042_v30 = vadd.f32 %v2075_v6, %v2041_v19  ;;  %v2378_v22 = vpop.f32.mrb[11].mxu1 }
 0x9dd   :  { %2045 = vst [vmem:[#allocation13] sm:$0x3] %v2042_v30 }
 0x9de   :  { %2885 = shalt.err (!%p2882_p10)
}
 0x9df   :  { %s2886_s5 = scalar_lea.hbm %s3743_s15, 32 }
 0x9e0   :  { %p2887_p11 = scmp.ne.s32.totalorder %s3743_s15, %s2886_s5  ;;  %p2890_p12 = scmp.lt.u32.totalorder %s2886_s5, %s3743_s15 }
 0x9e2   :  { %p2892_p13 = pnand %p2890_p12, %p2887_p11 }
 0x9e4   :  { %2895 = shalt.err (!%p2892_p13)
}
 0x9e5   :  { %2055 = dma.vmem_to_hbm [thread:$0]  %s2053_s17, 32, %s3743_s15, [#allocation4]  }
 0x9e6   :  { %2904 = dma.done.wait [#allocation4], 32  }
 0x9e7   :  { %2905 = vsyncadd [#allocation4], 4294967264 }
 0x9e8   :  { %2059 = vsyncpa [#allocation3], 1 }
 0x9e9   :  { %2060 = vsyncpa [#allocation6], 1 }
 0x9ea   :  { %2061 = vsyncpa [#allocation9], 1 }
 0x9eb   :  { %2062 = vsyncpa [#allocation12], 1 }
 0x9ec   :  { %2063 = vsyncpa [#allocation4], 1 }

</bundles_post_ra>
